<compile_context>
chip_gen: v6e
topology: v6e:2x2x1
jax: 0.10.0
libtpu: 0.0.40
codegen_flags: <defaults>
</compile_context>

<pallas_src>
import jax
import jax.numpy as jnp
from jax import lax
from jax.experimental import pallas as pl
from jax.experimental.pallas import tpu as pltpu

NEG_SLOPE = 0.2
BN_EPS = 1e-5
_VMEM_LIMIT = 64 * 1024 * 1024


def _leaky(x):
    return jnp.where(x >= 0, x, NEG_SLOPE * x)


def _row_tile(n, target=256):
    """Largest row tile <= target that divides n (multiple of 8 when tiling)."""
    if n <= target:
        return n
    for t in range(target, 7, -8):
        if n % t == 0:
            return t
    return n


# ----------------------------- Pallas kernels ------------------------------

def gram_linear0_kernel(xt_ref, w0_ref, out_ref):
    # xt: (N, 3) point coords (channel-last), w0: (N, CF) linear0 weight (f32).
    # h = (d d^T) w0 == d (d^T w0): the (N, N) Gram matrix is never formed.
    xt = xt_ref[...]                                     # (N, 3) f32
    w0 = w0_ref[...]                                     # (N, CF) f32
    y = jnp.mean(xt, axis=1, keepdims=True)              # mean over coords (torch dim=1)
    d = y - xt                                           # (N, 3)
    lane = lax.broadcasted_iota(jnp.int32, d.shape, 1)
    acc = None
    for c in range(3):                                   # 3 rank-1 updates, pure VPU
        dc = jnp.sum(jnp.where(lane == c, d, 0.0), axis=1, keepdims=True)   # (N, 1) = d[:, c]
        tc = jnp.sum(dc * w0, axis=0, keepdims=True)                        # (1, CF) = (d^T w0)[c]
        upd = dc * tc                                                       # (N, CF)
        acc = upd if acc is None else acc + upd
    out_ref[...] = _leaky(acc)                           # linear0 + LeakyReLU


def pdist_kernel(rows_ref, full_ref, out_ref):
    # rows: (tn, C) query rows, full: (N, C). Output: torch-convention negative
    # squared pairwise distance (tn, N). Kept f32 so top-k ranking matches ref.
    fr = rows_ref[...]
    ff = full_ref[...]
    g = lax.dot_general(fr, ff, (((1,), (1,)), ((), ())),
                        preferred_element_type=jnp.float32)          # fr @ ff.T -> (tn, N)
    rn = jnp.sum(fr * fr, axis=1, keepdims=True)                     # (tn, 1) row norms
    sq = ff * ff
    ones = jnp.ones((1, ff.shape[1]), jnp.float32)
    cn = lax.dot_general(ones, sq, (((1,), (1,)), ((), ())),
                         preferred_element_type=jnp.float32)         # (1, N) column norms
    out_ref[...] = 2.0 * g - rn - cn


def edgeconv_kernel(src_ref, ctr_ref, idx_ref, w1_ref, wd_ref, shift_ref, out_ref):
    # src: (N, C) gather source, ctr: (tn, C) center rows, idx: (tn, K) int32.
    # Weights are pre-folded:  w1 = W1*scale,  wd = (W2-W1)*scale,  shift = BN shift.
    # Implements: max_j LeakyReLU(BN(W1 (x_j - x_i) + W2 x_i))
    #           = max_j LeakyReLU(proj_src[idx[i,j]] + center[i])
    bf = jnp.bfloat16
    f32 = jnp.float32
    src = src_ref[...].astype(bf)                        # (N, C)
    ctr = ctr_ref[...].astype(bf)                        # (tn, C)
    proj_src = jnp.dot(src, w1_ref[...],
                       preferred_element_type=f32).astype(bf)        # (N, Cout) gather source
    center = jnp.dot(ctr, wd_ref[...],
                     preferred_element_type=f32) + shift_ref[...]    # (tn, Cout) f32

    idx_f = idx_ref[...].astype(f32)                     # (tn, K); exact for idx < 2^24
    tn, k = idx_f.shape
    n_src = src_ref.shape[0]
    k_iota = lax.broadcasted_iota(jnp.int32, (tn, k), 1)
    n_iota = lax.broadcasted_iota(jnp.int32, (tn, n_src), 1).astype(f32)

    acc = None
    for j in range(k):                                   # small static K -> unrolled
        colf = jnp.sum(jnp.where(k_iota == j, idx_f, 0.0),
                       axis=1, keepdims=True)            # (tn, 1) = idx[:, j]
        onehot = jnp.where(colf == n_iota, 1.0, 0.0).astype(bf)          # (tn, N)
        g = jnp.dot(onehot, proj_src, preferred_element_type=f32)        # gather via MXU
        h = _leaky(g + center)
        acc = h if acc is None else jnp.maximum(acc, h)
    out_ref[...] = acc


def conv5_pool_kernel(x1_ref, x2_ref, x3_ref, x4_ref,
                      w1_ref, w2_ref, w3_ref, w4_ref, shift_ref, out_ref):
    # conv5 (1x1) applied to the implicit concat(x1..x4) via per-group weights
    # (BN scale pre-folded into the weights), then +shift, LeakyReLU, pooling.
    bf = jnp.bfloat16
    f32 = jnp.float32
    h = jnp.dot(x1_ref[...].astype(bf), w1_ref[...], preferred_element_type=f32)
    h = h + jnp.dot(x2_ref[...].astype(bf), w2_ref[...], preferred_element_type=f32)
    h = h + jnp.dot(x3_ref[...].astype(bf), w3_ref[...], preferred_element_type=f32)
    h = h + jnp.dot(x4_ref[...].astype(bf), w4_ref[...], preferred_element_type=f32)
    h = _leaky(h + shift_ref[...])
    mx = jnp.max(h, axis=0, keepdims=True)
    av = jnp.mean(h, axis=0, keepdims=True)
    out_ref[...] = jnp.concatenate([mx, av], axis=0)     # (2, E): row0=max, row1=avg


def head_kernel(x_ref, w1_ref, sh6_ref, w2_ref, b2_ref, w3_ref, b3_ref, out_ref):
    # x: (B, 2E). BN6/BN7 pre-folded into w1/w2 and the bias terms.
    # linear1 -> +sh6 -> lrelu -> linear2 -> +b2' -> lrelu -> linear3 -> +b3
    bf = jnp.bfloat16
    f32 = jnp.float32
    h = jnp.dot(x_ref[...].astype(bf), w1_ref[...], preferred_element_type=f32)
    h = _leaky(h + sh6_ref[...])                         # dp1 == identity (eval)
    h = jnp.dot(h.astype(bf), w2_ref[...], preferred_element_type=f32) + b2_ref[...]
    h = _leaky(h)                                        # dp2 == identity (eval)
    out_ref[...] = jnp.dot(h.astype(bf), w3_ref[...], preferred_element_type=f32) + b3_ref[...]


# ------------------------------ wrappers -----------------------------------

def run_gram_linear0(x_t, w0):
    B, N, _ = x_t.shape
    CF = w0.shape[1]
    return pl.pallas_call(
        gram_linear0_kernel,
        out_shape=jax.ShapeDtypeStruct((B, N, CF), jnp.float32),
        grid=(B,),
        in_specs=[pl.BlockSpec((None, N, 3), lambda b: (b, 0, 0)),
                  pl.BlockSpec((N, CF), lambda b: (0, 0))],
        out_specs=pl.BlockSpec((None, N, CF), lambda b: (b, 0, 0)),
        compiler_params=pltpu.CompilerParams(dimension_semantics=("parallel",)),
    )(x_t, w0)


def run_pdist(feat, row_tile=256):
    B, N, C = feat.shape
    tn = _row_tile(N, row_tile)
    return pl.pallas_call(
        pdist_kernel,
        out_shape=jax.ShapeDtypeStruct((B, N, N), jnp.float32),
        grid=(B, N // tn),
        in_specs=[pl.BlockSpec((None, tn, C), lambda b, i: (b, i, 0)),
                  pl.BlockSpec((None, N, C), lambda b, i: (b, 0, 0))],
        out_specs=pl.BlockSpec((None, tn, N), lambda b, i: (b, i, 0)),
        compiler_params=pltpu.CompilerParams(
            dimension_semantics=("parallel", "parallel"),
            vmem_limit_bytes=_VMEM_LIMIT),
    )(feat, feat)


def run_edgeconv(feat, idx, w1, wd, shift, row_tile=256):
    B, N, C = feat.shape
    K = idx.shape[-1]
    Cout = w1.shape[1]
    tn = _row_tile(N, row_tile)
    return pl.pallas_call(
        edgeconv_kernel,
        out_shape=jax.ShapeDtypeStruct((B, N, Cout), jnp.float32),
        grid=(B, N // tn),
        in_specs=[pl.BlockSpec((None, N, C), lambda b, i: (b, 0, 0)),    # gather source (full)
                  pl.BlockSpec((None, tn, C), lambda b, i: (b, i, 0)),   # center rows (tile)
                  pl.BlockSpec((None, tn, K), lambda b, i: (b, i, 0)),   # neighbor indices
                  pl.BlockSpec((C, Cout), lambda b, i: (0, 0)),          # W1*scale
                  pl.BlockSpec((C, Cout), lambda b, i: (0, 0)),          # (W2-W1)*scale
                  pl.BlockSpec((1, Cout), lambda b, i: (0, 0))],         # BN shift
        out_specs=pl.BlockSpec((None, tn, Cout), lambda b, i: (b, i, 0)),
        compiler_params=pltpu.CompilerParams(
            dimension_semantics=("parallel", "parallel"),
            vmem_limit_bytes=_VMEM_LIMIT),
    )(feat, feat, idx, w1, wd, shift)


def run_conv5_pool(xs, ws, shift):
    x1, x2, x3, x4 = xs
    w1, w2, w3, w4 = ws
    B, N, _ = x1.shape
    E = w1.shape[1]
    def xspec(a):
        return pl.BlockSpec((None, N, a.shape[2]), lambda b: (b, 0, 0))
    def wspec(a):
        return pl.BlockSpec(a.shape, lambda b: (0, 0))
    return pl.pallas_call(
        conv5_pool_kernel,
        out_shape=jax.ShapeDtypeStruct((B, 2, E), jnp.float32),
        grid=(B,),
        in_specs=[xspec(x1), xspec(x2), xspec(x3), xspec(x4),
                  wspec(w1), wspec(w2), wspec(w3), wspec(w4), wspec(shift)],
        out_specs=pl.BlockSpec((None, 2, E), lambda b: (b, 0, 0)),
        compiler_params=pltpu.CompilerParams(dimension_semantics=("parallel",),
                                             vmem_limit_bytes=_VMEM_LIMIT),
    )(x1, x2, x3, x4, w1, w2, w3, w4, shift)


def run_head(x, w1, sh6, w2, b2, w3, b3):
    B = x.shape[0]
    OUT = w3.shape[1]
    spec = lambda a: pl.BlockSpec(a.shape, lambda i: (0,) * a.ndim)
    args = (x, w1, sh6, w2, b2, w3, b3)
    return pl.pallas_call(
        head_kernel,
        out_shape=jax.ShapeDtypeStruct((B, OUT), jnp.float32),
        grid=(1,),
        in_specs=[spec(a) for a in args],
        out_specs=pl.BlockSpec((B, OUT), lambda i: (0, 0)),
    )(*args)


# ------------------------------ JAX glue ------------------------------------

def edge_block(feat, w1, wd, shift, k):
    """get_graph_feature + 1x1 conv + (folded) BN + LeakyReLU + max over neighbors."""
    pd = run_pdist(feat)                                  # (B, N, N) negative sq. distances
    # TODO(synk): top-k neighbor selection stays in XLA glue (no clean in-kernel sort).
    idx = lax.top_k(pd, k)[1]                             # (B, N, k) int32; self included (dist 0)
    return run_edgeconv(feat, idx, w1, wd, shift)         # gather fused into the kernel


def dgcnn_brute_forward(x, p, k):
    # x: (B, 3, N) -- same axis convention as the PyTorch module input
    B = x.shape[0]
    x_t = jnp.transpose(x, (0, 2, 1))                     # glue reshape -> (B, N, 3)
    h = run_gram_linear0(x_t, p['w0'])                    # (B, N, CF)
    x1 = edge_block(h,  *p['conv1'], k)                   # (B, N, 64)
    x2 = edge_block(x1, *p['conv2'], k)                   # (B, N, 64)
    x3 = edge_block(x2, *p['conv3'], k)                   # (B, N, 128)
    x4 = edge_block(x3, *p['conv4'], k)                   # (B, N, 256)
    pooled = run_conv5_pool((x1, x2, x3, x4), p['conv5_w'], p['conv5_shift'])  # (B, 2, E)
    feats = pooled.reshape(B, -1)                         # (B, 2E): [max || avg]
    return run_head(feats, p['w_l1'], p['sh6'],
                    p['w_l2'], p['b_l2'], p['w_l3'], p['b_l3'])


# ------------------------------ params --------------------------------------

def init_params(key, N, CF, EMB, OUT):
    """Random weights matching the torch module layout, with eval-mode BN
    pre-folded into the preceding matmul weights (zero forward-time cost)."""
    ks = list(jax.random.split(key, 40))

    def pop():
        return ks.pop()

    def w(shape, s=0.1):
        return s * jax.random.normal(pop(), shape)        # raw f32

    def bn(c):
        k1, k2, k3, k4 = jax.random.split(pop(), 4)
        gamma = 1.0 + 0.1 * jax.random.normal(k1, (1, c))
        beta = 0.1 * jax.random.normal(k2, (1, c))
        mean = 0.1 * jax.random.normal(k3, (1, c))
        var = 1.0 + 0.1 * jax.random.uniform(k4, (1, c))
        scale = gamma * jax.lax.rsqrt(var + BN_EPS)
        shift = beta - mean * scale
        return scale, shift

    def edge(cin, cout):
        # Conv2d(2*cin, cout) split into diff / center halves; BN folded:
        #   scale*(W1(x_j-x_i) + W2 x_i) + shift
        #     = x_j @ (W1*scale) + x_i @ ((W2-W1)*scale) + shift
        w1, w2 = w((cin, cout)), w((cin, cout))
        scale, shift = bn(cout)
        return ((w1 * scale).astype(jnp.bfloat16),
                ((w2 - w1) * scale).astype(jnp.bfloat16),
                shift.astype(jnp.float32))

    p = {}
    p['w0'] = w((N, CF)).astype(jnp.float32)              # nn.Linear(num_points, compact_feature)
    p['conv1'] = edge(CF, 64)
    p['conv2'] = edge(64, 64)
    p['conv3'] = edge(64, 128)
    p['conv4'] = edge(128, 256)
    # Conv1d(512, emb_dims) weight pre-split by input group (x1|x2|x3|x4 channels), BN5 folded.
    s5, sh5 = bn(EMB)
    p['conv5_w'] = tuple((w((c, EMB)) * s5).astype(jnp.bfloat16) for c in (64, 64, 128, 256))
    p['conv5_shift'] = sh5.astype(jnp.float32)
    s6, sh6 = bn(512)
    p['w_l1'] = (w((2 * EMB, 512)) * s6).astype(jnp.bfloat16)     # linear1 (no bias) + bn6 folded
    p['sh6'] = sh6.astype(jnp.float32)
    s7, sh7 = bn(256)
    p['w_l2'] = (w((512, 256)) * s7).astype(jnp.bfloat16)         # linear2 + bn7 folded
    p['b_l2'] = (w((1, 256)) * s7 + sh7).astype(jnp.float32)
    p['w_l3'] = w((256, OUT)).astype(jnp.bfloat16)
    p['b_l3'] = w((1, OUT)).astype(jnp.float32)
    return p


if __name__ == "__main__":
    # batch, num_points, k, compact_feature, emb_dims, classes
    # CF/EMB = 128 keeps the gram / conv5 outputs lane-dense.
    B, N, K, CF, EMB, OUT = 2, 16, 4, 128, 128, 40
    key = jax.random.PRNGKey(0)
    kx, kp = jax.random.split(key)
    x = jax.random.normal(kx, (B, 3, N), dtype=jnp.float32)
    params = init_params(kp, N, CF, EMB, OUT)

    fwd = jax.jit(dgcnn_brute_forward, static_argnums=2)
    out = jax.block_until_ready(fwd(x, params, K))

    assert out.shape == (B, OUT), out.shape
    assert bool(jnp.all(jnp.isfinite(out)))
    print("KERNEL_OK")
</pallas_src>

<mosaic_0001>
module attributes {stable_mosaic.version = 11 : i64} {
  func.func @pdist_kernel(%arg0: i32, %arg1: i32, %arg2: memref<1x16x128xf32, #tpu.memory_space<vmem>>, %arg3: memref<1x16x128xf32, #tpu.memory_space<vmem>>, %arg4: memref<1x16x16xf32, #tpu.memory_space<vmem>>) attributes {dimension_semantics = [#tpu.dimension_semantics<parallel>, #tpu.dimension_semantics<parallel>], iteration_bounds = array<i64: 2, 1>, scalar_prefetch = 0 : i64, scratch_operands = 0 : i64, tpu.core_type = #tpu.core_type<tc>, window_params = [{transform_indices = @transform_0, window_bounds = array<i64: 1, 16, 128>}, {transform_indices = @transform_1, window_bounds = array<i64: 1, 16, 128>}, {transform_indices = @transform_2, window_bounds = array<i64: 1, 16, 16>}]} {
    %c0 = arith.constant 0 : index
    %c0_0 = arith.constant 0 : index
    %c0_1 = arith.constant 0 : index
    %0 = vector.load %arg2[%c0, %c0_0, %c0_1] : memref<1x16x128xf32, #tpu.memory_space<vmem>>, vector<1x16x128xf32>
    %1 = vector.shape_cast %0 : vector<1x16x128xf32> to vector<16x128xf32>
    %c0_2 = arith.constant 0 : index
    %c0_3 = arith.constant 0 : index
    %c0_4 = arith.constant 0 : index
    %2 = vector.load %arg3[%c0_2, %c0_3, %c0_4] : memref<1x16x128xf32, #tpu.memory_space<vmem>>, vector<1x16x128xf32>
    %3 = vector.shape_cast %2 : vector<1x16x128xf32> to vector<16x128xf32>
    %cst = arith.constant dense<0.000000e+00> : vector<16x16xf32>
    %4 = tpu.matmul %1, %3, %cst {dimension_numbers = #tpu.dot_dimension_numbers<[1], [1], [0], [0], [0, 0, 1, 0], [], []>} : vector<16x128xf32>, vector<16x128xf32>, vector<16x16xf32> -> vector<16x16xf32>
    %5 = arith.mulf %1, %1 : vector<16x128xf32>
    %cst_5 = arith.constant dense<0.000000e+00> : vector<16xf32>
    %6 = vector.multi_reduction <add>, %5, %cst_5 [1] : vector<16x128xf32> to vector<16xf32>
    %7 = vector.shape_cast %6 : vector<16xf32> to vector<16x1xf32>
    %8 = arith.mulf %3, %3 : vector<16x128xf32>
    %cst_6 = arith.constant 1.000000e+00 : f32
    %9 = vector.broadcast %cst_6 : f32 to vector<1x128xf32>
    %cst_7 = arith.constant dense<0.000000e+00> : vector<1x16xf32>
    %10 = tpu.matmul %9, %8, %cst_7 {dimension_numbers = #tpu.dot_dimension_numbers<[1], [1], [0], [0], [0, 0, 1, 0], [], []>} : vector<1x128xf32>, vector<16x128xf32>, vector<1x16xf32> -> vector<1x16xf32>
    %cst_8 = arith.constant 2.000000e+00 : f32
    %11 = vector.broadcast %cst_8 : f32 to vector<16x16xf32>
    %12 = arith.mulf %11, %4 : vector<16x16xf32>
    %13 = vector.broadcast %7 : vector<16x1xf32> to vector<16x16xf32>
    %14 = arith.subf %12, %13 : vector<16x16xf32>
    %15 = vector.broadcast %10 : vector<1x16xf32> to vector<16x16xf32>
    %16 = arith.subf %14, %15 : vector<16x16xf32>
    %c0_9 = arith.constant 0 : index
    %c0_10 = arith.constant 0 : index
    %c0_11 = arith.constant 0 : index
    %17 = vector.load %arg4[%c0_9, %c0_10, %c0_11] : memref<1x16x16xf32, #tpu.memory_space<vmem>>, vector<1x16x16xf32>
    %18 = vector.shape_cast %17 : vector<1x16x16xf32> to vector<16x16xf32>
    %19 = vector.shape_cast %16 : vector<16x16xf32> to vector<1x16x16xf32>
    tpu.vector_store %arg4[%c0_9, %c0_10, %c0_11], %19 {strides = array<i32>} : memref<1x16x16xf32, #tpu.memory_space<vmem>>, vector<1x16x16xf32>,
    return
  }
  func.func @transform_0(%arg0: i32, %arg1: i32) -> (i32, i32, i32) {
    %c0_i32 = arith.constant 0 : i32
    %c0_i32_0 = arith.constant 0 : i32
    return %arg0, %arg1, %c0_i32 : i32, i32, i32
  }
  func.func @transform_1(%arg0: i32, %arg1: i32) -> (i32, i32, i32) {
    %c0_i32 = arith.constant 0 : i32
    %c0_i32_0 = arith.constant 0 : i32
    %c0_i32_1 = arith.constant 0 : i32
    return %arg0, %c0_i32, %c0_i32_0 : i32, i32, i32
  }
  func.func @transform_2(%arg0: i32, %arg1: i32) -> (i32, i32, i32) {
    %c0_i32 = arith.constant 0 : i32
    %c0_i32_0 = arith.constant 0 : i32
    return %arg0, %arg1, %c0_i32 : i32, i32, i32
  }
}

module attributes {stable_mosaic.version = 11 : i64} {
  func.func @gram_linear0_kernel(%arg0: i32, %arg1: memref<1x16x3xf32, #tpu.memory_space<vmem>>, %arg2: memref<16x128xf32, #tpu.memory_space<vmem>>, %arg3: memref<1x16x128xf32, #tpu.memory_space<vmem>>) attributes {dimension_semantics = [#tpu.dimension_semantics<parallel>], iteration_bounds = array<i64: 2>, scalar_prefetch = 0 : i64, scratch_operands = 0 : i64, tpu.core_type = #tpu.core_type<tc>, window_params = [{transform_indices = @transform_0, window_bounds = array<i64: 1, 16, 3>}, {pipeline_mode = #tpu.pipeline_mode<synchronous>, transform_indices = @transform_1, window_bounds = array<i64: 16, 128>}, {transform_indices = @transform_2, window_bounds = array<i64: 1, 16, 128>}]} {
    %c0 = arith.constant 0 : index
    %c0_0 = arith.constant 0 : index
    %c0_1 = arith.constant 0 : index
    %0 = vector.load %arg1[%c0, %c0_0, %c0_1] : memref<1x16x3xf32, #tpu.memory_space<vmem>>, vector<1x16x3xf32>
    %1 = vector.shape_cast %0 : vector<1x16x3xf32> to vector<16x3xf32>
    %c0_2 = arith.constant 0 : index
    %c0_3 = arith.constant 0 : index
    %2 = vector.load %arg2[%c0_2, %c0_3] : memref<16x128xf32, #tpu.memory_space<vmem>>, vector<16x128xf32>
    %cst = arith.constant dense<0.000000e+00> : vector<16xf32>
    %3 = vector.multi_reduction <add>, %1, %cst [1] : vector<16x3xf32> to vector<16xf32>
    %4 = vector.shape_cast %3 : vector<16xf32> to vector<16x1xf32>
    %cst_4 = arith.constant 3.000000e+00 : f32
    %5 = vector.broadcast %cst_4 : f32 to vector<16x1xf32>
    %6 = arith.divf %4, %5 : vector<16x1xf32>
    %7 = vector.broadcast %6 : vector<16x1xf32> to vector<16x3xf32>
    %8 = arith.subf %7, %1 : vector<16x3xf32>
    %9 = tpu.iota {dimensions = array<i32: 1>} : vector<16x3xi32>
    %c0_i32 = arith.constant 0 : i32
    %10 = vector.broadcast %c0_i32 : i32 to vector<16x3xi32>
    %11 = arith.cmpi eq, %9, %10 : vector<16x3xi32>
    %cst_5 = arith.constant 0.000000e+00 : f32
    %12 = vector.broadcast %cst_5 : f32 to vector<16x3xf32>
    %13 = arith.select %11, %8, %12 : vector<16x3xi1>, vector<16x3xf32>
    %cst_6 = arith.constant dense<0.000000e+00> : vector<16xf32>
    %14 = vector.multi_reduction <add>, %13, %cst_6 [1] : vector<16x3xf32> to vector<16xf32>
    %15 = vector.shape_cast %14 : vector<16xf32> to vector<16x1xf32>
    %16 = vector.broadcast %15 : vector<16x1xf32> to vector<16x128xf32>
    %17 = arith.mulf %16, %2 : vector<16x128xf32>
    %cst_7 = arith.constant dense<0.000000e+00> : vector<128xf32>
    %18 = vector.multi_reduction <add>, %17, %cst_7 [0] : vector<16x128xf32> to vector<128xf32>
    %19 = vector.shape_cast %18 : vector<128xf32> to vector<1x128xf32>
    %20 = vector.broadcast %15 : vector<16x1xf32> to vector<16x128xf32>
    %21 = vector.broadcast %19 : vector<1x128xf32> to vector<16x128xf32>
    %22 = arith.mulf %20, %21 : vector<16x128xf32>
    %c1_i32 = arith.constant 1 : i32
    %23 = vector.broadcast %c1_i32 : i32 to vector<16x3xi32>
    %24 = arith.cmpi eq, %9, %23 : vector<16x3xi32>
    %cst_8 = arith.constant 0.000000e+00 : f32
    %25 = vector.broadcast %cst_8 : f32 to vector<16x3xf32>
    %26 = arith.select %24, %8, %25 : vector<16x3xi1>, vector<16x3xf32>
    %cst_9 = arith.constant dense<0.000000e+00> : vector<16xf32>
    %27 = vector.multi_reduction <add>, %26, %cst_9 [1] : vector<16x3xf32> to vector<16xf32>
    %28 = vector.shape_cast %27 : vector<16xf32> to vector<16x1xf32>
    %29 = vector.broadcast %28 : vector<16x1xf32> to vector<16x128xf32>
    %30 = arith.mulf %29, %2 : vector<16x128xf32>
    %cst_10 = arith.constant dense<0.000000e+00> : vector<128xf32>
    %31 = vector.multi_reduction <add>, %30, %cst_10 [0] : vector<16x128xf32> to vector<128xf32>
    %32 = vector.shape_cast %31 : vector<128xf32> to vector<1x128xf32>
    %33 = vector.broadcast %28 : vector<16x1xf32> to vector<16x128xf32>
    %34 = vector.broadcast %32 : vector<1x128xf32> to vector<16x128xf32>
    %35 = arith.mulf %33, %34 : vector<16x128xf32>
    %36 = arith.addf %22, %35 : vector<16x128xf32>
    %c2_i32 = arith.constant 2 : i32
    %37 = vector.broadcast %c2_i32 : i32 to vector<16x3xi32>
    %38 = arith.cmpi eq, %9, %37 : vector<16x3xi32>
    %cst_11 = arith.constant 0.000000e+00 : f32
    %39 = vector.broadcast %cst_11 : f32 to vector<16x3xf32>
    %40 = arith.select %38, %8, %39 : vector<16x3xi1>, vector<16x3xf32>
    %cst_12 = arith.constant dense<0.000000e+00> : vector<16xf32>
    %41 = vector.multi_reduction <add>, %40, %cst_12 [1] : vector<16x3xf32> to vector<16xf32>
    %42 = vector.shape_cast %41 : vector<16xf32> to vector<16x1xf32>
    %43 = vector.broadcast %42 : vector<16x1xf32> to vector<16x128xf32>
    %44 = arith.mulf %43, %2 : vector<16x128xf32>
    %cst_13 = arith.constant dense<0.000000e+00> : vector<128xf32>
    %45 = vector.multi_reduction <add>, %44, %cst_13 [0] : vector<16x128xf32> to vector<128xf32>
    %46 = vector.shape_cast %45 : vector<128xf32> to vector<1x128xf32>
    %47 = vector.broadcast %42 : vector<16x1xf32> to vector<16x128xf32>
    %48 = vector.broadcast %46 : vector<1x128xf32> to vector<16x128xf32>
    %49 = arith.mulf %47, %48 : vector<16x128xf32>
    %50 = arith.addf %36, %49 : vector<16x128xf32>
    %cst_14 = arith.constant 0.000000e+00 : f32
    %51 = vector.broadcast %cst_14 : f32 to vector<16x128xf32>
    %52 = arith.cmpf oge, %50, %51 : vector<16x128xf32>
    %cst_15 = arith.constant 2.000000e-01 : f32
    %53 = vector.broadcast %cst_15 : f32 to vector<16x128xf32>
    %54 = arith.mulf %53, %50 : vector<16x128xf32>
    %55 = arith.select %52, %50, %54 : vector<16x128xi1>, vector<16x128xf32>
    %c0_16 = arith.constant 0 : index
    %c0_17 = arith.constant 0 : index
    %c0_18 = arith.constant 0 : index
    %56 = vector.load %arg3[%c0_16, %c0_17, %c0_18] : memref<1x16x128xf32, #tpu.memory_space<vmem>>, vector<1x16x128xf32>
    %57 = vector.shape_cast %56 : vector<1x16x128xf32> to vector<16x128xf32>
    %58 = vector.shape_cast %55 : vector<16x128xf32> to vector<1x16x128xf32>
    tpu.vector_store %arg3[%c0_16, %c0_17, %c0_18], %58 {strides = array<i32>} : memref<1x16x128xf32, #tpu.memory_space<vmem>>, vector<1x16x128xf32>,
    return
  }
  func.func @transform_0(%arg0: i32) -> (i32, i32, i32) {
    %c0_i32 = arith.constant 0 : i32
    %c0_i32_0 = arith.constant 0 : i32
    %c0_i32_1 = arith.constant 0 : i32
    return %arg0, %c0_i32, %c0_i32_0 : i32, i32, i32
  }
  func.func @transform_1(%arg0: i32) -> (i32, i32) {
    %c0_i32 = arith.constant 0 : i32
    %c0_i32_0 = arith.constant 0 : i32
    %c0_i32_1 = arith.constant 0 : i32
    return %c0_i32, %c0_i32_0 : i32, i32
  }
  func.func @transform_2(%arg0: i32) -> (i32, i32, i32) {
    %c0_i32 = arith.constant 0 : i32
    %c0_i32_0 = arith.constant 0 : i32
    %c0_i32_1 = arith.constant 0 : i32
    return %arg0, %c0_i32, %c0_i32_0 : i32, i32, i32
  }
}

module attributes {stable_mosaic.version = 11 : i64} {
  func.func @edgeconv_kernel(%arg0: i32, %arg1: i32, %arg2: memref<1x16x128xf32, #tpu.memory_space<vmem>>, %arg3: memref<1x16x128xf32, #tpu.memory_space<vmem>>, %arg4: memref<1x16x4xi32, #tpu.memory_space<vmem>>, %arg5: memref<128x64xbf16, #tpu.memory_space<vmem>>, %arg6: memref<128x64xbf16, #tpu.memory_space<vmem>>, %arg7: memref<1x64xf32, #tpu.memory_space<vmem>>, %arg8: memref<1x16x64xf32, #tpu.memory_space<vmem>>) attributes {dimension_semantics = [#tpu.dimension_semantics<parallel>, #tpu.dimension_semantics<parallel>], iteration_bounds = array<i64: 2, 1>, scalar_prefetch = 0 : i64, scratch_operands = 0 : i64, tpu.core_type = #tpu.core_type<tc>, window_params = [{transform_indices = @transform_0, window_bounds = array<i64: 1, 16, 128>}, {transform_indices = @transform_1, window_bounds = array<i64: 1, 16, 128>}, {transform_indices = @transform_2, window_bounds = array<i64: 1, 16, 4>}, {pipeline_mode = #tpu.pipeline_mode<synchronous>, transform_indices = @transform_3, window_bounds = array<i64: 128, 64>}, {pipeline_mode = #tpu.pipeline_mode<synchronous>, transform_indices = @transform_4, window_bounds = array<i64: 128, 64>}, {pipeline_mode = #tpu.pipeline_mode<synchronous>, transform_indices = @transform_5, window_bounds = array<i64: 1, 64>}, {transform_indices = @transform_6, window_bounds = array<i64: 1, 16, 64>}]} {
    %c0 = arith.constant 0 : index
    %c0_0 = arith.constant 0 : index
    %c0_1 = arith.constant 0 : index
    %0 = vector.load %arg2[%c0, %c0_0, %c0_1] : memref<1x16x128xf32, #tpu.memory_space<vmem>>, vector<1x16x128xf32>
    %1 = vector.shape_cast %0 : vector<1x16x128xf32> to vector<16x128xf32>
    %2 = arith.truncf %1 : vector<16x128xf32> to vector<16x128xbf16>
    %c0_2 = arith.constant 0 : index
    %c0_3 = arith.constant 0 : index
    %c0_4 = arith.constant 0 : index
    %3 = vector.load %arg3[%c0_2, %c0_3, %c0_4] : memref<1x16x128xf32, #tpu.memory_space<vmem>>, vector<1x16x128xf32>
    %4 = vector.shape_cast %3 : vector<1x16x128xf32> to vector<16x128xf32>
    %5 = arith.truncf %4 : vector<16x128xf32> to vector<16x128xbf16>
    %c0_5 = arith.constant 0 : index
    %c0_6 = arith.constant 0 : index
    %6 = vector.load %arg5[%c0_5, %c0_6] : memref<128x64xbf16, #tpu.memory_space<vmem>>, vector<128x64xbf16>
    %cst = arith.constant dense<0.000000e+00> : vector<16x64xf32>
    %7 = tpu.matmul %2, %6, %cst {dimension_numbers = #tpu.dot_dimension_numbers<[1], [0], [0], [1], [0, 0, 1, 1], [], []>} : vector<16x128xbf16>, vector<128x64xbf16>, vector<16x64xf32> -> vector<16x64xf32>
    %8 = arith.truncf %7 : vector<16x64xf32> to vector<16x64xbf16>
    %c0_7 = arith.constant 0 : index
    %c0_8 = arith.constant 0 : index
    %9 = vector.load %arg6[%c0_7, %c0_8] : memref<128x64xbf16, #tpu.memory_space<vmem>>, vector<128x64xbf16>
    %cst_9 = arith.constant dense<0.000000e+00> : vector<16x64xf32>
    %10 = tpu.matmul %5, %9, %cst_9 {dimension_numbers = #tpu.dot_dimension_numbers<[1], [0], [0], [1], [0, 0, 1, 1], [], []>} : vector<16x128xbf16>, vector<128x64xbf16>, vector<16x64xf32> -> vector<16x64xf32>
    %c0_10 = arith.constant 0 : index
    %c0_11 = arith.constant 0 : index
    %11 = vector.load %arg7[%c0_10, %c0_11] : memref<1x64xf32, #tpu.memory_space<vmem>>, vector<1x64xf32>
    %12 = vector.broadcast %11 : vector<1x64xf32> to vector<16x64xf32>
    %13 = arith.addf %10, %12 : vector<16x64xf32>
    %c0_12 = arith.constant 0 : index
    %c0_13 = arith.constant 0 : index
    %c0_14 = arith.constant 0 : index
    %14 = vector.load %arg4[%c0_12, %c0_13, %c0_14] : memref<1x16x4xi32, #tpu.memory_space<vmem>>, vector<1x16x4xi32>
    %15 = vector.shape_cast %14 : vector<1x16x4xi32> to vector<16x4xi32>
    %16 = arith.sitofp %15 : vector<16x4xi32> to vector<16x4xf32>
    %17 = tpu.iota {dimensions = array<i32: 1>} : vector<16x4xi32>
    %18 = tpu.iota {dimensions = array<i32: 1>} : vector<16x16xi32>
    %19 = arith.sitofp %18 : vector<16x16xi32> to vector<16x16xf32>
    %c0_i32 = arith.constant 0 : i32
    %20 = vector.broadcast %c0_i32 : i32 to vector<16x4xi32>
    %21 = arith.cmpi eq, %17, %20 : vector<16x4xi32>
    %cst_15 = arith.constant 0.000000e+00 : f32
    %22 = vector.broadcast %cst_15 : f32 to vector<16x4xf32>
    %23 = arith.select %21, %16, %22 : vector<16x4xi1>, vector<16x4xf32>
    %cst_16 = arith.constant dense<0.000000e+00> : vector<16xf32>
    %24 = vector.multi_reduction <add>, %23, %cst_16 [1] : vector<16x4xf32> to vector<16xf32>
    %25 = vector.shape_cast %24 : vector<16xf32> to vector<16x1xf32>
    %26 = vector.broadcast %25 : vector<16x1xf32> to vector<16x16xf32>
    %27 = arith.cmpf oeq, %26, %19 : vector<16x16xf32>
    %cst_17 = arith.constant 1.000000e+00 : f32
    %cst_18 = arith.constant 0.000000e+00 : f32
    %28 = vector.broadcast %cst_17 : f32 to vector<16x16xf32>
    %29 = vector.broadcast %cst_18 : f32 to vector<16x16xf32>
    %30 = arith.select %27, %28, %29 : vector<16x16xi1>, vector<16x16xf32>
    %31 = arith.truncf %30 : vector<16x16xf32> to vector<16x16xbf16>
    %cst_19 = arith.constant dense<0.000000e+00> : vector<16x64xf32>
    %32 = tpu.matmul %31, %8, %cst_19 {dimension_numbers = #tpu.dot_dimension_numbers<[1], [0], [0], [1], [0, 0, 1, 1], [], []>} : vector<16x16xbf16>, vector<16x64xbf16>, vector<16x64xf32> -> vector<16x64xf32>
    %33 = arith.addf %32, %13 : vector<16x64xf32>
    %cst_20 = arith.constant 0.000000e+00 : f32
    %34 = vector.broadcast %cst_20 : f32 to vector<16x64xf32>
    %35 = arith.cmpf oge, %33, %34 : vector<16x64xf32>
    %cst_21 = arith.constant 2.000000e-01 : f32
    %36 = vector.broadcast %cst_21 : f32 to vector<16x64xf32>
    %37 = arith.mulf %36, %33 : vector<16x64xf32>
    %38 = arith.select %35, %33, %37 : vector<16x64xi1>, vector<16x64xf32>
    %c1_i32 = arith.constant 1 : i32
    %39 = vector.broadcast %c1_i32 : i32 to vector<16x4xi32>
    %40 = arith.cmpi eq, %17, %39 : vector<16x4xi32>
    %cst_22 = arith.constant 0.000000e+00 : f32
    %41 = vector.broadcast %cst_22 : f32 to vector<16x4xf32>
    %42 = arith.select %40, %16, %41 : vector<16x4xi1>, vector<16x4xf32>
    %cst_23 = arith.constant dense<0.000000e+00> : vector<16xf32>
    %43 = vector.multi_reduction <add>, %42, %cst_23 [1] : vector<16x4xf32> to vector<16xf32>
    %44 = vector.shape_cast %43 : vector<16xf32> to vector<16x1xf32>
    %45 = vector.broadcast %44 : vector<16x1xf32> to vector<16x16xf32>
    %46 = arith.cmpf oeq, %45, %19 : vector<16x16xf32>
    %cst_24 = arith.constant 1.000000e+00 : f32
    %cst_25 = arith.constant 0.000000e+00 : f32
    %47 = vector.broadcast %cst_24 : f32 to vector<16x16xf32>
    %48 = vector.broadcast %cst_25 : f32 to vector<16x16xf32>
    %49 = arith.select %46, %47, %48 : vector<16x16xi1>, vector<16x16xf32>
    %50 = arith.truncf %49 : vector<16x16xf32> to vector<16x16xbf16>
    %cst_26 = arith.constant dense<0.000000e+00> : vector<16x64xf32>
    %51 = tpu.matmul %50, %8, %cst_26 {dimension_numbers = #tpu.dot_dimension_numbers<[1], [0], [0], [1], [0, 0, 1, 1], [], []>} : vector<16x16xbf16>, vector<16x64xbf16>, vector<16x64xf32> -> vector<16x64xf32>
    %52 = arith.addf %51, %13 : vector<16x64xf32>
    %cst_27 = arith.constant 0.000000e+00 : f32
    %53 = vector.broadcast %cst_27 : f32 to vector<16x64xf32>
    %54 = arith.cmpf oge, %52, %53 : vector<16x64xf32>
    %cst_28 = arith.constant 2.000000e-01 : f32
    %55 = vector.broadcast %cst_28 : f32 to vector<16x64xf32>
    %56 = arith.mulf %55, %52 : vector<16x64xf32>
    %57 = arith.select %54, %52, %56 : vector<16x64xi1>, vector<16x64xf32>
    %58 = arith.maximumf %38, %57 : vector<16x64xf32>
    %c2_i32 = arith.constant 2 : i32
    %59 = vector.broadcast %c2_i32 : i32 to vector<16x4xi32>
    %60 = arith.cmpi eq, %17, %59 : vector<16x4xi32>
    %cst_29 = arith.constant 0.000000e+00 : f32
    %61 = vector.broadcast %cst_29 : f32 to vector<16x4xf32>
    %62 = arith.select %60, %16, %61 : vector<16x4xi1>, vector<16x4xf32>
    %cst_30 = arith.constant dense<0.000000e+00> : vector<16xf32>
    %63 = vector.multi_reduction <add>, %62, %cst_30 [1] : vector<16x4xf32> to vector<16xf32>
    %64 = vector.shape_cast %63 : vector<16xf32> to vector<16x1xf32>
    %65 = vector.broadcast %64 : vector<16x1xf32> to vector<16x16xf32>
    %66 = arith.cmpf oeq, %65, %19 : vector<16x16xf32>
    %cst_31 = arith.constant 1.000000e+00 : f32
    %cst_32 = arith.constant 0.000000e+00 : f32
    %67 = vector.broadcast %cst_31 : f32 to vector<16x16xf32>
    %68 = vector.broadcast %cst_32 : f32 to vector<16x16xf32>
    %69 = arith.select %66, %67, %68 : vector<16x16xi1>, vector<16x16xf32>
    %70 = arith.truncf %69 : vector<16x16xf32> to vector<16x16xbf16>
    %cst_33 = arith.constant dense<0.000000e+00> : vector<16x64xf32>
    %71 = tpu.matmul %70, %8, %cst_33 {dimension_numbers = #tpu.dot_dimension_numbers<[1], [0], [0], [1], [0, 0, 1, 1], [], []>} : vector<16x16xbf16>, vector<16x64xbf16>, vector<16x64xf32> -> vector<16x64xf32>
    %72 = arith.addf %71, %13 : vector<16x64xf32>
    %cst_34 = arith.constant 0.000000e+00 : f32
    %73 = vector.broadcast %cst_34 : f32 to vector<16x64xf32>
    %74 = arith.cmpf oge, %72, %73 : vector<16x64xf32>
    %cst_35 = arith.constant 2.000000e-01 : f32
    %75 = vector.broadcast %cst_35 : f32 to vector<16x64xf32>
    %76 = arith.mulf %75, %72 : vector<16x64xf32>
    %77 = arith.select %74, %72, %76 : vector<16x64xi1>, vector<16x64xf32>
    %78 = arith.maximumf %58, %77 : vector<16x64xf32>
    %c3_i32 = arith.constant 3 : i32
    %79 = vector.broadcast %c3_i32 : i32 to vector<16x4xi32>
    %80 = arith.cmpi eq, %17, %79 : vector<16x4xi32>
    %cst_36 = arith.constant 0.000000e+00 : f32
    %81 = vector.broadcast %cst_36 : f32 to vector<16x4xf32>
    %82 = arith.select %80, %16, %81 : vector<16x4xi1>, vector<16x4xf32>
    %cst_37 = arith.constant dense<0.000000e+00> : vector<16xf32>
    %83 = vector.multi_reduction <add>, %82, %cst_37 [1] : vector<16x4xf32> to vector<16xf32>
    %84 = vector.shape_cast %83 : vector<16xf32> to vector<16x1xf32>
    %85 = vector.broadcast %84 : vector<16x1xf32> to vector<16x16xf32>
    %86 = arith.cmpf oeq, %85, %19 : vector<16x16xf32>
    %cst_38 = arith.constant 1.000000e+00 : f32
    %cst_39 = arith.constant 0.000000e+00 : f32
    %87 = vector.broadcast %cst_38 : f32 to vector<16x16xf32>
    %88 = vector.broadcast %cst_39 : f32 to vector<16x16xf32>
    %89 = arith.select %86, %87, %88 : vector<16x16xi1>, vector<16x16xf32>
    %90 = arith.truncf %89 : vector<16x16xf32> to vector<16x16xbf16>
    %cst_40 = arith.constant dense<0.000000e+00> : vector<16x64xf32>
    %91 = tpu.matmul %90, %8, %cst_40 {dimension_numbers = #tpu.dot_dimension_numbers<[1], [0], [0], [1], [0, 0, 1, 1], [], []>} : vector<16x16xbf16>, vector<16x64xbf16>, vector<16x64xf32> -> vector<16x64xf32>
    %92 = arith.addf %91, %13 : vector<16x64xf32>
    %cst_41 = arith.constant 0.000000e+00 : f32
    %93 = vector.broadcast %cst_41 : f32 to vector<16x64xf32>
    %94 = arith.cmpf oge, %92, %93 : vector<16x64xf32>
    %cst_42 = arith.constant 2.000000e-01 : f32
    %95 = vector.broadcast %cst_42 : f32 to vector<16x64xf32>
    %96 = arith.mulf %95, %92 : vector<16x64xf32>
    %97 = arith.select %94, %92, %96 : vector<16x64xi1>, vector<16x64xf32>
    %98 = arith.maximumf %78, %97 : vector<16x64xf32>
    %c0_43 = arith.constant 0 : index
    %c0_44 = arith.constant 0 : index
    %c0_45 = arith.constant 0 : index
    %99 = vector.load %arg8[%c0_43, %c0_44, %c0_45] : memref<1x16x64xf32, #tpu.memory_space<vmem>>, vector<1x16x64xf32>
    %100 = vector.shape_cast %99 : vector<1x16x64xf32> to vector<16x64xf32>
    %101 = vector.shape_cast %98 : vector<16x64xf32> to vector<1x16x64xf32>
    tpu.vector_store %arg8[%c0_43, %c0_44, %c0_45], %101 {strides = array<i32>} : memref<1x16x64xf32, #tpu.memory_space<vmem>>, vector<1x16x64xf32>,
    return
  }
  func.func @transform_0(%arg0: i32, %arg1: i32) -> (i32, i32, i32) {
    %c0_i32 = arith.constant 0 : i32
    %c0_i32_0 = arith.constant 0 : i32
    %c0_i32_1 = arith.constant 0 : i32
    return %arg0, %c0_i32, %c0_i32_0 : i32, i32, i32
  }
  func.func @transform_1(%arg0: i32, %arg1: i32) -> (i32, i32, i32) {
    %c0_i32 = arith.constant 0 : i32
    %c0_i32_0 = arith.constant 0 : i32
    return %arg0, %arg1, %c0_i32 : i32, i32, i32
  }
  func.func @transform_2(%arg0: i32, %arg1: i32) -> (i32, i32, i32) {
    %c0_i32 = arith.constant 0 : i32
    %c0_i32_0 = arith.constant 0 : i32
    return %arg0, %arg1, %c0_i32 : i32, i32, i32
  }
  func.func @transform_3(%arg0: i32, %arg1: i32) -> (i32, i32) {
    %c0_i32 = arith.constant 0 : i32
    %c0_i32_0 = arith.constant 0 : i32
    %c0_i32_1 = arith.constant 0 : i32
    return %c0_i32, %c0_i32_0 : i32, i32
  }
  func.func @transform_4(%arg0: i32, %arg1: i32) -> (i32, i32) {
    %c0_i32 = arith.constant 0 : i32
    %c0_i32_0 = arith.constant 0 : i32
    %c0_i32_1 = arith.constant 0 : i32
    return %c0_i32, %c0_i32_0 : i32, i32
  }
  func.func @transform_5(%arg0: i32, %arg1: i32) -> (i32, i32) {
    %c0_i32 = arith.constant 0 : i32
    %c0_i32_0 = arith.constant 0 : i32
    %c0_i32_1 = arith.constant 0 : i32
    return %c0_i32, %c0_i32_0 : i32, i32
  }
  func.func @transform_6(%arg0: i32, %arg1: i32) -> (i32, i32, i32) {
    %c0_i32 = arith.constant 0 : i32
    %c0_i32_0 = arith.constant 0 : i32
    return %arg0, %arg1, %c0_i32 : i32, i32, i32
  }
}

module attributes {stable_mosaic.version = 11 : i64} {
  func.func @edgeconv_kernel(%arg0: i32, %arg1: i32, %arg2: memref<1x16x64xf32, #tpu.memory_space<vmem>>, %arg3: memref<1x16x64xf32, #tpu.memory_space<vmem>>, %arg4: memref<1x16x4xi32, #tpu.memory_space<vmem>>, %arg5: memref<64x64xbf16, #tpu.memory_space<vmem>>, %arg6: memref<64x64xbf16, #tpu.memory_space<vmem>>, %arg7: memref<1x64xf32, #tpu.memory_space<vmem>>, %arg8: memref<1x16x64xf32, #tpu.memory_space<vmem>>) attributes {dimension_semantics = [#tpu.dimension_semantics<parallel>, #tpu.dimension_semantics<parallel>], iteration_bounds = array<i64: 2, 1>, scalar_prefetch = 0 : i64, scratch_operands = 0 : i64, tpu.core_type = #tpu.core_type<tc>, window_params = [{transform_indices = @transform_0, window_bounds = array<i64: 1, 16, 64>}, {transform_indices = @transform_1, window_bounds = array<i64: 1, 16, 64>}, {transform_indices = @transform_2, window_bounds = array<i64: 1, 16, 4>}, {pipeline_mode = #tpu.pipeline_mode<synchronous>, transform_indices = @transform_3, window_bounds = array<i64: 64, 64>}, {pipeline_mode = #tpu.pipeline_mode<synchronous>, transform_indices = @transform_4, window_bounds = array<i64: 64, 64>}, {pipeline_mode = #tpu.pipeline_mode<synchronous>, transform_indices = @transform_5, window_bounds = array<i64: 1, 64>}, {transform_indices = @transform_6, window_bounds = array<i64: 1, 16, 64>}]} {
    %c0 = arith.constant 0 : index
    %c0_0 = arith.constant 0 : index
    %c0_1 = arith.constant 0 : index
    %0 = vector.load %arg2[%c0, %c0_0, %c0_1] : memref<1x16x64xf32, #tpu.memory_space<vmem>>, vector<1x16x64xf32>
    %1 = vector.shape_cast %0 : vector<1x16x64xf32> to vector<16x64xf32>
    %2 = arith.truncf %1 : vector<16x64xf32> to vector<16x64xbf16>
    %c0_2 = arith.constant 0 : index
    %c0_3 = arith.constant 0 : index
    %c0_4 = arith.constant 0 : index
    %3 = vector.load %arg3[%c0_2, %c0_3, %c0_4] : memref<1x16x64xf32, #tpu.memory_space<vmem>>, vector<1x16x64xf32>
    %4 = vector.shape_cast %3 : vector<1x16x64xf32> to vector<16x64xf32>
    %5 = arith.truncf %4 : vector<16x64xf32> to vector<16x64xbf16>
    %c0_5 = arith.constant 0 : index
    %c0_6 = arith.constant 0 : index
    %6 = vector.load %arg5[%c0_5, %c0_6] : memref<64x64xbf16, #tpu.memory_space<vmem>>, vector<64x64xbf16>
    %cst = arith.constant dense<0.000000e+00> : vector<16x64xf32>
    %7 = tpu.matmul %2, %6, %cst {dimension_numbers = #tpu.dot_dimension_numbers<[1], [0], [0], [1], [0, 0, 1, 1], [], []>} : vector<16x64xbf16>, vector<64x64xbf16>, vector<16x64xf32> -> vector<16x64xf32>
    %8 = arith.truncf %7 : vector<16x64xf32> to vector<16x64xbf16>
    %c0_7 = arith.constant 0 : index
    %c0_8 = arith.constant 0 : index
    %9 = vector.load %arg6[%c0_7, %c0_8] : memref<64x64xbf16, #tpu.memory_space<vmem>>, vector<64x64xbf16>
    %cst_9 = arith.constant dense<0.000000e+00> : vector<16x64xf32>
    %10 = tpu.matmul %5, %9, %cst_9 {dimension_numbers = #tpu.dot_dimension_numbers<[1], [0], [0], [1], [0, 0, 1, 1], [], []>} : vector<16x64xbf16>, vector<64x64xbf16>, vector<16x64xf32> -> vector<16x64xf32>
    %c0_10 = arith.constant 0 : index
    %c0_11 = arith.constant 0 : index
    %11 = vector.load %arg7[%c0_10, %c0_11] : memref<1x64xf32, #tpu.memory_space<vmem>>, vector<1x64xf32>
    %12 = vector.broadcast %11 : vector<1x64xf32> to vector<16x64xf32>
    %13 = arith.addf %10, %12 : vector<16x64xf32>
    %c0_12 = arith.constant 0 : index
    %c0_13 = arith.constant 0 : index
    %c0_14 = arith.constant 0 : index
    %14 = vector.load %arg4[%c0_12, %c0_13, %c0_14] : memref<1x16x4xi32, #tpu.memory_space<vmem>>, vector<1x16x4xi32>
    %15 = vector.shape_cast %14 : vector<1x16x4xi32> to vector<16x4xi32>
    %16 = arith.sitofp %15 : vector<16x4xi32> to vector<16x4xf32>
    %17 = tpu.iota {dimensions = array<i32: 1>} : vector<16x4xi32>
    %18 = tpu.iota {dimensions = array<i32: 1>} : vector<16x16xi32>
    %19 = arith.sitofp %18 : vector<16x16xi32> to vector<16x16xf32>
    %c0_i32 = arith.constant 0 : i32
    %20 = vector.broadcast %c0_i32 : i32 to vector<16x4xi32>
    %21 = arith.cmpi eq, %17, %20 : vector<16x4xi32>
    %cst_15 = arith.constant 0.000000e+00 : f32
    %22 = vector.broadcast %cst_15 : f32 to vector<16x4xf32>
    %23 = arith.select %21, %16, %22 : vector<16x4xi1>, vector<16x4xf32>
    %cst_16 = arith.constant dense<0.000000e+00> : vector<16xf32>
    %24 = vector.multi_reduction <add>, %23, %cst_16 [1] : vector<16x4xf32> to vector<16xf32>
    %25 = vector.shape_cast %24 : vector<16xf32> to vector<16x1xf32>
    %26 = vector.broadcast %25 : vector<16x1xf32> to vector<16x16xf32>
    %27 = arith.cmpf oeq, %26, %19 : vector<16x16xf32>
    %cst_17 = arith.constant 1.000000e+00 : f32
    %cst_18 = arith.constant 0.000000e+00 : f32
    %28 = vector.broadcast %cst_17 : f32 to vector<16x16xf32>
    %29 = vector.broadcast %cst_18 : f32 to vector<16x16xf32>
    %30 = arith.select %27, %28, %29 : vector<16x16xi1>, vector<16x16xf32>
    %31 = arith.truncf %30 : vector<16x16xf32> to vector<16x16xbf16>
    %cst_19 = arith.constant dense<0.000000e+00> : vector<16x64xf32>
    %32 = tpu.matmul %31, %8, %cst_19 {dimension_numbers = #tpu.dot_dimension_numbers<[1], [0], [0], [1], [0, 0, 1, 1], [], []>} : vector<16x16xbf16>, vector<16x64xbf16>, vector<16x64xf32> -> vector<16x64xf32>
    %33 = arith.addf %32, %13 : vector<16x64xf32>
    %cst_20 = arith.constant 0.000000e+00 : f32
    %34 = vector.broadcast %cst_20 : f32 to vector<16x64xf32>
    %35 = arith.cmpf oge, %33, %34 : vector<16x64xf32>
    %cst_21 = arith.constant 2.000000e-01 : f32
    %36 = vector.broadcast %cst_21 : f32 to vector<16x64xf32>
    %37 = arith.mulf %36, %33 : vector<16x64xf32>
    %38 = arith.select %35, %33, %37 : vector<16x64xi1>, vector<16x64xf32>
    %c1_i32 = arith.constant 1 : i32
    %39 = vector.broadcast %c1_i32 : i32 to vector<16x4xi32>
    %40 = arith.cmpi eq, %17, %39 : vector<16x4xi32>
    %cst_22 = arith.constant 0.000000e+00 : f32
    %41 = vector.broadcast %cst_22 : f32 to vector<16x4xf32>
    %42 = arith.select %40, %16, %41 : vector<16x4xi1>, vector<16x4xf32>
    %cst_23 = arith.constant dense<0.000000e+00> : vector<16xf32>
    %43 = vector.multi_reduction <add>, %42, %cst_23 [1] : vector<16x4xf32> to vector<16xf32>
    %44 = vector.shape_cast %43 : vector<16xf32> to vector<16x1xf32>
    %45 = vector.broadcast %44 : vector<16x1xf32> to vector<16x16xf32>
    %46 = arith.cmpf oeq, %45, %19 : vector<16x16xf32>
    %cst_24 = arith.constant 1.000000e+00 : f32
    %cst_25 = arith.constant 0.000000e+00 : f32
    %47 = vector.broadcast %cst_24 : f32 to vector<16x16xf32>
    %48 = vector.broadcast %cst_25 : f32 to vector<16x16xf32>
    %49 = arith.select %46, %47, %48 : vector<16x16xi1>, vector<16x16xf32>
    %50 = arith.truncf %49 : vector<16x16xf32> to vector<16x16xbf16>
    %cst_26 = arith.constant dense<0.000000e+00> : vector<16x64xf32>
    %51 = tpu.matmul %50, %8, %cst_26 {dimension_numbers = #tpu.dot_dimension_numbers<[1], [0], [0], [1], [0, 0, 1, 1], [], []>} : vector<16x16xbf16>, vector<16x64xbf16>, vector<16x64xf32> -> vector<16x64xf32>
    %52 = arith.addf %51, %13 : vector<16x64xf32>
    %cst_27 = arith.constant 0.000000e+00 : f32
    %53 = vector.broadcast %cst_27 : f32 to vector<16x64xf32>
    %54 = arith.cmpf oge, %52, %53 : vector<16x64xf32>
    %cst_28 = arith.constant 2.000000e-01 : f32
    %55 = vector.broadcast %cst_28 : f32 to vector<16x64xf32>
    %56 = arith.mulf %55, %52 : vector<16x64xf32>
    %57 = arith.select %54, %52, %56 : vector<16x64xi1>, vector<16x64xf32>
    %58 = arith.maximumf %38, %57 : vector<16x64xf32>
    %c2_i32 = arith.constant 2 : i32
    %59 = vector.broadcast %c2_i32 : i32 to vector<16x4xi32>
    %60 = arith.cmpi eq, %17, %59 : vector<16x4xi32>
    %cst_29 = arith.constant 0.000000e+00 : f32
    %61 = vector.broadcast %cst_29 : f32 to vector<16x4xf32>
    %62 = arith.select %60, %16, %61 : vector<16x4xi1>, vector<16x4xf32>
    %cst_30 = arith.constant dense<0.000000e+00> : vector<16xf32>
    %63 = vector.multi_reduction <add>, %62, %cst_30 [1] : vector<16x4xf32> to vector<16xf32>
    %64 = vector.shape_cast %63 : vector<16xf32> to vector<16x1xf32>
    %65 = vector.broadcast %64 : vector<16x1xf32> to vector<16x16xf32>
    %66 = arith.cmpf oeq, %65, %19 : vector<16x16xf32>
    %cst_31 = arith.constant 1.000000e+00 : f32
    %cst_32 = arith.constant 0.000000e+00 : f32
    %67 = vector.broadcast %cst_31 : f32 to vector<16x16xf32>
    %68 = vector.broadcast %cst_32 : f32 to vector<16x16xf32>
    %69 = arith.select %66, %67, %68 : vector<16x16xi1>, vector<16x16xf32>
    %70 = arith.truncf %69 : vector<16x16xf32> to vector<16x16xbf16>
    %cst_33 = arith.constant dense<0.000000e+00> : vector<16x64xf32>
    %71 = tpu.matmul %70, %8, %cst_33 {dimension_numbers = #tpu.dot_dimension_numbers<[1], [0], [0], [1], [0, 0, 1, 1], [], []>} : vector<16x16xbf16>, vector<16x64xbf16>, vector<16x64xf32> -> vector<16x64xf32>
    %72 = arith.addf %71, %13 : vector<16x64xf32>
    %cst_34 = arith.constant 0.000000e+00 : f32
    %73 = vector.broadcast %cst_34 : f32 to vector<16x64xf32>
    %74 = arith.cmpf oge, %72, %73 : vector<16x64xf32>
    %cst_35 = arith.constant 2.000000e-01 : f32
    %75 = vector.broadcast %cst_35 : f32 to vector<16x64xf32>
    %76 = arith.mulf %75, %72 : vector<16x64xf32>
    %77 = arith.select %74, %72, %76 : vector<16x64xi1>, vector<16x64xf32>
    %78 = arith.maximumf %58, %77 : vector<16x64xf32>
    %c3_i32 = arith.constant 3 : i32
    %79 = vector.broadcast %c3_i32 : i32 to vector<16x4xi32>
    %80 = arith.cmpi eq, %17, %79 : vector<16x4xi32>
    %cst_36 = arith.constant 0.000000e+00 : f32
    %81 = vector.broadcast %cst_36 : f32 to vector<16x4xf32>
    %82 = arith.select %80, %16, %81 : vector<16x4xi1>, vector<16x4xf32>
    %cst_37 = arith.constant dense<0.000000e+00> : vector<16xf32>
    %83 = vector.multi_reduction <add>, %82, %cst_37 [1] : vector<16x4xf32> to vector<16xf32>
    %84 = vector.shape_cast %83 : vector<16xf32> to vector<16x1xf32>
    %85 = vector.broadcast %84 : vector<16x1xf32> to vector<16x16xf32>
    %86 = arith.cmpf oeq, %85, %19 : vector<16x16xf32>
    %cst_38 = arith.constant 1.000000e+00 : f32
    %cst_39 = arith.constant 0.000000e+00 : f32
    %87 = vector.broadcast %cst_38 : f32 to vector<16x16xf32>
    %88 = vector.broadcast %cst_39 : f32 to vector<16x16xf32>
    %89 = arith.select %86, %87, %88 : vector<16x16xi1>, vector<16x16xf32>
    %90 = arith.truncf %89 : vector<16x16xf32> to vector<16x16xbf16>
    %cst_40 = arith.constant dense<0.000000e+00> : vector<16x64xf32>
    %91 = tpu.matmul %90, %8, %cst_40 {dimension_numbers = #tpu.dot_dimension_numbers<[1], [0], [0], [1], [0, 0, 1, 1], [], []>} : vector<16x16xbf16>, vector<16x64xbf16>, vector<16x64xf32> -> vector<16x64xf32>
    %92 = arith.addf %91, %13 : vector<16x64xf32>
    %cst_41 = arith.constant 0.000000e+00 : f32
    %93 = vector.broadcast %cst_41 : f32 to vector<16x64xf32>
    %94 = arith.cmpf oge, %92, %93 : vector<16x64xf32>
    %cst_42 = arith.constant 2.000000e-01 : f32
    %95 = vector.broadcast %cst_42 : f32 to vector<16x64xf32>
    %96 = arith.mulf %95, %92 : vector<16x64xf32>
    %97 = arith.select %94, %92, %96 : vector<16x64xi1>, vector<16x64xf32>
    %98 = arith.maximumf %78, %97 : vector<16x64xf32>
    %c0_43 = arith.constant 0 : index
    %c0_44 = arith.constant 0 : index
    %c0_45 = arith.constant 0 : index
    %99 = vector.load %arg8[%c0_43, %c0_44, %c0_45] : memref<1x16x64xf32, #tpu.memory_space<vmem>>, vector<1x16x64xf32>
    %100 = vector.shape_cast %99 : vector<1x16x64xf32> to vector<16x64xf32>
    %101 = vector.shape_cast %98 : vector<16x64xf32> to vector<1x16x64xf32>
    tpu.vector_store %arg8[%c0_43, %c0_44, %c0_45], %101 {strides = array<i32>} : memref<1x16x64xf32, #tpu.memory_space<vmem>>, vector<1x16x64xf32>,
    return
  }
  func.func @transform_0(%arg0: i32, %arg1: i32) -> (i32, i32, i32) {
    %c0_i32 = arith.constant 0 : i32
    %c0_i32_0 = arith.constant 0 : i32
    %c0_i32_1 = arith.constant 0 : i32
    return %arg0, %c0_i32, %c0_i32_0 : i32, i32, i32
  }
  func.func @transform_1(%arg0: i32, %arg1: i32) -> (i32, i32, i32) {
    %c0_i32 = arith.constant 0 : i32
    %c0_i32_0 = arith.constant 0 : i32
    return %arg0, %arg1, %c0_i32 : i32, i32, i32
  }
  func.func @transform_2(%arg0: i32, %arg1: i32) -> (i32, i32, i32) {
    %c0_i32 = arith.constant 0 : i32
    %c0_i32_0 = arith.constant 0 : i32
    return %arg0, %arg1, %c0_i32 : i32, i32, i32
  }
  func.func @transform_3(%arg0: i32, %arg1: i32) -> (i32, i32) {
    %c0_i32 = arith.constant 0 : i32
    %c0_i32_0 = arith.constant 0 : i32
    %c0_i32_1 = arith.constant 0 : i32
    return %c0_i32, %c0_i32_0 : i32, i32
  }
  func.func @transform_4(%arg0: i32, %arg1: i32) -> (i32, i32) {
    %c0_i32 = arith.constant 0 : i32
    %c0_i32_0 = arith.constant 0 : i32
    %c0_i32_1 = arith.constant 0 : i32
    return %c0_i32, %c0_i32_0 : i32, i32
  }
  func.func @transform_5(%arg0: i32, %arg1: i32) -> (i32, i32) {
    %c0_i32 = arith.constant 0 : i32
    %c0_i32_0 = arith.constant 0 : i32
    %c0_i32_1 = arith.constant 0 : i32
    return %c0_i32, %c0_i32_0 : i32, i32
  }
  func.func @transform_6(%arg0: i32, %arg1: i32) -> (i32, i32, i32) {
    %c0_i32 = arith.constant 0 : i32
    %c0_i32_0 = arith.constant 0 : i32
    return %arg0, %arg1, %c0_i32 : i32, i32, i32
  }
}

module attributes {stable_mosaic.version = 11 : i64} {
  func.func @edgeconv_kernel(%arg0: i32, %arg1: i32, %arg2: memref<1x16x64xf32, #tpu.memory_space<vmem>>, %arg3: memref<1x16x64xf32, #tpu.memory_space<vmem>>, %arg4: memref<1x16x4xi32, #tpu.memory_space<vmem>>, %arg5: memref<64x128xbf16, #tpu.memory_space<vmem>>, %arg6: memref<64x128xbf16, #tpu.memory_space<vmem>>, %arg7: memref<1x128xf32, #tpu.memory_space<vmem>>, %arg8: memref<1x16x128xf32, #tpu.memory_space<vmem>>) attributes {dimension_semantics = [#tpu.dimension_semantics<parallel>, #tpu.dimension_semantics<parallel>], iteration_bounds = array<i64: 2, 1>, scalar_prefetch = 0 : i64, scratch_operands = 0 : i64, tpu.core_type = #tpu.core_type<tc>, window_params = [{transform_indices = @transform_0, window_bounds = array<i64: 1, 16, 64>}, {transform_indices = @transform_1, window_bounds = array<i64: 1, 16, 64>}, {transform_indices = @transform_2, window_bounds = array<i64: 1, 16, 4>}, {pipeline_mode = #tpu.pipeline_mode<synchronous>, transform_indices = @transform_3, window_bounds = array<i64: 64, 128>}, {pipeline_mode = #tpu.pipeline_mode<synchronous>, transform_indices = @transform_4, window_bounds = array<i64: 64, 128>}, {pipeline_mode = #tpu.pipeline_mode<synchronous>, transform_indices = @transform_5, window_bounds = array<i64: 1, 128>}, {transform_indices = @transform_6, window_bounds = array<i64: 1, 16, 128>}]} {
    %c0 = arith.constant 0 : index
    %c0_0 = arith.constant 0 : index
    %c0_1 = arith.constant 0 : index
    %0 = vector.load %arg2[%c0, %c0_0, %c0_1] : memref<1x16x64xf32, #tpu.memory_space<vmem>>, vector<1x16x64xf32>
    %1 = vector.shape_cast %0 : vector<1x16x64xf32> to vector<16x64xf32>
    %2 = arith.truncf %1 : vector<16x64xf32> to vector<16x64xbf16>
    %c0_2 = arith.constant 0 : index
    %c0_3 = arith.constant 0 : index
    %c0_4 = arith.constant 0 : index
    %3 = vector.load %arg3[%c0_2, %c0_3, %c0_4] : memref<1x16x64xf32, #tpu.memory_space<vmem>>, vector<1x16x64xf32>
    %4 = vector.shape_cast %3 : vector<1x16x64xf32> to vector<16x64xf32>
    %5 = arith.truncf %4 : vector<16x64xf32> to vector<16x64xbf16>
    %c0_5 = arith.constant 0 : index
    %c0_6 = arith.constant 0 : index
    %6 = vector.load %arg5[%c0_5, %c0_6] : memref<64x128xbf16, #tpu.memory_space<vmem>>, vector<64x128xbf16>
    %cst = arith.constant dense<0.000000e+00> : vector<16x128xf32>
    %7 = tpu.matmul %2, %6, %cst {dimension_numbers = #tpu.dot_dimension_numbers<[1], [0], [0], [1], [0, 0, 1, 1], [], []>} : vector<16x64xbf16>, vector<64x128xbf16>, vector<16x128xf32> -> vector<16x128xf32>
    %8 = arith.truncf %7 : vector<16x128xf32> to vector<16x128xbf16>
    %c0_7 = arith.constant 0 : index
    %c0_8 = arith.constant 0 : index
    %9 = vector.load %arg6[%c0_7, %c0_8] : memref<64x128xbf16, #tpu.memory_space<vmem>>, vector<64x128xbf16>
    %cst_9 = arith.constant dense<0.000000e+00> : vector<16x128xf32>
    %10 = tpu.matmul %5, %9, %cst_9 {dimension_numbers = #tpu.dot_dimension_numbers<[1], [0], [0], [1], [0, 0, 1, 1], [], []>} : vector<16x64xbf16>, vector<64x128xbf16>, vector<16x128xf32> -> vector<16x128xf32>
    %c0_10 = arith.constant 0 : index
    %c0_11 = arith.constant 0 : index
    %11 = vector.load %arg7[%c0_10, %c0_11] : memref<1x128xf32, #tpu.memory_space<vmem>>, vector<1x128xf32>
    %12 = vector.broadcast %11 : vector<1x128xf32> to vector<16x128xf32>
    %13 = arith.addf %10, %12 : vector<16x128xf32>
    %c0_12 = arith.constant 0 : index
    %c0_13 = arith.constant 0 : index
    %c0_14 = arith.constant 0 : index
    %14 = vector.load %arg4[%c0_12, %c0_13, %c0_14] : memref<1x16x4xi32, #tpu.memory_space<vmem>>, vector<1x16x4xi32>
    %15 = vector.shape_cast %14 : vector<1x16x4xi32> to vector<16x4xi32>
    %16 = arith.sitofp %15 : vector<16x4xi32> to vector<16x4xf32>
    %17 = tpu.iota {dimensions = array<i32: 1>} : vector<16x4xi32>
    %18 = tpu.iota {dimensions = array<i32: 1>} : vector<16x16xi32>
    %19 = arith.sitofp %18 : vector<16x16xi32> to vector<16x16xf32>
    %c0_i32 = arith.constant 0 : i32
    %20 = vector.broadcast %c0_i32 : i32 to vector<16x4xi32>
    %21 = arith.cmpi eq, %17, %20 : vector<16x4xi32>
    %cst_15 = arith.constant 0.000000e+00 : f32
    %22 = vector.broadcast %cst_15 : f32 to vector<16x4xf32>
    %23 = arith.select %21, %16, %22 : vector<16x4xi1>, vector<16x4xf32>
    %cst_16 = arith.constant dense<0.000000e+00> : vector<16xf32>
    %24 = vector.multi_reduction <add>, %23, %cst_16 [1] : vector<16x4xf32> to vector<16xf32>
    %25 = vector.shape_cast %24 : vector<16xf32> to vector<16x1xf32>
    %26 = vector.broadcast %25 : vector<16x1xf32> to vector<16x16xf32>
    %27 = arith.cmpf oeq, %26, %19 : vector<16x16xf32>
    %cst_17 = arith.constant 1.000000e+00 : f32
    %cst_18 = arith.constant 0.000000e+00 : f32
    %28 = vector.broadcast %cst_17 : f32 to vector<16x16xf32>
    %29 = vector.broadcast %cst_18 : f32 to vector<16x16xf32>
    %30 = arith.select %27, %28, %29 : vector<16x16xi1>, vector<16x16xf32>
    %31 = arith.truncf %30 : vector<16x16xf32> to vector<16x16xbf16>
    %cst_19 = arith.constant dense<0.000000e+00> : vector<16x128xf32>
    %32 = tpu.matmul %31, %8, %cst_19 {dimension_numbers = #tpu.dot_dimension_numbers<[1], [0], [0], [1], [0, 0, 1, 1], [], []>} : vector<16x16xbf16>, vector<16x128xbf16>, vector<16x128xf32> -> vector<16x128xf32>
    %33 = arith.addf %32, %13 : vector<16x128xf32>
    %cst_20 = arith.constant 0.000000e+00 : f32
    %34 = vector.broadcast %cst_20 : f32 to vector<16x128xf32>
    %35 = arith.cmpf oge, %33, %34 : vector<16x128xf32>
    %cst_21 = arith.constant 2.000000e-01 : f32
    %36 = vector.broadcast %cst_21 : f32 to vector<16x128xf32>
    %37 = arith.mulf %36, %33 : vector<16x128xf32>
    %38 = arith.select %35, %33, %37 : vector<16x128xi1>, vector<16x128xf32>
    %c1_i32 = arith.constant 1 : i32
    %39 = vector.broadcast %c1_i32 : i32 to vector<16x4xi32>
    %40 = arith.cmpi eq, %17, %39 : vector<16x4xi32>
    %cst_22 = arith.constant 0.000000e+00 : f32
    %41 = vector.broadcast %cst_22 : f32 to vector<16x4xf32>
    %42 = arith.select %40, %16, %41 : vector<16x4xi1>, vector<16x4xf32>
    %cst_23 = arith.constant dense<0.000000e+00> : vector<16xf32>
    %43 = vector.multi_reduction <add>, %42, %cst_23 [1] : vector<16x4xf32> to vector<16xf32>
    %44 = vector.shape_cast %43 : vector<16xf32> to vector<16x1xf32>
    %45 = vector.broadcast %44 : vector<16x1xf32> to vector<16x16xf32>
    %46 = arith.cmpf oeq, %45, %19 : vector<16x16xf32>
    %cst_24 = arith.constant 1.000000e+00 : f32
    %cst_25 = arith.constant 0.000000e+00 : f32
    %47 = vector.broadcast %cst_24 : f32 to vector<16x16xf32>
    %48 = vector.broadcast %cst_25 : f32 to vector<16x16xf32>
    %49 = arith.select %46, %47, %48 : vector<16x16xi1>, vector<16x16xf32>
    %50 = arith.truncf %49 : vector<16x16xf32> to vector<16x16xbf16>
    %cst_26 = arith.constant dense<0.000000e+00> : vector<16x128xf32>
    %51 = tpu.matmul %50, %8, %cst_26 {dimension_numbers = #tpu.dot_dimension_numbers<[1], [0], [0], [1], [0, 0, 1, 1], [], []>} : vector<16x16xbf16>, vector<16x128xbf16>, vector<16x128xf32> -> vector<16x128xf32>
    %52 = arith.addf %51, %13 : vector<16x128xf32>
    %cst_27 = arith.constant 0.000000e+00 : f32
    %53 = vector.broadcast %cst_27 : f32 to vector<16x128xf32>
    %54 = arith.cmpf oge, %52, %53 : vector<16x128xf32>
    %cst_28 = arith.constant 2.000000e-01 : f32
    %55 = vector.broadcast %cst_28 : f32 to vector<16x128xf32>
    %56 = arith.mulf %55, %52 : vector<16x128xf32>
    %57 = arith.select %54, %52, %56 : vector<16x128xi1>, vector<16x128xf32>
    %58 = arith.maximumf %38, %57 : vector<16x128xf32>
    %c2_i32 = arith.constant 2 : i32
    %59 = vector.broadcast %c2_i32 : i32 to vector<16x4xi32>
    %60 = arith.cmpi eq, %17, %59 : vector<16x4xi32>
    %cst_29 = arith.constant 0.000000e+00 : f32
    %61 = vector.broadcast %cst_29 : f32 to vector<16x4xf32>
    %62 = arith.select %60, %16, %61 : vector<16x4xi1>, vector<16x4xf32>
    %cst_30 = arith.constant dense<0.000000e+00> : vector<16xf32>
    %63 = vector.multi_reduction <add>, %62, %cst_30 [1] : vector<16x4xf32> to vector<16xf32>
    %64 = vector.shape_cast %63 : vector<16xf32> to vector<16x1xf32>
    %65 = vector.broadcast %64 : vector<16x1xf32> to vector<16x16xf32>
    %66 = arith.cmpf oeq, %65, %19 : vector<16x16xf32>
    %cst_31 = arith.constant 1.000000e+00 : f32
    %cst_32 = arith.constant 0.000000e+00 : f32
    %67 = vector.broadcast %cst_31 : f32 to vector<16x16xf32>
    %68 = vector.broadcast %cst_32 : f32 to vector<16x16xf32>
    %69 = arith.select %66, %67, %68 : vector<16x16xi1>, vector<16x16xf32>
    %70 = arith.truncf %69 : vector<16x16xf32> to vector<16x16xbf16>
    %cst_33 = arith.constant dense<0.000000e+00> : vector<16x128xf32>
    %71 = tpu.matmul %70, %8, %cst_33 {dimension_numbers = #tpu.dot_dimension_numbers<[1], [0], [0], [1], [0, 0, 1, 1], [], []>} : vector<16x16xbf16>, vector<16x128xbf16>, vector<16x128xf32> -> vector<16x128xf32>
    %72 = arith.addf %71, %13 : vector<16x128xf32>
    %cst_34 = arith.constant 0.000000e+00 : f32
    %73 = vector.broadcast %cst_34 : f32 to vector<16x128xf32>
    %74 = arith.cmpf oge, %72, %73 : vector<16x128xf32>
    %cst_35 = arith.constant 2.000000e-01 : f32
    %75 = vector.broadcast %cst_35 : f32 to vector<16x128xf32>
    %76 = arith.mulf %75, %72 : vector<16x128xf32>
    %77 = arith.select %74, %72, %76 : vector<16x128xi1>, vector<16x128xf32>
    %78 = arith.maximumf %58, %77 : vector<16x128xf32>
    %c3_i32 = arith.constant 3 : i32
    %79 = vector.broadcast %c3_i32 : i32 to vector<16x4xi32>
    %80 = arith.cmpi eq, %17, %79 : vector<16x4xi32>
    %cst_36 = arith.constant 0.000000e+00 : f32
    %81 = vector.broadcast %cst_36 : f32 to vector<16x4xf32>
    %82 = arith.select %80, %16, %81 : vector<16x4xi1>, vector<16x4xf32>
    %cst_37 = arith.constant dense<0.000000e+00> : vector<16xf32>
    %83 = vector.multi_reduction <add>, %82, %cst_37 [1] : vector<16x4xf32> to vector<16xf32>
    %84 = vector.shape_cast %83 : vector<16xf32> to vector<16x1xf32>
    %85 = vector.broadcast %84 : vector<16x1xf32> to vector<16x16xf32>
    %86 = arith.cmpf oeq, %85, %19 : vector<16x16xf32>
    %cst_38 = arith.constant 1.000000e+00 : f32
    %cst_39 = arith.constant 0.000000e+00 : f32
    %87 = vector.broadcast %cst_38 : f32 to vector<16x16xf32>
    %88 = vector.broadcast %cst_39 : f32 to vector<16x16xf32>
    %89 = arith.select %86, %87, %88 : vector<16x16xi1>, vector<16x16xf32>
    %90 = arith.truncf %89 : vector<16x16xf32> to vector<16x16xbf16>
    %cst_40 = arith.constant dense<0.000000e+00> : vector<16x128xf32>
    %91 = tpu.matmul %90, %8, %cst_40 {dimension_numbers = #tpu.dot_dimension_numbers<[1], [0], [0], [1], [0, 0, 1, 1], [], []>} : vector<16x16xbf16>, vector<16x128xbf16>, vector<16x128xf32> -> vector<16x128xf32>
    %92 = arith.addf %91, %13 : vector<16x128xf32>
    %cst_41 = arith.constant 0.000000e+00 : f32
    %93 = vector.broadcast %cst_41 : f32 to vector<16x128xf32>
    %94 = arith.cmpf oge, %92, %93 : vector<16x128xf32>
    %cst_42 = arith.constant 2.000000e-01 : f32
    %95 = vector.broadcast %cst_42 : f32 to vector<16x128xf32>
    %96 = arith.mulf %95, %92 : vector<16x128xf32>
    %97 = arith.select %94, %92, %96 : vector<16x128xi1>, vector<16x128xf32>
    %98 = arith.maximumf %78, %97 : vector<16x128xf32>
    %c0_43 = arith.constant 0 : index
    %c0_44 = arith.constant 0 : index
    %c0_45 = arith.constant 0 : index
    %99 = vector.load %arg8[%c0_43, %c0_44, %c0_45] : memref<1x16x128xf32, #tpu.memory_space<vmem>>, vector<1x16x128xf32>
    %100 = vector.shape_cast %99 : vector<1x16x128xf32> to vector<16x128xf32>
    %101 = vector.shape_cast %98 : vector<16x128xf32> to vector<1x16x128xf32>
    tpu.vector_store %arg8[%c0_43, %c0_44, %c0_45], %101 {strides = array<i32>} : memref<1x16x128xf32, #tpu.memory_space<vmem>>, vector<1x16x128xf32>,
    return
  }
  func.func @transform_0(%arg0: i32, %arg1: i32) -> (i32, i32, i32) {
    %c0_i32 = arith.constant 0 : i32
    %c0_i32_0 = arith.constant 0 : i32
    %c0_i32_1 = arith.constant 0 : i32
    return %arg0, %c0_i32, %c0_i32_0 : i32, i32, i32
  }
  func.func @transform_1(%arg0: i32, %arg1: i32) -> (i32, i32, i32) {
    %c0_i32 = arith.constant 0 : i32
    %c0_i32_0 = arith.constant 0 : i32
    return %arg0, %arg1, %c0_i32 : i32, i32, i32
  }
  func.func @transform_2(%arg0: i32, %arg1: i32) -> (i32, i32, i32) {
    %c0_i32 = arith.constant 0 : i32
    %c0_i32_0 = arith.constant 0 : i32
    return %arg0, %arg1, %c0_i32 : i32, i32, i32
  }
  func.func @transform_3(%arg0: i32, %arg1: i32) -> (i32, i32) {
    %c0_i32 = arith.constant 0 : i32
    %c0_i32_0 = arith.constant 0 : i32
    %c0_i32_1 = arith.constant 0 : i32
    return %c0_i32, %c0_i32_0 : i32, i32
  }
  func.func @transform_4(%arg0: i32, %arg1: i32) -> (i32, i32) {
    %c0_i32 = arith.constant 0 : i32
    %c0_i32_0 = arith.constant 0 : i32
    %c0_i32_1 = arith.constant 0 : i32
    return %c0_i32, %c0_i32_0 : i32, i32
  }
  func.func @transform_5(%arg0: i32, %arg1: i32) -> (i32, i32) {
    %c0_i32 = arith.constant 0 : i32
    %c0_i32_0 = arith.constant 0 : i32
    %c0_i32_1 = arith.constant 0 : i32
    return %c0_i32, %c0_i32_0 : i32, i32
  }
  func.func @transform_6(%arg0: i32, %arg1: i32) -> (i32, i32, i32) {
    %c0_i32 = arith.constant 0 : i32
    %c0_i32_0 = arith.constant 0 : i32
    return %arg0, %arg1, %c0_i32 : i32, i32, i32
  }
}

module attributes {stable_mosaic.version = 11 : i64} {
  func.func @pdist_kernel(%arg0: i32, %arg1: i32, %arg2: memref<1x16x64xf32, #tpu.memory_space<vmem>>, %arg3: memref<1x16x64xf32, #tpu.memory_space<vmem>>, %arg4: memref<1x16x16xf32, #tpu.memory_space<vmem>>) attributes {dimension_semantics = [#tpu.dimension_semantics<parallel>, #tpu.dimension_semantics<parallel>], iteration_bounds = array<i64: 2, 1>, scalar_prefetch = 0 : i64, scratch_operands = 0 : i64, tpu.core_type = #tpu.core_type<tc>, window_params = [{transform_indices = @transform_0, window_bounds = array<i64: 1, 16, 64>}, {transform_indices = @transform_1, window_bounds = array<i64: 1, 16, 64>}, {transform_indices = @transform_2, window_bounds = array<i64: 1, 16, 16>}]} {
    %c0 = arith.constant 0 : index
    %c0_0 = arith.constant 0 : index
    %c0_1 = arith.constant 0 : index
    %0 = vector.load %arg2[%c0, %c0_0, %c0_1] : memref<1x16x64xf32, #tpu.memory_space<vmem>>, vector<1x16x64xf32>
    %1 = vector.shape_cast %0 : vector<1x16x64xf32> to vector<16x64xf32>
    %c0_2 = arith.constant 0 : index
    %c0_3 = arith.constant 0 : index
    %c0_4 = arith.constant 0 : index
    %2 = vector.load %arg3[%c0_2, %c0_3, %c0_4] : memref<1x16x64xf32, #tpu.memory_space<vmem>>, vector<1x16x64xf32>
    %3 = vector.shape_cast %2 : vector<1x16x64xf32> to vector<16x64xf32>
    %cst = arith.constant dense<0.000000e+00> : vector<16x16xf32>
    %4 = tpu.matmul %1, %3, %cst {dimension_numbers = #tpu.dot_dimension_numbers<[1], [1], [0], [0], [0, 0, 1, 0], [], []>} : vector<16x64xf32>, vector<16x64xf32>, vector<16x16xf32> -> vector<16x16xf32>
    %5 = arith.mulf %1, %1 : vector<16x64xf32>
    %cst_5 = arith.constant dense<0.000000e+00> : vector<16xf32>
    %6 = vector.multi_reduction <add>, %5, %cst_5 [1] : vector<16x64xf32> to vector<16xf32>
    %7 = vector.shape_cast %6 : vector<16xf32> to vector<16x1xf32>
    %8 = arith.mulf %3, %3 : vector<16x64xf32>
    %cst_6 = arith.constant 1.000000e+00 : f32
    %9 = vector.broadcast %cst_6 : f32 to vector<1x64xf32>
    %cst_7 = arith.constant dense<0.000000e+00> : vector<1x16xf32>
    %10 = tpu.matmul %9, %8, %cst_7 {dimension_numbers = #tpu.dot_dimension_numbers<[1], [1], [0], [0], [0, 0, 1, 0], [], []>} : vector<1x64xf32>, vector<16x64xf32>, vector<1x16xf32> -> vector<1x16xf32>
    %cst_8 = arith.constant 2.000000e+00 : f32
    %11 = vector.broadcast %cst_8 : f32 to vector<16x16xf32>
    %12 = arith.mulf %11, %4 : vector<16x16xf32>
    %13 = vector.broadcast %7 : vector<16x1xf32> to vector<16x16xf32>
    %14 = arith.subf %12, %13 : vector<16x16xf32>
    %15 = vector.broadcast %10 : vector<1x16xf32> to vector<16x16xf32>
    %16 = arith.subf %14, %15 : vector<16x16xf32>
    %c0_9 = arith.constant 0 : index
    %c0_10 = arith.constant 0 : index
    %c0_11 = arith.constant 0 : index
    %17 = vector.load %arg4[%c0_9, %c0_10, %c0_11] : memref<1x16x16xf32, #tpu.memory_space<vmem>>, vector<1x16x16xf32>
    %18 = vector.shape_cast %17 : vector<1x16x16xf32> to vector<16x16xf32>
    %19 = vector.shape_cast %16 : vector<16x16xf32> to vector<1x16x16xf32>
    tpu.vector_store %arg4[%c0_9, %c0_10, %c0_11], %19 {strides = array<i32>} : memref<1x16x16xf32, #tpu.memory_space<vmem>>, vector<1x16x16xf32>,
    return
  }
  func.func @transform_0(%arg0: i32, %arg1: i32) -> (i32, i32, i32) {
    %c0_i32 = arith.constant 0 : i32
    %c0_i32_0 = arith.constant 0 : i32
    return %arg0, %arg1, %c0_i32 : i32, i32, i32
  }
  func.func @transform_1(%arg0: i32, %arg1: i32) -> (i32, i32, i32) {
    %c0_i32 = arith.constant 0 : i32
    %c0_i32_0 = arith.constant 0 : i32
    %c0_i32_1 = arith.constant 0 : i32
    return %arg0, %c0_i32, %c0_i32_0 : i32, i32, i32
  }
  func.func @transform_2(%arg0: i32, %arg1: i32) -> (i32, i32, i32) {
    %c0_i32 = arith.constant 0 : i32
    %c0_i32_0 = arith.constant 0 : i32
    return %arg0, %arg1, %c0_i32 : i32, i32, i32
  }
}

module attributes {stable_mosaic.version = 11 : i64} {
  func.func @edgeconv_kernel(%arg0: i32, %arg1: i32, %arg2: memref<1x16x128xf32, #tpu.memory_space<vmem>>, %arg3: memref<1x16x128xf32, #tpu.memory_space<vmem>>, %arg4: memref<1x16x4xi32, #tpu.memory_space<vmem>>, %arg5: memref<128x256xbf16, #tpu.memory_space<vmem>>, %arg6: memref<128x256xbf16, #tpu.memory_space<vmem>>, %arg7: memref<1x256xf32, #tpu.memory_space<vmem>>, %arg8: memref<1x16x256xf32, #tpu.memory_space<vmem>>) attributes {dimension_semantics = [#tpu.dimension_semantics<parallel>, #tpu.dimension_semantics<parallel>], iteration_bounds = array<i64: 2, 1>, scalar_prefetch = 0 : i64, scratch_operands = 0 : i64, tpu.core_type = #tpu.core_type<tc>, window_params = [{transform_indices = @transform_0, window_bounds = array<i64: 1, 16, 128>}, {transform_indices = @transform_1, window_bounds = array<i64: 1, 16, 128>}, {transform_indices = @transform_2, window_bounds = array<i64: 1, 16, 4>}, {pipeline_mode = #tpu.pipeline_mode<synchronous>, transform_indices = @transform_3, window_bounds = array<i64: 128, 256>}, {pipeline_mode = #tpu.pipeline_mode<synchronous>, transform_indices = @transform_4, window_bounds = array<i64: 128, 256>}, {pipeline_mode = #tpu.pipeline_mode<synchronous>, transform_indices = @transform_5, window_bounds = array<i64: 1, 256>}, {transform_indices = @transform_6, window_bounds = array<i64: 1, 16, 256>}]} {
    %c0 = arith.constant 0 : index
    %c0_0 = arith.constant 0 : index
    %c0_1 = arith.constant 0 : index
    %0 = vector.load %arg2[%c0, %c0_0, %c0_1] : memref<1x16x128xf32, #tpu.memory_space<vmem>>, vector<1x16x128xf32>
    %1 = vector.shape_cast %0 : vector<1x16x128xf32> to vector<16x128xf32>
    %2 = arith.truncf %1 : vector<16x128xf32> to vector<16x128xbf16>
    %c0_2 = arith.constant 0 : index
    %c0_3 = arith.constant 0 : index
    %c0_4 = arith.constant 0 : index
    %3 = vector.load %arg3[%c0_2, %c0_3, %c0_4] : memref<1x16x128xf32, #tpu.memory_space<vmem>>, vector<1x16x128xf32>
    %4 = vector.shape_cast %3 : vector<1x16x128xf32> to vector<16x128xf32>
    %5 = arith.truncf %4 : vector<16x128xf32> to vector<16x128xbf16>
    %c0_5 = arith.constant 0 : index
    %c0_6 = arith.constant 0 : index
    %6 = vector.load %arg5[%c0_5, %c0_6] : memref<128x256xbf16, #tpu.memory_space<vmem>>, vector<128x256xbf16>
    %cst = arith.constant dense<0.000000e+00> : vector<16x256xf32>
    %7 = tpu.matmul %2, %6, %cst {dimension_numbers = #tpu.dot_dimension_numbers<[1], [0], [0], [1], [0, 0, 1, 1], [], []>} : vector<16x128xbf16>, vector<128x256xbf16>, vector<16x256xf32> -> vector<16x256xf32>
    %8 = arith.truncf %7 : vector<16x256xf32> to vector<16x256xbf16>
    %c0_7 = arith.constant 0 : index
    %c0_8 = arith.constant 0 : index
    %9 = vector.load %arg6[%c0_7, %c0_8] : memref<128x256xbf16, #tpu.memory_space<vmem>>, vector<128x256xbf16>
    %cst_9 = arith.constant dense<0.000000e+00> : vector<16x256xf32>
    %10 = tpu.matmul %5, %9, %cst_9 {dimension_numbers = #tpu.dot_dimension_numbers<[1], [0], [0], [1], [0, 0, 1, 1], [], []>} : vector<16x128xbf16>, vector<128x256xbf16>, vector<16x256xf32> -> vector<16x256xf32>
    %c0_10 = arith.constant 0 : index
    %c0_11 = arith.constant 0 : index
    %11 = vector.load %arg7[%c0_10, %c0_11] : memref<1x256xf32, #tpu.memory_space<vmem>>, vector<1x256xf32>
    %12 = vector.broadcast %11 : vector<1x256xf32> to vector<16x256xf32>
    %13 = arith.addf %10, %12 : vector<16x256xf32>
    %c0_12 = arith.constant 0 : index
    %c0_13 = arith.constant 0 : index
    %c0_14 = arith.constant 0 : index
    %14 = vector.load %arg4[%c0_12, %c0_13, %c0_14] : memref<1x16x4xi32, #tpu.memory_space<vmem>>, vector<1x16x4xi32>
    %15 = vector.shape_cast %14 : vector<1x16x4xi32> to vector<16x4xi32>
    %16 = arith.sitofp %15 : vector<16x4xi32> to vector<16x4xf32>
    %17 = tpu.iota {dimensions = array<i32: 1>} : vector<16x4xi32>
    %18 = tpu.iota {dimensions = array<i32: 1>} : vector<16x16xi32>
    %19 = arith.sitofp %18 : vector<16x16xi32> to vector<16x16xf32>
    %c0_i32 = arith.constant 0 : i32
    %20 = vector.broadcast %c0_i32 : i32 to vector<16x4xi32>
    %21 = arith.cmpi eq, %17, %20 : vector<16x4xi32>
    %cst_15 = arith.constant 0.000000e+00 : f32
    %22 = vector.broadcast %cst_15 : f32 to vector<16x4xf32>
    %23 = arith.select %21, %16, %22 : vector<16x4xi1>, vector<16x4xf32>
    %cst_16 = arith.constant dense<0.000000e+00> : vector<16xf32>
    %24 = vector.multi_reduction <add>, %23, %cst_16 [1] : vector<16x4xf32> to vector<16xf32>
    %25 = vector.shape_cast %24 : vector<16xf32> to vector<16x1xf32>
    %26 = vector.broadcast %25 : vector<16x1xf32> to vector<16x16xf32>
    %27 = arith.cmpf oeq, %26, %19 : vector<16x16xf32>
    %cst_17 = arith.constant 1.000000e+00 : f32
    %cst_18 = arith.constant 0.000000e+00 : f32
    %28 = vector.broadcast %cst_17 : f32 to vector<16x16xf32>
    %29 = vector.broadcast %cst_18 : f32 to vector<16x16xf32>
    %30 = arith.select %27, %28, %29 : vector<16x16xi1>, vector<16x16xf32>
    %31 = arith.truncf %30 : vector<16x16xf32> to vector<16x16xbf16>
    %cst_19 = arith.constant dense<0.000000e+00> : vector<16x256xf32>
    %32 = tpu.matmul %31, %8, %cst_19 {dimension_numbers = #tpu.dot_dimension_numbers<[1], [0], [0], [1], [0, 0, 1, 1], [], []>} : vector<16x16xbf16>, vector<16x256xbf16>, vector<16x256xf32> -> vector<16x256xf32>
    %33 = arith.addf %32, %13 : vector<16x256xf32>
    %cst_20 = arith.constant 0.000000e+00 : f32
    %34 = vector.broadcast %cst_20 : f32 to vector<16x256xf32>
    %35 = arith.cmpf oge, %33, %34 : vector<16x256xf32>
    %cst_21 = arith.constant 2.000000e-01 : f32
    %36 = vector.broadcast %cst_21 : f32 to vector<16x256xf32>
    %37 = arith.mulf %36, %33 : vector<16x256xf32>
    %38 = arith.select %35, %33, %37 : vector<16x256xi1>, vector<16x256xf32>
    %c1_i32 = arith.constant 1 : i32
    %39 = vector.broadcast %c1_i32 : i32 to vector<16x4xi32>
    %40 = arith.cmpi eq, %17, %39 : vector<16x4xi32>
    %cst_22 = arith.constant 0.000000e+00 : f32
    %41 = vector.broadcast %cst_22 : f32 to vector<16x4xf32>
    %42 = arith.select %40, %16, %41 : vector<16x4xi1>, vector<16x4xf32>
    %cst_23 = arith.constant dense<0.000000e+00> : vector<16xf32>
    %43 = vector.multi_reduction <add>, %42, %cst_23 [1] : vector<16x4xf32> to vector<16xf32>
    %44 = vector.shape_cast %43 : vector<16xf32> to vector<16x1xf32>
    %45 = vector.broadcast %44 : vector<16x1xf32> to vector<16x16xf32>
    %46 = arith.cmpf oeq, %45, %19 : vector<16x16xf32>
    %cst_24 = arith.constant 1.000000e+00 : f32
    %cst_25 = arith.constant 0.000000e+00 : f32
    %47 = vector.broadcast %cst_24 : f32 to vector<16x16xf32>
    %48 = vector.broadcast %cst_25 : f32 to vector<16x16xf32>
    %49 = arith.select %46, %47, %48 : vector<16x16xi1>, vector<16x16xf32>
    %50 = arith.truncf %49 : vector<16x16xf32> to vector<16x16xbf16>
    %cst_26 = arith.constant dense<0.000000e+00> : vector<16x256xf32>
    %51 = tpu.matmul %50, %8, %cst_26 {dimension_numbers = #tpu.dot_dimension_numbers<[1], [0], [0], [1], [0, 0, 1, 1], [], []>} : vector<16x16xbf16>, vector<16x256xbf16>, vector<16x256xf32> -> vector<16x256xf32>
    %52 = arith.addf %51, %13 : vector<16x256xf32>
    %cst_27 = arith.constant 0.000000e+00 : f32
    %53 = vector.broadcast %cst_27 : f32 to vector<16x256xf32>
    %54 = arith.cmpf oge, %52, %53 : vector<16x256xf32>
    %cst_28 = arith.constant 2.000000e-01 : f32
    %55 = vector.broadcast %cst_28 : f32 to vector<16x256xf32>
    %56 = arith.mulf %55, %52 : vector<16x256xf32>
    %57 = arith.select %54, %52, %56 : vector<16x256xi1>, vector<16x256xf32>
    %58 = arith.maximumf %38, %57 : vector<16x256xf32>
    %c2_i32 = arith.constant 2 : i32
    %59 = vector.broadcast %c2_i32 : i32 to vector<16x4xi32>
    %60 = arith.cmpi eq, %17, %59 : vector<16x4xi32>
    %cst_29 = arith.constant 0.000000e+00 : f32
    %61 = vector.broadcast %cst_29 : f32 to vector<16x4xf32>
    %62 = arith.select %60, %16, %61 : vector<16x4xi1>, vector<16x4xf32>
    %cst_30 = arith.constant dense<0.000000e+00> : vector<16xf32>
    %63 = vector.multi_reduction <add>, %62, %cst_30 [1] : vector<16x4xf32> to vector<16xf32>
    %64 = vector.shape_cast %63 : vector<16xf32> to vector<16x1xf32>
    %65 = vector.broadcast %64 : vector<16x1xf32> to vector<16x16xf32>
    %66 = arith.cmpf oeq, %65, %19 : vector<16x16xf32>
    %cst_31 = arith.constant 1.000000e+00 : f32
    %cst_32 = arith.constant 0.000000e+00 : f32
    %67 = vector.broadcast %cst_31 : f32 to vector<16x16xf32>
    %68 = vector.broadcast %cst_32 : f32 to vector<16x16xf32>
    %69 = arith.select %66, %67, %68 : vector<16x16xi1>, vector<16x16xf32>
    %70 = arith.truncf %69 : vector<16x16xf32> to vector<16x16xbf16>
    %cst_33 = arith.constant dense<0.000000e+00> : vector<16x256xf32>
    %71 = tpu.matmul %70, %8, %cst_33 {dimension_numbers = #tpu.dot_dimension_numbers<[1], [0], [0], [1], [0, 0, 1, 1], [], []>} : vector<16x16xbf16>, vector<16x256xbf16>, vector<16x256xf32> -> vector<16x256xf32>
    %72 = arith.addf %71, %13 : vector<16x256xf32>
    %cst_34 = arith.constant 0.000000e+00 : f32
    %73 = vector.broadcast %cst_34 : f32 to vector<16x256xf32>
    %74 = arith.cmpf oge, %72, %73 : vector<16x256xf32>
    %cst_35 = arith.constant 2.000000e-01 : f32
    %75 = vector.broadcast %cst_35 : f32 to vector<16x256xf32>
    %76 = arith.mulf %75, %72 : vector<16x256xf32>
    %77 = arith.select %74, %72, %76 : vector<16x256xi1>, vector<16x256xf32>
    %78 = arith.maximumf %58, %77 : vector<16x256xf32>
    %c3_i32 = arith.constant 3 : i32
    %79 = vector.broadcast %c3_i32 : i32 to vector<16x4xi32>
    %80 = arith.cmpi eq, %17, %79 : vector<16x4xi32>
    %cst_36 = arith.constant 0.000000e+00 : f32
    %81 = vector.broadcast %cst_36 : f32 to vector<16x4xf32>
    %82 = arith.select %80, %16, %81 : vector<16x4xi1>, vector<16x4xf32>
    %cst_37 = arith.constant dense<0.000000e+00> : vector<16xf32>
    %83 = vector.multi_reduction <add>, %82, %cst_37 [1] : vector<16x4xf32> to vector<16xf32>
    %84 = vector.shape_cast %83 : vector<16xf32> to vector<16x1xf32>
    %85 = vector.broadcast %84 : vector<16x1xf32> to vector<16x16xf32>
    %86 = arith.cmpf oeq, %85, %19 : vector<16x16xf32>
    %cst_38 = arith.constant 1.000000e+00 : f32
    %cst_39 = arith.constant 0.000000e+00 : f32
    %87 = vector.broadcast %cst_38 : f32 to vector<16x16xf32>
    %88 = vector.broadcast %cst_39 : f32 to vector<16x16xf32>
    %89 = arith.select %86, %87, %88 : vector<16x16xi1>, vector<16x16xf32>
    %90 = arith.truncf %89 : vector<16x16xf32> to vector<16x16xbf16>
    %cst_40 = arith.constant dense<0.000000e+00> : vector<16x256xf32>
    %91 = tpu.matmul %90, %8, %cst_40 {dimension_numbers = #tpu.dot_dimension_numbers<[1], [0], [0], [1], [0, 0, 1, 1], [], []>} : vector<16x16xbf16>, vector<16x256xbf16>, vector<16x256xf32> -> vector<16x256xf32>
    %92 = arith.addf %91, %13 : vector<16x256xf32>
    %cst_41 = arith.constant 0.000000e+00 : f32
    %93 = vector.broadcast %cst_41 : f32 to vector<16x256xf32>
    %94 = arith.cmpf oge, %92, %93 : vector<16x256xf32>
    %cst_42 = arith.constant 2.000000e-01 : f32
    %95 = vector.broadcast %cst_42 : f32 to vector<16x256xf32>
    %96 = arith.mulf %95, %92 : vector<16x256xf32>
    %97 = arith.select %94, %92, %96 : vector<16x256xi1>, vector<16x256xf32>
    %98 = arith.maximumf %78, %97 : vector<16x256xf32>
    %c0_43 = arith.constant 0 : index
    %c0_44 = arith.constant 0 : index
    %c0_45 = arith.constant 0 : index
    %99 = vector.load %arg8[%c0_43, %c0_44, %c0_45] : memref<1x16x256xf32, #tpu.memory_space<vmem>>, vector<1x16x256xf32>
    %100 = vector.shape_cast %99 : vector<1x16x256xf32> to vector<16x256xf32>
    %101 = vector.shape_cast %98 : vector<16x256xf32> to vector<1x16x256xf32>
    tpu.vector_store %arg8[%c0_43, %c0_44, %c0_45], %101 {strides = array<i32>} : memref<1x16x256xf32, #tpu.memory_space<vmem>>, vector<1x16x256xf32>,
    return
  }
  func.func @transform_0(%arg0: i32, %arg1: i32) -> (i32, i32, i32) {
    %c0_i32 = arith.constant 0 : i32
    %c0_i32_0 = arith.constant 0 : i32
    %c0_i32_1 = arith.constant 0 : i32
    return %arg0, %c0_i32, %c0_i32_0 : i32, i32, i32
  }
  func.func @transform_1(%arg0: i32, %arg1: i32) -> (i32, i32, i32) {
    %c0_i32 = arith.constant 0 : i32
    %c0_i32_0 = arith.constant 0 : i32
    return %arg0, %arg1, %c0_i32 : i32, i32, i32
  }
  func.func @transform_2(%arg0: i32, %arg1: i32) -> (i32, i32, i32) {
    %c0_i32 = arith.constant 0 : i32
    %c0_i32_0 = arith.constant 0 : i32
    return %arg0, %arg1, %c0_i32 : i32, i32, i32
  }
  func.func @transform_3(%arg0: i32, %arg1: i32) -> (i32, i32) {
    %c0_i32 = arith.constant 0 : i32
    %c0_i32_0 = arith.constant 0 : i32
    %c0_i32_1 = arith.constant 0 : i32
    return %c0_i32, %c0_i32_0 : i32, i32
  }
  func.func @transform_4(%arg0: i32, %arg1: i32) -> (i32, i32) {
    %c0_i32 = arith.constant 0 : i32
    %c0_i32_0 = arith.constant 0 : i32
    %c0_i32_1 = arith.constant 0 : i32
    return %c0_i32, %c0_i32_0 : i32, i32
  }
  func.func @transform_5(%arg0: i32, %arg1: i32) -> (i32, i32) {
    %c0_i32 = arith.constant 0 : i32
    %c0_i32_0 = arith.constant 0 : i32
    %c0_i32_1 = arith.constant 0 : i32
    return %c0_i32, %c0_i32_0 : i32, i32
  }
  func.func @transform_6(%arg0: i32, %arg1: i32) -> (i32, i32, i32) {
    %c0_i32 = arith.constant 0 : i32
    %c0_i32_0 = arith.constant 0 : i32
    return %arg0, %arg1, %c0_i32 : i32, i32, i32
  }
}

module attributes {stable_mosaic.version = 11 : i64} {
  func.func @conv5_pool_kernel(%arg0: i32, %arg1: memref<1x16x64xf32, #tpu.memory_space<vmem>>, %arg2: memref<1x16x64xf32, #tpu.memory_space<vmem>>, %arg3: memref<1x16x128xf32, #tpu.memory_space<vmem>>, %arg4: memref<1x16x256xf32, #tpu.memory_space<vmem>>, %arg5: memref<64x128xbf16, #tpu.memory_space<vmem>>, %arg6: memref<64x128xbf16, #tpu.memory_space<vmem>>, %arg7: memref<128x128xbf16, #tpu.memory_space<vmem>>, %arg8: memref<256x128xbf16, #tpu.memory_space<vmem>>, %arg9: memref<1x128xf32, #tpu.memory_space<vmem>>, %arg10: memref<1x2x128xf32, #tpu.memory_space<vmem>>) attributes {dimension_semantics = [#tpu.dimension_semantics<parallel>], iteration_bounds = array<i64: 2>, scalar_prefetch = 0 : i64, scratch_operands = 0 : i64, tpu.core_type = #tpu.core_type<tc>, window_params = [{transform_indices = @transform_0, window_bounds = array<i64: 1, 16, 64>}, {transform_indices = @transform_1, window_bounds = array<i64: 1, 16, 64>}, {transform_indices = @transform_2, window_bounds = array<i64: 1, 16, 128>}, {transform_indices = @transform_3, window_bounds = array<i64: 1, 16, 256>}, {pipeline_mode = #tpu.pipeline_mode<synchronous>, transform_indices = @transform_4, window_bounds = array<i64: 64, 128>}, {pipeline_mode = #tpu.pipeline_mode<synchronous>, transform_indices = @transform_5, window_bounds = array<i64: 64, 128>}, {pipeline_mode = #tpu.pipeline_mode<synchronous>, transform_indices = @transform_6, window_bounds = array<i64: 128, 128>}, {pipeline_mode = #tpu.pipeline_mode<synchronous>, transform_indices = @transform_7, window_bounds = array<i64: 256, 128>}, {pipeline_mode = #tpu.pipeline_mode<synchronous>, transform_indices = @transform_8, window_bounds = array<i64: 1, 128>}, {transform_indices = @transform_9, window_bounds = array<i64: 1, 2, 128>}]} {
    %c0 = arith.constant 0 : index
    %c0_0 = arith.constant 0 : index
    %c0_1 = arith.constant 0 : index
    %0 = vector.load %arg1[%c0, %c0_0, %c0_1] : memref<1x16x64xf32, #tpu.memory_space<vmem>>, vector<1x16x64xf32>
    %1 = vector.shape_cast %0 : vector<1x16x64xf32> to vector<16x64xf32>
    %2 = arith.truncf %1 : vector<16x64xf32> to vector<16x64xbf16>
    %c0_2 = arith.constant 0 : index
    %c0_3 = arith.constant 0 : index
    %3 = vector.load %arg5[%c0_2, %c0_3] : memref<64x128xbf16, #tpu.memory_space<vmem>>, vector<64x128xbf16>
    %cst = arith.constant dense<0.000000e+00> : vector<16x128xf32>
    %4 = tpu.matmul %2, %3, %cst {dimension_numbers = #tpu.dot_dimension_numbers<[1], [0], [0], [1], [0, 0, 1, 1], [], []>} : vector<16x64xbf16>, vector<64x128xbf16>, vector<16x128xf32> -> vector<16x128xf32>
    %c0_4 = arith.constant 0 : index
    %c0_5 = arith.constant 0 : index
    %c0_6 = arith.constant 0 : index
    %5 = vector.load %arg2[%c0_4, %c0_5, %c0_6] : memref<1x16x64xf32, #tpu.memory_space<vmem>>, vector<1x16x64xf32>
    %6 = vector.shape_cast %5 : vector<1x16x64xf32> to vector<16x64xf32>
    %7 = arith.truncf %6 : vector<16x64xf32> to vector<16x64xbf16>
    %c0_7 = arith.constant 0 : index
    %c0_8 = arith.constant 0 : index
    %8 = vector.load %arg6[%c0_7, %c0_8] : memref<64x128xbf16, #tpu.memory_space<vmem>>, vector<64x128xbf16>
    %cst_9 = arith.constant dense<0.000000e+00> : vector<16x128xf32>
    %9 = tpu.matmul %7, %8, %cst_9 {dimension_numbers = #tpu.dot_dimension_numbers<[1], [0], [0], [1], [0, 0, 1, 1], [], []>} : vector<16x64xbf16>, vector<64x128xbf16>, vector<16x128xf32> -> vector<16x128xf32>
    %10 = arith.addf %4, %9 : vector<16x128xf32>
    %c0_10 = arith.constant 0 : index
    %c0_11 = arith.constant 0 : index
    %c0_12 = arith.constant 0 : index
    %11 = vector.load %arg3[%c0_10, %c0_11, %c0_12] : memref<1x16x128xf32, #tpu.memory_space<vmem>>, vector<1x16x128xf32>
    %12 = vector.shape_cast %11 : vector<1x16x128xf32> to vector<16x128xf32>
    %13 = arith.truncf %12 : vector<16x128xf32> to vector<16x128xbf16>
    %c0_13 = arith.constant 0 : index
    %c0_14 = arith.constant 0 : index
    %14 = vector.load %arg7[%c0_13, %c0_14] : memref<128x128xbf16, #tpu.memory_space<vmem>>, vector<128x128xbf16>
    %cst_15 = arith.constant dense<0.000000e+00> : vector<16x128xf32>
    %15 = tpu.matmul %13, %14, %cst_15 {dimension_numbers = #tpu.dot_dimension_numbers<[1], [0], [0], [1], [0, 0, 1, 1], [], []>} : vector<16x128xbf16>, vector<128x128xbf16>, vector<16x128xf32> -> vector<16x128xf32>
    %16 = arith.addf %10, %15 : vector<16x128xf32>
    %c0_16 = arith.constant 0 : index
    %c0_17 = arith.constant 0 : index
    %c0_18 = arith.constant 0 : index
    %17 = vector.load %arg4[%c0_16, %c0_17, %c0_18] : memref<1x16x256xf32, #tpu.memory_space<vmem>>, vector<1x16x256xf32>
    %18 = vector.shape_cast %17 : vector<1x16x256xf32> to vector<16x256xf32>
    %19 = arith.truncf %18 : vector<16x256xf32> to vector<16x256xbf16>
    %c0_19 = arith.constant 0 : index
    %c0_20 = arith.constant 0 : index
    %20 = vector.load %arg8[%c0_19, %c0_20] : memref<256x128xbf16, #tpu.memory_space<vmem>>, vector<256x128xbf16>
    %cst_21 = arith.constant dense<0.000000e+00> : vector<16x128xf32>
    %21 = tpu.matmul %19, %20, %cst_21 {dimension_numbers = #tpu.dot_dimension_numbers<[1], [0], [0], [1], [0, 0, 1, 1], [], []>} : vector<16x256xbf16>, vector<256x128xbf16>, vector<16x128xf32> -> vector<16x128xf32>
    %22 = arith.addf %16, %21 : vector<16x128xf32>
    %c0_22 = arith.constant 0 : index
    %c0_23 = arith.constant 0 : index
    %23 = vector.load %arg9[%c0_22, %c0_23] : memref<1x128xf32, #tpu.memory_space<vmem>>, vector<1x128xf32>
    %24 = vector.broadcast %23 : vector<1x128xf32> to vector<16x128xf32>
    %25 = arith.addf %22, %24 : vector<16x128xf32>
    %cst_24 = arith.constant 0.000000e+00 : f32
    %26 = vector.broadcast %cst_24 : f32 to vector<16x128xf32>
    %27 = arith.cmpf oge, %25, %26 : vector<16x128xf32>
    %cst_25 = arith.constant 2.000000e-01 : f32
    %28 = vector.broadcast %cst_25 : f32 to vector<16x128xf32>
    %29 = arith.mulf %28, %25 : vector<16x128xf32>
    %30 = arith.select %27, %25, %29 : vector<16x128xi1>, vector<16x128xf32>
    %cst_26 = arith.constant dense<0xFF800000> : vector<128xf32>
    %31 = vector.multi_reduction <maximumf>, %30, %cst_26 [0] : vector<16x128xf32> to vector<128xf32>
    %32 = vector.shape_cast %31 : vector<128xf32> to vector<1x128xf32>
    %cst_27 = arith.constant dense<0.000000e+00> : vector<128xf32>
    %33 = vector.multi_reduction <add>, %30, %cst_27 [0] : vector<16x128xf32> to vector<128xf32>
    %34 = vector.shape_cast %33 : vector<128xf32> to vector<1x128xf32>
    %cst_28 = arith.constant 1.600000e+01 : f32
    %35 = vector.broadcast %cst_28 : f32 to vector<1x128xf32>
    %36 = arith.divf %34, %35 : vector<1x128xf32>
    %37 = tpu.concatenate %32, %36 in 0 : vector<1x128xf32>, vector<1x128xf32> -> vector<2x128xf32>
    %c0_29 = arith.constant 0 : index
    %c0_30 = arith.constant 0 : index
    %c0_31 = arith.constant 0 : index
    %38 = vector.load %arg10[%c0_29, %c0_30, %c0_31] : memref<1x2x128xf32, #tpu.memory_space<vmem>>, vector<1x2x128xf32>
    %39 = vector.shape_cast %38 : vector<1x2x128xf32> to vector<2x128xf32>
    %40 = vector.shape_cast %37 : vector<2x128xf32> to vector<1x2x128xf32>
    tpu.vector_store %arg10[%c0_29, %c0_30, %c0_31], %40 {strides = array<i32>} : memref<1x2x128xf32, #tpu.memory_space<vmem>>, vector<1x2x128xf32>,
    return
  }
  func.func @transform_0(%arg0: i32) -> (i32, i32, i32) {
    %c0_i32 = arith.constant 0 : i32
    %c0_i32_0 = arith.constant 0 : i32
    %c0_i32_1 = arith.constant 0 : i32
    return %arg0, %c0_i32, %c0_i32_0 : i32, i32, i32
  }
  func.func @transform_1(%arg0: i32) -> (i32, i32, i32) {
    %c0_i32 = arith.constant 0 : i32
    %c0_i32_0 = arith.constant 0 : i32
    %c0_i32_1 = arith.constant 0 : i32
    return %arg0, %c0_i32, %c0_i32_0 : i32, i32, i32
  }
  func.func @transform_2(%arg0: i32) -> (i32, i32, i32) {
    %c0_i32 = arith.constant 0 : i32
    %c0_i32_0 = arith.constant 0 : i32
    %c0_i32_1 = arith.constant 0 : i32
    return %arg0, %c0_i32, %c0_i32_0 : i32, i32, i32
  }
  func.func @transform_3(%arg0: i32) -> (i32, i32, i32) {
    %c0_i32 = arith.constant 0 : i32
    %c0_i32_0 = arith.constant 0 : i32
    %c0_i32_1 = arith.constant 0 : i32
    return %arg0, %c0_i32, %c0_i32_0 : i32, i32, i32
  }
  func.func @transform_4(%arg0: i32) -> (i32, i32) {
    %c0_i32 = arith.constant 0 : i32
    %c0_i32_0 = arith.constant 0 : i32
    %c0_i32_1 = arith.constant 0 : i32
    return %c0_i32, %c0_i32_0 : i32, i32
  }
  func.func @transform_5(%arg0: i32) -> (i32, i32) {
    %c0_i32 = arith.constant 0 : i32
    %c0_i32_0 = arith.constant 0 : i32
    %c0_i32_1 = arith.constant 0 : i32
    return %c0_i32, %c0_i32_0 : i32, i32
  }
  func.func @transform_6(%arg0: i32) -> (i32, i32) {
    %c0_i32 = arith.constant 0 : i32
    %c0_i32_0 = arith.constant 0 : i32
    %c0_i32_1 = arith.constant 0 : i32
    return %c0_i32, %c0_i32_0 : i32, i32
  }
  func.func @transform_7(%arg0: i32) -> (i32, i32) {
    %c0_i32 = arith.constant 0 : i32
    %c0_i32_0 = arith.constant 0 : i32
    %c0_i32_1 = arith.constant 0 : i32
    return %c0_i32, %c0_i32_0 : i32, i32
  }
  func.func @transform_8(%arg0: i32) -> (i32, i32) {
    %c0_i32 = arith.constant 0 : i32
    %c0_i32_0 = arith.constant 0 : i32
    %c0_i32_1 = arith.constant 0 : i32
    return %c0_i32, %c0_i32_0 : i32, i32
  }
  func.func @transform_9(%arg0: i32) -> (i32, i32, i32) {
    %c0_i32 = arith.constant 0 : i32
    %c0_i32_0 = arith.constant 0 : i32
    %c0_i32_1 = arith.constant 0 : i32
    return %arg0, %c0_i32, %c0_i32_0 : i32, i32, i32
  }
}

module attributes {stable_mosaic.version = 11 : i64} {
  func.func @head_kernel(%arg0: i32, %arg1: memref<2x256xf32, #tpu.memory_space<vmem>>, %arg2: memref<256x512xbf16, #tpu.memory_space<vmem>>, %arg3: memref<1x512xf32, #tpu.memory_space<vmem>>, %arg4: memref<512x256xbf16, #tpu.memory_space<vmem>>, %arg5: memref<1x256xf32, #tpu.memory_space<vmem>>, %arg6: memref<256x40xbf16, #tpu.memory_space<vmem>>, %arg7: memref<1x40xf32, #tpu.memory_space<vmem>>, %arg8: memref<2x40xf32, #tpu.memory_space<vmem>>) attributes {dimension_semantics = [#tpu.dimension_semantics<arbitrary>], iteration_bounds = array<i64: 1>, scalar_prefetch = 0 : i64, scratch_operands = 0 : i64, tpu.core_type = #tpu.core_type<tc>, window_params = [{pipeline_mode = #tpu.pipeline_mode<synchronous>, transform_indices = @transform_0, window_bounds = array<i64: 2, 256>}, {pipeline_mode = #tpu.pipeline_mode<synchronous>, transform_indices = @transform_1, window_bounds = array<i64: 256, 512>}, {pipeline_mode = #tpu.pipeline_mode<synchronous>, transform_indices = @transform_2, window_bounds = array<i64: 1, 512>}, {pipeline_mode = #tpu.pipeline_mode<synchronous>, transform_indices = @transform_3, window_bounds = array<i64: 512, 256>}, {pipeline_mode = #tpu.pipeline_mode<synchronous>, transform_indices = @transform_4, window_bounds = array<i64: 1, 256>}, {pipeline_mode = #tpu.pipeline_mode<synchronous>, transform_indices = @transform_5, window_bounds = array<i64: 256, 40>}, {pipeline_mode = #tpu.pipeline_mode<synchronous>, transform_indices = @transform_6, window_bounds = array<i64: 1, 40>}, {pipeline_mode = #tpu.pipeline_mode<synchronous>, transform_indices = @transform_7, window_bounds = array<i64: 2, 40>}]} {
    %c0 = arith.constant 0 : index
    %c0_0 = arith.constant 0 : index
    %0 = vector.load %arg1[%c0, %c0_0] : memref<2x256xf32, #tpu.memory_space<vmem>>, vector<2x256xf32>
    %1 = arith.truncf %0 : vector<2x256xf32> to vector<2x256xbf16>
    %c0_1 = arith.constant 0 : index
    %c0_2 = arith.constant 0 : index
    %2 = vector.load %arg2[%c0_1, %c0_2] : memref<256x512xbf16, #tpu.memory_space<vmem>>, vector<256x512xbf16>
    %cst = arith.constant dense<0.000000e+00> : vector<2x512xf32>
    %3 = tpu.matmul %1, %2, %cst {dimension_numbers = #tpu.dot_dimension_numbers<[1], [0], [0], [1], [0, 0, 1, 1], [], []>} : vector<2x256xbf16>, vector<256x512xbf16>, vector<2x512xf32> -> vector<2x512xf32>
    %c0_3 = arith.constant 0 : index
    %c0_4 = arith.constant 0 : index
    %4 = vector.load %arg3[%c0_3, %c0_4] : memref<1x512xf32, #tpu.memory_space<vmem>>, vector<1x512xf32>
    %5 = vector.broadcast %4 : vector<1x512xf32> to vector<2x512xf32>
    %6 = arith.addf %3, %5 : vector<2x512xf32>
    %cst_5 = arith.constant 0.000000e+00 : f32
    %7 = vector.broadcast %cst_5 : f32 to vector<2x512xf32>
    %8 = arith.cmpf oge, %6, %7 : vector<2x512xf32>
    %cst_6 = arith.constant 2.000000e-01 : f32
    %9 = vector.broadcast %cst_6 : f32 to vector<2x512xf32>
    %10 = arith.mulf %9, %6 : vector<2x512xf32>
    %11 = arith.select %8, %6, %10 : vector<2x512xi1>, vector<2x512xf32>
    %12 = arith.truncf %11 : vector<2x512xf32> to vector<2x512xbf16>
    %c0_7 = arith.constant 0 : index
    %c0_8 = arith.constant 0 : index
    %13 = vector.load %arg4[%c0_7, %c0_8] : memref<512x256xbf16, #tpu.memory_space<vmem>>, vector<512x256xbf16>
    %cst_9 = arith.constant dense<0.000000e+00> : vector<2x256xf32>
    %14 = tpu.matmul %12, %13, %cst_9 {dimension_numbers = #tpu.dot_dimension_numbers<[1], [0], [0], [1], [0, 0, 1, 1], [], []>} : vector<2x512xbf16>, vector<512x256xbf16>, vector<2x256xf32> -> vector<2x256xf32>
    %c0_10 = arith.constant 0 : index
    %c0_11 = arith.constant 0 : index
    %15 = vector.load %arg5[%c0_10, %c0_11] : memref<1x256xf32, #tpu.memory_space<vmem>>, vector<1x256xf32>
    %16 = vector.broadcast %15 : vector<1x256xf32> to vector<2x256xf32>
    %17 = arith.addf %14, %16 : vector<2x256xf32>
    %cst_12 = arith.constant 0.000000e+00 : f32
    %18 = vector.broadcast %cst_12 : f32 to vector<2x256xf32>
    %19 = arith.cmpf oge, %17, %18 : vector<2x256xf32>
    %cst_13 = arith.constant 2.000000e-01 : f32
    %20 = vector.broadcast %cst_13 : f32 to vector<2x256xf32>
    %21 = arith.mulf %20, %17 : vector<2x256xf32>
    %22 = arith.select %19, %17, %21 : vector<2x256xi1>, vector<2x256xf32>
    %23 = arith.truncf %22 : vector<2x256xf32> to vector<2x256xbf16>
    %c0_14 = arith.constant 0 : index
    %c0_15 = arith.constant 0 : index
    %24 = vector.load %arg6[%c0_14, %c0_15] : memref<256x40xbf16, #tpu.memory_space<vmem>>, vector<256x40xbf16>
    %cst_16 = arith.constant dense<0.000000e+00> : vector<2x40xf32>
    %25 = tpu.matmul %23, %24, %cst_16 {dimension_numbers = #tpu.dot_dimension_numbers<[1], [0], [0], [1], [0, 0, 1, 1], [], []>} : vector<2x256xbf16>, vector<256x40xbf16>, vector<2x40xf32> -> vector<2x40xf32>
    %c0_17 = arith.constant 0 : index
    %c0_18 = arith.constant 0 : index
    %26 = vector.load %arg7[%c0_17, %c0_18] : memref<1x40xf32, #tpu.memory_space<vmem>>, vector<1x40xf32>
    %27 = vector.broadcast %26 : vector<1x40xf32> to vector<2x40xf32>
    %28 = arith.addf %25, %27 : vector<2x40xf32>
    %c0_19 = arith.constant 0 : index
    %c0_20 = arith.constant 0 : index
    %29 = vector.load %arg8[%c0_19, %c0_20] : memref<2x40xf32, #tpu.memory_space<vmem>>, vector<2x40xf32>
    tpu.vector_store %arg8[%c0_19, %c0_20], %28 {strides = array<i32>} : memref<2x40xf32, #tpu.memory_space<vmem>>, vector<2x40xf32>,
    return
  }
  func.func @transform_0(%arg0: i32) -> (i32, i32) {
    %c0_i32 = arith.constant 0 : i32
    %c0_i32_0 = arith.constant 0 : i32
    %c0_i32_1 = arith.constant 0 : i32
    return %c0_i32, %c0_i32_0 : i32, i32
  }
  func.func @transform_1(%arg0: i32) -> (i32, i32) {
    %c0_i32 = arith.constant 0 : i32
    %c0_i32_0 = arith.constant 0 : i32
    %c0_i32_1 = arith.constant 0 : i32
    return %c0_i32, %c0_i32_0 : i32, i32
  }
  func.func @transform_2(%arg0: i32) -> (i32, i32) {
    %c0_i32 = arith.constant 0 : i32
    %c0_i32_0 = arith.constant 0 : i32
    %c0_i32_1 = arith.constant 0 : i32
    return %c0_i32, %c0_i32_0 : i32, i32
  }
  func.func @transform_3(%arg0: i32) -> (i32, i32) {
    %c0_i32 = arith.constant 0 : i32
    %c0_i32_0 = arith.constant 0 : i32
    %c0_i32_1 = arith.constant 0 : i32
    return %c0_i32, %c0_i32_0 : i32, i32
  }
  func.func @transform_4(%arg0: i32) -> (i32, i32) {
    %c0_i32 = arith.constant 0 : i32
    %c0_i32_0 = arith.constant 0 : i32
    %c0_i32_1 = arith.constant 0 : i32
    return %c0_i32, %c0_i32_0 : i32, i32
  }
  func.func @transform_5(%arg0: i32) -> (i32, i32) {
    %c0_i32 = arith.constant 0 : i32
    %c0_i32_0 = arith.constant 0 : i32
    %c0_i32_1 = arith.constant 0 : i32
    return %c0_i32, %c0_i32_0 : i32, i32
  }
  func.func @transform_6(%arg0: i32) -> (i32, i32) {
    %c0_i32 = arith.constant 0 : i32
    %c0_i32_0 = arith.constant 0 : i32
    %c0_i32_1 = arith.constant 0 : i32
    return %c0_i32, %c0_i32_0 : i32, i32
  }
  func.func @transform_7(%arg0: i32) -> (i32, i32) {
    %c0_i32 = arith.constant 0 : i32
    %c0_i32_0 = arith.constant 0 : i32
    %c0_i32_1 = arith.constant 0 : i32
    return %c0_i32, %c0_i32_0 : i32, i32
  }
}

</mosaic_0001>

<bundles_post_ra>
// kernel: dgcnn_brute_forward.11
= control target key start
LH: loop header
LB: loop body
LE: loop exit
PB: predicated region body
PF: predicated region fallthrough
CT: control target
= control target key end

     0   :  { %s333_s9 = smov 0   ;;  %s375_s0 = inlined_call_operand.vmem [shape: f32[2,16,3], index: 0, kind: input, shape index: {}]   ;;  %s376_s1 = inlined_call_operand.vmem [shape: f32[16,128], index: 1, kind: input, shape index: {}]   ;;  %s377_s2 = inlined_call_operand.vmem [shape: f32[2,16,128], index: 2, kind: output, shape index: {}]  }
   0x1 LB: > { %s289_s10 = sadd.s32 4294967295, %s316_s9   ;;  %p293_p0 = scmp.ge.s32.totalorder %s316_s9, 1  ;;  %s316_s9 = sphi %s333_s9, %s12_s9  }
   0x2   : > { %p112_p1 = scmp.lt.s32.totalorder %s316_s9, 3 }
   0x4   : > { %p113_p2 = pnand %p293_p0, %p112_p1 }
   0x5   : > { %p134_p3 = scmp.lt.s32.totalorder (!%p113_p2), %s289_s10, 1 }
   0x6   : > { %116 = sbr.rel (%p113_p2) target bundleno = 334 (0x14e), region = 28 }
   0xb   : > { %s379_s10 = smov (!%p134_p3, %s289_s10), 1  ;;  %vm148_vm0 = vcmask 23552   ;;  %v160_v4 = vlaneseq  ;;  %v146_v25 = vld [vmem:[%s376_s1] sm:$0xff]  ;;  %v147_v26 = vld [vmem:[%s376_s1 + $0x8] sm:$0xff] }
   0xc   : > { %s300_s11 = sshll.u32 %s379_s10, 4 }
   0xd   : > { %s138_s14 = scalar_lea.vmem %s375_s0, %s300_s11  ;;  %v161_v5 = vand.u32 127, %v160_v4  ;;  %s143_s21 = scalar_lea.vmem %s377_s2, %s300_s11 }
   0xe   : > { %v144_v0 = vld [vmem:[%s138_s14] sm:$0xff]  ;;  %v145_v1 = vld [vmem:[%s138_s14 + $0x8] sm:$0xff] }
   0xf   : > { %v149_v2 = vsel %vm148_vm0, %v144_v0, 0.0  ;;  %v152_v3 = vsel %vm148_vm0, %v145_v1, 0.0  ;;  %vm182_vm1 = vcmp.eq.s32.totalorder %v161_v5, 1  ;;  %vm162_vm2 = vcmp.eq.s32.totalorder %v161_v5, 0 }
  0x10   : > { %150 = vadd.xlane.f32.xlu0 %v149_v2  ;;  %vm204_vm3 = vcmp.eq.s32.totalorder %v161_v5, 2 }
  0x14   : > { %153 = vadd.xlane.f32.xlu0 %v152_v3 }
  0x99   : > { %v151_v6 = vpop.xlane.xlu0 %150 }
  0x9a   : > { %v156_v7 = vmul.f32 0.33333334, %v151_v6 }
  0x9c   : > { %v158_v8 = vsub.f32 %v156_v7, %v144_v0 }
  0x9d   : > { %v154_v9 = vpop.xlane.xlu0 %153 }
  0x9e   : > { %v157_v10 = vmul.f32 0.33333334, %v154_v9  ;;  %v183_v11 = vsel %vm182_vm1, %v158_v8, 0.0  ;;  %v163_v12 = vsel %vm162_vm2, %v158_v8, 0.0  ;;  %v205_v16 = vsel %vm204_vm3, %v158_v8, 0.0 }
  0x9f   : > { %v185_v13 = vsel %vm148_vm0, %v183_v11, 0.0  ;;  %v165_v14 = vsel %vm148_vm0, %v163_v12, 0.0  ;;  %v207_v18 = vsel %vm148_vm0, %v205_v16, 0.0 }
  0xa0   : > { %v159_v15 = vsub.f32 %v157_v10, %v145_v1  ;;  %186 = vadd.xlane.f32.xlu0 %v185_v13  ;;  %166 = vadd.xlane.f32.xlu1 %v165_v14 }
  0xa2   : > { %v164_v17 = vsel %vm162_vm2, %v159_v15, 0.0  ;;  %v184_v20 = vsel %vm182_vm1, %v159_v15, 0.0  ;;  %v206_v22 = vsel %vm204_vm3, %v159_v15, 0.0 }
  0xa3   : > { %v168_v19 = vsel %vm148_vm0, %v164_v17, 0.0  ;;  %v188_v21 = vsel %vm148_vm0, %v184_v20, 0.0  ;;  %v210_v23 = vsel %vm148_vm0, %v206_v22, 0.0 }
  0xa4   : > { %208 = vadd.xlane.f32.xlu0 %v207_v18  ;;  %169 = vadd.xlane.f32.xlu1 %v168_v19 }
  0xa8   : > { %189 = vadd.xlane.f32.xlu1 %v188_v21 }
  0xac   : > { %211 = vadd.xlane.f32.xlu1 %v210_v23 }
 0x129   : > { %v167_v24 = vpop.xlane.xlu1 %166  ;;  %v187_v27 = vpop.xlane.xlu0 %186 }
 0x12a   : > { %v171_v29 = vmul.f32 %v167_v24, %v146_v25  ;;  %v191_v33 = vmul.f32 %v187_v27, %v146_v25 }
 0x12d   : > { %v170_v28 = vpop.xlane.xlu1 %169  ;;  %v209_v36 = vpop.xlane.xlu0 %208 }
 0x12e   : > { %v172_v30 = vmul.f32 %v170_v28, %v147_v26  ;;  %v213_v41 = vmul.f32 %v209_v36, %v146_v25 }
 0x130   : > { %v173_v31 = vadd.f32 %v172_v30, %v171_v29 }
 0x131   : > { %v190_v32 = vpop.xlane.xlu1 %189 }
 0x132   : > { %v174_v34 = vrot.slane %v173_v31, 4  ;;  %v192_v35 = vmul.f32 %v190_v32, %v147_v26 }
 0x134   : > { %v175_v37 = vadd.f32 %v174_v34, %v173_v31  ;;  %v193_v38 = vadd.f32 %v192_v35, %v191_v33 }
 0x135   : > { %v212_v39 = vpop.xlane.xlu1 %211 }
 0x136   : > { %v176_v40 = vrot.slane %v175_v37, 2  ;;  %v194_v42 = vrot.slane %v193_v38, 4  ;;  %v214_v43 = vmul.f32 %v212_v39, %v147_v26 }
 0x138   : > { %v177_v44 = vadd.f32 %v176_v40, %v175_v37  ;;  %v195_v45 = vadd.f32 %v194_v42, %v193_v38  ;;  %v215_v46 = vadd.f32 %v214_v43, %v213_v41 }
 0x13a   : > { %v196_v47 = vrot.slane %v195_v45, 2  ;;  %v216_v48 = vrot.slane %v215_v46, 4  ;;  %v178_v49 = vrot.slane %v177_v44, 1 }
 0x13c   : > { %v197_v50 = vadd.f32 %v196_v47, %v195_v45  ;;  %v217_v51 = vadd.f32 %v216_v48, %v215_v46  ;;  %v179_v54 = vadd.f32 %v178_v49, %v177_v44 }
 0x13e   : > { %v198_v52 = vrot.slane %v197_v50, 1  ;;  %v218_v53 = vrot.slane %v217_v51, 2  ;;  %v180_v60 = vmul.f32 %v179_v54, %v167_v24  ;;  %v181_v61 = vmul.f32 %v179_v54, %v170_v28 }
 0x140   : > { %v199_v55 = vadd.f32 %v198_v52, %v197_v50  ;;  %v219_v56 = vadd.f32 %v218_v53, %v217_v51 }
 0x142   : > { %v200_v57 = vmul.f32 %v199_v55, %v187_v27  ;;  %v201_v58 = vmul.f32 %v199_v55, %v190_v32  ;;  %v220_v59 = vrot.slane %v219_v56, 1 }
 0x144   : > { %v221_v62 = vadd.f32 %v220_v59, %v219_v56  ;;  %v202_v63 = vadd.f32 %v200_v57, %v180_v60  ;;  %v203_v0 = vadd.f32 %v201_v58, %v181_v61 }
 0x146   : > { %v222_v1 = vmul.f32 %v221_v62, %v209_v36  ;;  %v223_v2 = vmul.f32 %v221_v62, %v212_v39 }
 0x148   : > { %v224_v3 = vadd.f32 %v222_v1, %v202_v63  ;;  %v225_v4 = vadd.f32 %v223_v2, %v203_v0 }
 0x14a   : > { %vm226_vm4 = vcmp.ge.f32.partialorder %v224_v3, 0.0  ;;  %vm227_vm5 = vcmp.ge.f32.partialorder %v225_v4, 0.0  ;;  %v228_v5 = vmul.f32 0.2, %v224_v3  ;;  %v229_v6 = vmul.f32 0.2, %v225_v4 }
 0x14c   : > { %v230_v7 = vsel %vm226_vm4, %v224_v3, %v228_v5  ;;  %v231_v8 = vsel %vm227_vm5, %v225_v4, %v229_v6 }
 0x14d   : > { %232 = vst [vmem:[%s143_s21] sm:$0xff] %v230_v7  ;;  %233 = vst [vmem:[%s143_s21 + $0x8] sm:$0xff] %v231_v8 }
 0x14e PF: > { %s12_s9 = sadd.s32 1, %s316_s9  }
 0x14f   : > { %p9_p4 = scmp.ge.s32.totalorder %s12_s9, 4  }
 0x151   :  { %11 = sbr.rel (!%p9_p4) target bundleno = 1 (0x1), region = 58 }

// kernel: dgcnn_brute_forward.12
= control target key start
LH: loop header
LB: loop body
LE: loop exit
PB: predicated region body
PF: predicated region fallthrough
CT: control target
= control target key end

     0   :  { %s578_s9 = smov 0   ;;  %s580_s10 = smov 0   ;;  %s619_s0 = inlined_call_operand.vmem [shape: f32[2,16,128], index: 0, kind: input, shape index: {}, may-alias: {0,1}]   ;;  %s620_s1 = inlined_call_operand.vmem [shape: f32[2,16,128], index: 1, kind: input, shape index: {}, may-alias: {0,1}]   ;;  %s621_s2 = inlined_call_operand.vmem [shape: f32[2,16,16], index: 2, kind: output, shape index: {}]  }
   0x1   :  { %s582_s11 = smov 0  }
   0x2 LB: > { %s24_s12 = sadd.s32 1, %s554_s10  ;;  %p476_p0 = scmp.ge.s32.totalorder %s558_s11, 1  ;;  %s558_s11 = sphi %s582_s11, %s12_s11   ;;  %s554_s10 = sphi %s580_s10, %s623_s10   ;;  %s550_s9 = sphi %s578_s9, %s622_s9  }
   0x3   : > { %p26_p1 = scmp.ge.s32.totalorder %s24_s12, 2  ;;  %p143_p2 = scmp.lt.s32.totalorder %s558_s11, 3 }
   0x5   : > { %s625_s12 = smov (%p26_p1, %s24_s12), 0  ;;  %p144_p3 = pnand %p476_p0, %p143_p2 }
   0x6   : > { %p179_p4 = scmp.lt.s32.totalorder (!%p144_p3), %s550_s9, 1 }
   0x7   : > { %147 = sbr.rel (%p144_p3) target bundleno = 226 (0xe2), region = 28 }
   0xc   : > { %v560_v0 = vmov 0.0   ;;  %vm561_vm0 = vmmov 0   ;;  %s627_s9 = smov (!%p179_p4, %s550_s9), 1  ;;  %v562_v9 = vmov 1.0   ;;  %v364_v10 = vlaneseq }
   0xd   : > { %502 = vmatprep.subr.mxu1 %v560_v0  ;;  %506 = vmatprep.mubr.msk.f32.mxu1 %vm561_vm0, %v560_v0  ;;  %s596_s13 = sshll.u32 %s627_s9, 4  ;;  %vm370_vm1 = vcmask 130048  }
   0xe   : > { %s192_s16 = scalar_lea.vmem %s620_s1, %s596_s13  ;;  %s186_s19 = scalar_lea.vmem %s619_s0, %s596_s13  ;;  %v365_v12 = vshrl.u32 %v364_v10, 7 }
   0xf   : > { %v206_v1 = vld [vmem:[%s192_s16 + $0x8] sm:$0xff]  ;;  %v205_v2 = vld [vmem:[%s192_s16] sm:$0xff]  ;;  %s201_s22 = scalar_lea.vmem %s621_s2, %s596_s13 }
  0x10   : > { %495 = vmatprep.subr.mxu0 %v206_v1  ;;  %v289_v3 = vmul.f32 %v206_v1, %v206_v1  ;;  %v203_v4 = vld [vmem:[%s186_s19] sm:$0xff]  ;;  %v288_v6 = vmul.f32 %v205_v2, %v205_v2  ;;  %v204_v7 = vld [vmem:[%s186_s19 + $0x8] sm:$0xff]  ;;  %v366_v13 = vsub.s32 0, %v365_v12 }
  0x11   : > { %496 = vmatpush3.xpose.msra.mxu0 %v206_v1  ;;  %499 = vmatprep.mubr.f32.mxu0 %v203_v4  ;;  %v282_v5 = vmul.f32 %v203_v4, %v203_v4  ;;  %v283_v8 = vmul.f32 %v204_v7, %v204_v7 }
  0x12   : > { %503 = vmatpush3.xpose.msra.mxu1 %v289_v3  ;;  %497 = vmatprep.subr.mxu0 %v205_v2 }
  0x13   : > { %504 = vmatprep.subr.mxu1 %v560_v0  ;;  %284 = vadd.xlane.f32.xlu0 %v282_v5 }
  0x15   : > { %498 = vmatpush3.xpose.msra.mxu0 %v205_v2 }
  0x16   : > { %505 = vmatpush3.xpose.msra.mxu1 %v288_v6 }
  0x17   : > { %286 = vadd.xlane.f32.xlu0 %v283_v8 }
  0x18   : > { %500 = vmatmul.mubr.f32.vlgmr.msra.gmra.mxu0 %v204_v7 }
  0x19   : > { %507 = vmatmul.mubr.f32.vlgmr.msra.gmra.mxu1 %v562_v9 }
  0x9c   : > { %v285_v11 = vpop.xlane.xlu0 %284 }
  0xa0   : > { %v287_v15 = vpop.xlane.xlu0 %286 }
  0xd8   : > { %v501_v14 = vpop.f32.mrf.mxu0 }
  0xd9   : > { %v361_v16 = vmul.f32 2.0, %v501_v14  ;;  %v356_v17 = vpop.f32.mrf.mxu1 }
  0xda   : > { %v367_v18 = vrot.slane %v356_v17, %v366_v13  ;;  %v273_v19 = vpop.f32.mrf.mxu0 }
  0xdb   : > { %v363_v20 = vsub.f32 %v361_v16, %v287_v15  ;;  %v360_v21 = vmul.f32 2.0, %v273_v19  ;;  %v508_v22 = vpop.f32.mrf.mxu1 }
  0xdd   : > { %v369_v23 = vsub.f32 %v363_v20, %v367_v18  ;;  %v362_v24 = vsub.f32 %v360_v21, %v285_v11 }
  0xdf   : > { %372 = vst.msk [vmem:[%s201_s22 + $0x8] sm:$0xff] %vm370_vm1, %v369_v23  ;;  %v368_v25 = vsub.f32 %v362_v24, %v367_v18 }
  0xe1   : > { %371 = vst.msk [vmem:[%s201_s22] sm:$0xff] %vm370_vm1, %v368_v25 }
  0xe2 PF: > { %s12_s11 = sadd.s32 1, %s558_s11   ;;  %s622_s9 = smov %s554_s10 }
  0xe3   : > { %p9_p5 = scmp.ge.s32.totalorder %s12_s11, 4   ;;  %s623_s10 = smov %s625_s12 }
  0xe5   :  { %11 = sbr.rel (!%p9_p5) target bundleno = 2 (0x2), region = 61 }

// kernel: dgcnn_brute_forward.13
= control target key start
LH: loop header
LB: loop body
LE: loop exit
PB: predicated region body
PF: predicated region fallthrough
CT: control target
= control target key end

     0   :  { %s1196_s21 = smov 0   ;;  %s1198_s22 = smov 0   ;;  %s1357_s0 = inlined_call_operand.vmem [shape: f32[2,16,128], index: 0, kind: input, shape index: {}, may-alias: {0,1}]   ;;  %s1358_s1 = inlined_call_operand.vmem [shape: f32[2,16,128], index: 1, kind: input, shape index: {}, may-alias: {0,1}]   ;;  %s1359_s2 = inlined_call_operand.vmem [shape: s32[2,16,4], index: 2, kind: input, shape index: {}]   ;;  %s1360_s3 = inlined_call_operand.vmem [shape: bf16[128,64], index: 3, kind: input, shape index: {}]   ;;  %s1361_s4 = inlined_call_operand.vmem [shape: bf16[128,64], index: 4, kind: input, shape index: {}]   ;;  %s1362_s5 = inlined_call_operand.vmem [shape: f32[1,64], index: 5, kind: input, shape index: {}]   ;;  %s1363_s6 = inlined_call_operand.vmem [shape: f32[2,16,64], index: 6, kind: output, shape index: {}]  }
   0x1   :  { %s1200_s23 = smov 0  }
   0x2 LB: > { %s28_s24 = sadd.s32 1, %s1153_s22  ;;  %p967_p0 = scmp.ge.s32.totalorder %s1157_s23, 1  ;;  %s1157_s23 = sphi %s1200_s23, %s16_s23   ;;  %s1153_s22 = sphi %s1198_s22, %s1365_s22   ;;  %s1149_s21 = sphi %s1196_s21, %s1364_s21  }
   0x3   : > { %p30_p1 = scmp.ge.s32.totalorder %s28_s24, 2  ;;  %p260_p2 = scmp.lt.s32.totalorder %s1157_s23, 3 }
   0x5   : > { %s1367_s24 = smov (%p30_p1, %s28_s24), 0  ;;  %p261_p3 = pnand %p967_p0, %p260_p2 }
   0x6   : > { %p312_p4 = scmp.lt.s32.totalorder (!%p261_p3), %s1149_s21, 1 }
   0x7   : > { %264 = sbr.rel (%p261_p3) target bundleno = 462 (0x1ce), region = 44 }
   0xc   : > { %v1119_v0 = vld [vmem:[%s1360_s3 + $0x38] sm:$0xff]   ;;  %v576_v1 = vlaneseq  ;;  %v1159_v2 = vmov 0.0   ;;  %v1120_v3 = vld [vmem:[%s1360_s3 + $0x30] sm:$0xff]   ;;  %vm1160_vm0 = vmmov 0   ;;  %s1369_s21 = smov (!%p312_p4, %s1149_s21), 1  ;;  %v1121_v5 = vld [vmem:[%s1360_s3 + $0x28] sm:$0xff]  }
   0xd   : > { %1029 = vmatprep.subr.bf16.mxu0 %v1159_v2  ;;  %1049 = vmatprep.subr.bf16.mxu1 %v1159_v2  ;;  %s1232_s7 = sshll.u32 %s1369_s21, 4  ;;  %v1122_v6 = vld [vmem:[%s1360_s3 + $0x20] sm:$0xff]   ;;  %vm582_vm3 = vcmask 31744   ;;  %v1127_v11 = vld [vmem:[%s1361_s4 + $0x38] sm:$0xff]   ;;  %v1128_v14 = vld [vmem:[%s1361_s4 + $0x30] sm:$0xff]   ;;  %vm594_vm10 = vcmask 130048  }
   0xe   : > { %1030 = vmatpush3.bf16.msra.mxu0 %v1119_v0  ;;  %1045 = vmatprep.mubr.msk.bf16.mxu0 %vm1160_vm0, %v1159_v2  ;;  %v1227_v4 = vand.u32 127, %v576_v1  ;;  %s335_s10 = scalar_lea.vmem %s1359_s2, %s1232_s7  ;;  %v1123_v19 = vld [vmem:[%s1360_s3 + $0x18] sm:$0xff]   ;;  %v1129_v24 = vld [vmem:[%s1361_s4 + $0x28] sm:$0xff]   ;;  %v1124_v25 = vld [vmem:[%s1360_s3 + $0x10] sm:$0xff]   ;;  %s316_s9 = scalar_lea.vmem %s1357_s0, %s1232_s7 }
   0xf   : > { %1031 = vmatprep.subr.bf16.mxu0 %v1159_v2  ;;  %1065 = vmatprep.mubr.msk.bf16.mxu1 %vm1160_vm0, %v1159_v2  ;;  %v572_v7 = vld [vmem:[%s335_s10] sm:$0xff]  ;;  %v573_v9 = vld [vmem:[%s335_s10 + $0x8] sm:$0xff]  ;;  %v1131_v34 = vld [vmem:[%s1361_s4 + $0x18] sm:$0xff]   ;;  %s325_s25 = scalar_lea.vmem %s1358_s1, %s1232_s7  ;;  %s345_s30 = scalar_lea.vmem %s1363_s6, %s1232_s7 }
  0x10   : > { %vm645_vm1 = vcmp.eq.s32.totalorder %v1227_v4, 1  ;;  %vm579_vm2 = vcmp.eq.s32.totalorder %v1227_v4, 0  ;;  %v574_v8 = vcvt.s32.f32 %v572_v7  ;;  %v575_v10 = vcvt.s32.f32 %v573_v9  ;;  %1050 = vmatpush3.bf16.msra.mxu1 %v1127_v11  ;;  %v1130_v30 = vld [vmem:[%s1361_s4 + $0x20] sm:$0xff]   ;;  %v1125_v31 = vld [vmem:[%s1360_s3 + $0x8] sm:$0xff]   ;;  %v1132_v38 = vld [vmem:[%s1361_s4 + $0x10] sm:$0xff]  }
  0x11   : > { %vm711_vm4 = vcmp.eq.s32.totalorder %v1227_v4, 2  ;;  %vm777_vm5 = vcmp.eq.s32.totalorder %v1227_v4, 3  ;;  %1051 = vmatprep.subr.bf16.mxu1 %v1159_v2  ;;  %v1126_v35 = vld [vmem:[%s1360_s3] sm:$0xff]   ;;  %v349_v37 = vld [vmem:[%s316_s9 + $0x8] sm:$0xff]  ;;  %v578_v49 = vcvt.s32.f32 %v1227_v4 }
  0x12   : > { %1032 = vmatpush3.bf16.msra.mxu0 %v1120_v3  ;;  %v646_v12 = vsel %vm645_vm1, %v574_v8, 0.0  ;;  %v580_v13 = vsel %vm579_vm2, %v574_v8, 0.0  ;;  %v647_v17 = vsel %vm645_vm1, %v575_v10, 0.0  ;;  %v581_v18 = vsel %vm579_vm2, %v575_v10, 0.0  ;;  %v348_v36 = vld [vmem:[%s316_s9] sm:$0xff]  ;;  %v1133_v40 = vld [vmem:[%s1361_s4 + $0x8] sm:$0xff]  }
  0x13   : > { %1033 = vmatprep.subr.bf16.mxu0 %v1159_v2  ;;  %v648_v15 = vsel %vm582_vm3, %v646_v12, 0.0  ;;  %v583_v16 = vsel %vm582_vm3, %v580_v13, 0.0  ;;  %v651_v20 = vsel %vm582_vm3, %v647_v17, 0.0  ;;  %v586_v21 = vsel %vm582_vm3, %v581_v18, 0.0  ;;  %v1134_v41 = vld [vmem:[%s1361_s4] sm:$0xff]   ;;  %v352_v43 = vld [vmem:[%s325_s25 + $0x8] sm:$0xff] }
  0x14   : > { %649 = vadd.xlane.f32.xlu1 %v648_v15  ;;  %584 = vadd.xlane.f32.xlu0 %v583_v16  ;;  %v712_v22 = vsel %vm711_vm4, %v574_v8, 0.0  ;;  %v713_v23 = vsel %vm711_vm4, %v575_v10, 0.0  ;;  %v779_v28 = vsel %vm777_vm5, %v575_v10, 0.0  ;;  %v778_v29 = vsel %vm777_vm5, %v574_v8, 0.0  ;;  %v351_v42 = vld [vmem:[%s325_s25] sm:$0xff] }
  0x15   : > { %1052 = vmatpush3.bf16.msra.mxu1 %v1128_v14  ;;  %v717_v26 = vsel %vm582_vm3, %v713_v23, 0.0  ;;  %v714_v27 = vsel %vm582_vm3, %v712_v22, 0.0  ;;  %v783_v32 = vsel %vm582_vm3, %v779_v28, 0.0  ;;  %v780_v33 = vsel %vm582_vm3, %v778_v29, 0.0  ;;  %v984_v12 = vld [vmem:[%s1362_s5] ss:$0 sm:$0xff] }
  0x16   : > { %1034 = vmatpush3.bf16.msra.mxu0 %v1121_v5  ;;  %1053 = vmatprep.subr.bf16.mxu1 %v1159_v2  ;;  %v350_v39 = vpack.c.bf16 %v349_v37, %v348_v36  ;;  %v353_v44 = vpack.c.bf16 %v352_v43, %v351_v42  ;;  %vm843_vm5 = vcmask 523264  }
  0x17   : > { %1035 = vmatprep.subr.bf16.mxu0 %v1159_v2 }
  0x18   : > { %652 = vadd.xlane.f32.xlu1 %v651_v20  ;;  %587 = vadd.xlane.f32.xlu0 %v586_v21 }
  0x19   : > { %1054 = vmatpush3.bf16.msra.mxu1 %v1129_v24 }
  0x1a   : > { %1036 = vmatpush3.bf16.msra.mxu0 %v1122_v6  ;;  %1055 = vmatprep.subr.bf16.mxu1 %v1159_v2 }
  0x1b   : > { %1037 = vmatprep.subr.bf16.mxu0 %v1159_v2 }
  0x1c   : > { %718 = vadd.xlane.f32.xlu1 %v717_v26  ;;  %715 = vadd.xlane.f32.xlu0 %v714_v27 }
  0x1d   : > { %1056 = vmatpush3.bf16.msra.mxu1 %v1130_v30 }
  0x1e   : > { %1038 = vmatpush3.bf16.msra.mxu0 %v1123_v19  ;;  %1057 = vmatprep.subr.bf16.mxu1 %v1159_v2 }
  0x1f   : > { %1039 = vmatprep.subr.bf16.mxu0 %v1159_v2 }
  0x20   : > { %784 = vadd.xlane.f32.xlu1 %v783_v32  ;;  %781 = vadd.xlane.f32.xlu0 %v780_v33 }
  0x21   : > { %1058 = vmatpush3.bf16.msra.mxu1 %v1131_v34 }
  0x22   : > { %1040 = vmatpush3.bf16.msra.mxu0 %v1124_v25  ;;  %1059 = vmatprep.subr.bf16.mxu1 %v1159_v2 }
  0x23   : > { %1041 = vmatprep.subr.bf16.mxu0 %v1159_v2 }
  0x25   : > { %1060 = vmatpush3.bf16.msra.mxu1 %v1132_v38 }
  0x26   : > { %1042 = vmatpush3.bf16.msra.mxu0 %v1125_v31  ;;  %1061 = vmatprep.subr.bf16.mxu1 %v1159_v2 }
  0x27   : > { %1043 = vmatprep.subr.bf16.mxu0 %v1159_v2 }
  0x29   : > { %1062 = vmatpush3.bf16.msra.mxu1 %v1133_v40 }
  0x2a   : > { %1044 = vmatpush3.bf16.msra.mxu0 %v1126_v35  ;;  %1063 = vmatprep.subr.bf16.mxu1 %v1159_v2 }
  0x2b   : > { %1069 = vmatprep.subr.bf16.mxu0 %v1159_v2 }
  0x2d   : > { %1046 = vmatmul.mubr.bf16.vlgmr.msra.gmra.mxu0 %v350_v39  ;;  %1064 = vmatpush3.bf16.msra.mxu1 %v1134_v41 }
  0x2e   : > { %1071 = vmatprep.mubr.msk.bf16.mxu0 %vm1160_vm0, %v1159_v2  ;;  %1075 = vmatprep.subr.bf16.mxu1 %v1159_v2 }
  0x30   : > { %1066 = vmatmul.mubr.bf16.vlgmr.msra.gmra.mxu1 %v353_v44 }
  0x31   : > { %1077 = vmatprep.mubr.msk.bf16.mxu1 %vm1160_vm0, %v1159_v2 }
  0x9d   : > { %v650_v45 = vpop.xlane.xlu1 %649  ;;  %v585_v46 = vpop.xlane.xlu0 %584 }
  0x9e   : > { %vm654_vm6 = vcmp.eq.f32.partialorder %v650_v45, %v578_v49  ;;  %vm589_vm8 = vcmp.eq.f32.partialorder %v585_v46, %v578_v49 }
  0x9f   : > { %v656_v54 = vsel %vm654_vm6, 1.0, %v1159_v2  ;;  %v591_v57 = vsel %vm589_vm8, 1.0, %v1159_v2 }
  0xa1   : > { %v653_v47 = vpop.xlane.xlu1 %652  ;;  %v588_v48 = vpop.xlane.xlu0 %587 }
  0xa2   : > { %vm655_vm7 = vcmp.eq.f32.partialorder %v653_v47, %v578_v49  ;;  %vm590_vm9 = vcmp.eq.f32.partialorder %v588_v48, %v578_v49 }
  0xa3   : > { %v657_v56 = vsel %vm655_vm7, 1.0, %v1159_v2  ;;  %v592_v59 = vsel %vm590_vm9, 1.0, %v1159_v2 }
  0xa4   : > { %v658_v63 = vpack.c.bf16 %v657_v56, %v656_v54  ;;  %v593_v0 = vpack.c.bf16 %v592_v59, %v591_v57 }
  0xa5   : > { %v719_v50 = vpop.xlane.xlu1 %718  ;;  %v716_v51 = vpop.xlane.xlu0 %715 }
  0xa6   : > { %vm721_vm13 = vcmp.eq.f32.partialorder %v719_v50, %v578_v49  ;;  %vm720_vm14 = vcmp.eq.f32.partialorder %v716_v51, %v578_v49 }
  0xa7   : > { %v723_v4 = vsel %vm721_vm13, 1.0, %v1159_v2  ;;  %v722_v5 = vsel %vm720_vm14, 1.0, %v1159_v2 }
  0xa8   : > { %v724_v7 = vpack.c.bf16 %v723_v4, %v722_v5 }
  0xa9   : > { %v785_v60 = vpop.xlane.xlu1 %784  ;;  %v782_v61 = vpop.xlane.xlu0 %781 }
  0xaa   : > { %vm787_vm11 = vcmp.eq.f32.partialorder %v785_v60, %v578_v49  ;;  %vm786_vm12 = vcmp.eq.f32.partialorder %v782_v61, %v578_v49 }
  0xab   : > { %v789_v1 = vsel %vm787_vm11, 1.0, %v1159_v2  ;;  %v788_v3 = vsel %vm786_vm12, 1.0, %v1159_v2 }
  0xac   : > { %v790_v6 = vpack.c.bf16 %v789_v1, %v788_v3 }
  0xed   : > { %v452_v52 = vpop.f32.mrf.mxu0 }
  0xef   : > { %v1047_v53 = vpop.f32.mrf.mxu0 }
  0xf0   : > { %v565_v8 = vpop.f32.mrf.mxu1 }
  0xf1   : > { %v455_v55 = vpop.f32.mrf.mxu0  ;;  %v566_v13 = vadd.f32 %v984_v12, %v565_v8 }
  0xf2   : > { %v459_v58 = vpack.c.bf16 %v455_v55, %v452_v52  ;;  %v1067_v9 = vpop.f32.mrf.mxu1 }
  0xf3   : > { %v1048_v62 = vpop.f32.mrf.mxu0 }
  0xf4   : > { %1070 = vmatpush3.bf16.msra.mxu0 %v459_v58  ;;  %1076 = vmatpush3.bf16.msra.mxu1 %v459_v58  ;;  %v568_v10 = vpop.f32.mrf.mxu1 }
  0xf5   : > { %1081 = vmatprep.subr.bf16.mxu0 %v1159_v2  ;;  %1087 = vmatprep.subr.bf16.mxu1 %v1159_v2  ;;  %v569_v19 = vadd.f32 %v984_v12, %v568_v10 }
  0xf6   : > { %v1068_v11 = vpop.f32.mrf.mxu1 }
  0xf7   : > { %1072 = vmatmul.mubr.msk.bf16.vlgmr.msra.gmra.mxu0 %vm594_vm10, %v593_v0  ;;  %1078 = vmatmul.mubr.msk.bf16.vlgmr.msra.gmra.mxu1 %vm594_vm10, %v658_v63 }
  0xf8   : > { %1082 = vmatpush3.bf16.msra.mxu0 %v459_v58  ;;  %1088 = vmatpush3.bf16.msra.mxu1 %v459_v58 }
  0xf9   : > { %1083 = vmatprep.mubr.msk.bf16.mxu0 %vm1160_vm0, %v1159_v2  ;;  %1089 = vmatprep.mubr.msk.bf16.mxu1 %vm1160_vm0, %v1159_v2 }
  0xff   : > { %1084 = vmatmul.mubr.msk.bf16.vlgmr.msra.gmra.mxu0 %vm594_vm10, %v724_v7  ;;  %1090 = vmatmul.mubr.msk.bf16.vlgmr.msra.gmra.mxu1 %vm594_vm10, %v790_v6 }
 0x1b7   : > { %v632_v14 = vpop.f32.mrf.mxu0  ;;  %v696_v15 = vpop.f32.mrf.mxu1 }
 0x1b8   : > { %v633_v16 = vadd.f32 %v632_v14, %v566_v13  ;;  %v697_v17 = vadd.f32 %v696_v15, %v566_v13 }
 0x1b9   : > { %v1073_v2 = vpop.f32.mrf.mxu0  ;;  %v1079_v18 = vpop.f32.mrf.mxu1 }
 0x1ba   : > { %v641_v20 = vmul.f32 0.2, %v633_v16  ;;  %v705_v21 = vmul.f32 0.2, %v697_v17  ;;  %vm639_vm15 = vcmp.ge.f32.partialorder %v633_v16, 0.0  ;;  %vm703_vm0 = vcmp.ge.f32.partialorder %v697_v17, 0.0 }
 0x1bb   : > { %v635_v22 = vpop.f32.mrf.mxu0  ;;  %v699_v23 = vpop.f32.mrf.mxu1 }
 0x1bc   : > { %v636_v24 = vadd.f32 %v635_v22, %v569_v19  ;;  %v700_v25 = vadd.f32 %v699_v23, %v569_v19  ;;  %v643_v28 = vsel %vm639_vm15, %v633_v16, %v641_v20  ;;  %v707_v29 = vsel %vm703_vm0, %v697_v17, %v705_v21 }
 0x1bd   : > { %v1074_v26 = vpop.f32.mrf.mxu0  ;;  %v1080_v27 = vpop.f32.mrf.mxu1  ;;  %v709_v40 = vmax.f32 %v643_v28, %v707_v29 }
 0x1be   : > { %v642_v30 = vmul.f32 0.2, %v636_v24  ;;  %vm640_vm1 = vcmp.ge.f32.partialorder %v636_v24, 0.0  ;;  %v706_v33 = vmul.f32 0.2, %v700_v25  ;;  %vm704_vm2 = vcmp.ge.f32.partialorder %v700_v25, 0.0 }
 0x1bf   : > { %v762_v31 = vpop.f32.mrf.mxu0  ;;  %v828_v32 = vpop.f32.mrf.mxu1 }
 0x1c0   : > { %v763_v34 = vadd.f32 %v762_v31, %v566_v13  ;;  %v829_v35 = vadd.f32 %v828_v32, %v566_v13  ;;  %v644_v41 = vsel %vm640_vm1, %v636_v24, %v642_v30  ;;  %v708_v44 = vsel %vm704_vm2, %v700_v25, %v706_v33 }
 0x1c1   : > { %v1085_v36 = vpop.f32.mrf.mxu0  ;;  %v1091_v37 = vpop.f32.mrf.mxu1  ;;  %v710_v54 = vmax.f32 %v644_v41, %v708_v44 }
 0x1c2   : > { %vm769_vm3 = vcmp.ge.f32.partialorder %v763_v34, 0.0  ;;  %v771_v38 = vmul.f32 0.2, %v763_v34  ;;  %v837_v39 = vmul.f32 0.2, %v829_v35  ;;  %vm835_vm4 = vcmp.ge.f32.partialorder %v829_v35, 0.0 }
 0x1c3   : > { %v765_v42 = vpop.f32.mrf.mxu0  ;;  %v831_v43 = vpop.f32.mrf.mxu1 }
 0x1c4   : > { %v773_v45 = vsel %vm769_vm3, %v763_v34, %v771_v38  ;;  %v766_v46 = vadd.f32 %v765_v42, %v569_v19  ;;  %v832_v47 = vadd.f32 %v831_v43, %v569_v19  ;;  %v839_v51 = vsel %vm835_vm4, %v829_v35, %v837_v39 }
 0x1c5   : > { %v775_v48 = vmax.f32 %v709_v40, %v773_v45  ;;  %v1086_v49 = vpop.f32.mrf.mxu0  ;;  %v1092_v50 = vpop.f32.mrf.mxu1 }
 0x1c6   : > { %vm770_vm6 = vcmp.ge.f32.partialorder %v766_v46, 0.0  ;;  %v772_v52 = vmul.f32 0.2, %v766_v46  ;;  %v838_v53 = vmul.f32 0.2, %v832_v47  ;;  %vm836_vm7 = vcmp.ge.f32.partialorder %v832_v47, 0.0 }
 0x1c7   : > { %v841_v55 = vmax.f32 %v775_v48, %v839_v51 }
 0x1c8   : > { %v774_v56 = vsel %vm770_vm6, %v766_v46, %v772_v52  ;;  %v840_v58 = vsel %vm836_vm7, %v832_v47, %v838_v53 }
 0x1c9   : > { %844 = vst.msk [vmem:[%s345_s30] sm:$0xff] %vm843_vm5, %v841_v55  ;;  %v776_v57 = vmax.f32 %v710_v54, %v774_v56 }
 0x1cb   : > { %v842_v59 = vmax.f32 %v776_v57, %v840_v58 }
 0x1cd   : > { %845 = vst.msk [vmem:[%s345_s30 + $0x8] sm:$0xff] %vm843_vm5, %v842_v59 }
 0x1ce PF: > { %s16_s23 = sadd.s32 1, %s1157_s23   ;;  %s1364_s21 = smov %s1153_s22 }
 0x1cf   : > { %p13_p5 = scmp.ge.s32.totalorder %s16_s23, 4   ;;  %s1365_s22 = smov %s1367_s24 }
 0x1d1   :  { %15 = sbr.rel (!%p13_p5) target bundleno = 2 (0x2), region = 80 }

// kernel: dgcnn_brute_forward.14
= control target key start
LH: loop header
LB: loop body
LE: loop exit
PB: predicated region body
PF: predicated region fallthrough
CT: control target
= control target key end

     0   :  { %s609_s9 = smov 0   ;;  %s611_s10 = smov 0   ;;  %s661_s0 = inlined_call_operand.vmem [shape: f32[2,16,64], index: 0, kind: input, shape index: {}, may-alias: {0,1}]   ;;  %s662_s1 = inlined_call_operand.vmem [shape: f32[2,16,64], index: 1, kind: input, shape index: {}, may-alias: {0,1}]   ;;  %s663_s2 = inlined_call_operand.vmem [shape: f32[2,16,16], index: 2, kind: output, shape index: {}]  }
   0x1   :  { %s613_s11 = smov 0  }
   0x2 LB: > { %s24_s12 = sadd.s32 1, %s585_s10  ;;  %p500_p0 = scmp.ge.s32.totalorder %s589_s11, 1  ;;  %s589_s11 = sphi %s613_s11, %s12_s11   ;;  %s585_s10 = sphi %s611_s10, %s665_s10   ;;  %s581_s9 = sphi %s609_s9, %s664_s9  }
   0x3   : > { %p26_p1 = scmp.ge.s32.totalorder %s24_s12, 2  ;;  %p143_p2 = scmp.lt.s32.totalorder %s589_s11, 3 }
   0x5   : > { %s667_s12 = smov (%p26_p1, %s24_s12), 0  ;;  %p144_p3 = pnand %p500_p0, %p143_p2 }
   0x6   : > { %p179_p4 = scmp.lt.s32.totalorder (!%p144_p3), %s581_s9, 1 }
   0x7   : > { %147 = sbr.rel (%p144_p3) target bundleno = 226 (0xe2), region = 28 }
   0xc   : > { %v591_v0 = vmov 0.0   ;;  %vm592_vm0 = vmmov 0   ;;  %s669_s9 = smov (!%p179_p4, %s581_s9), 1  ;;  %vm207_vm1 = vcmask 523264   ;;  %v593_v11 = vmov 1.0  }
   0xd   : > { %533 = vmatprep.subr.mxu1 %v591_v0  ;;  %537 = vmatprep.mubr.msk.f32.mxu1 %vm592_vm0, %v591_v0  ;;  %s627_s13 = sshll.u32 %s669_s9, 4  ;;  %v388_v12 = vlaneseq  ;;  %vm394_vm2 = vcmask 130048  }
   0xe   : > { %s192_s16 = scalar_lea.vmem %s662_s1, %s627_s13  ;;  %s186_s19 = scalar_lea.vmem %s661_s0, %s627_s13 }
   0xf   : > { %v206_v1 = vld [vmem:[%s192_s16 + $0x8] sm:$0xff]  ;;  %v205_v2 = vld [vmem:[%s192_s16] sm:$0xff]  ;;  %v389_v14 = vshrl.u32 %v388_v12, 7  ;;  %s201_s22 = scalar_lea.vmem %s663_s2, %s627_s13 }
  0x10   : > { %526 = vmatprep.subr.msk.mxu0 %vm207_vm1, %v206_v1  ;;  %v304_v3 = vmul.f32 %v206_v1, %v206_v1  ;;  %v203_v4 = vld [vmem:[%s186_s19] sm:$0xff]  ;;  %v204_v5 = vld [vmem:[%s186_s19 + $0x8] sm:$0xff]  ;;  %v303_v8 = vmul.f32 %v205_v2, %v205_v2 }
  0x11   : > { %527 = vmatpush3.xpose.msk.msra.mxu0 %vm207_vm1, %v206_v1  ;;  %530 = vmatprep.mubr.msk.f32.mxu0 %vm207_vm1, %v203_v4  ;;  %v295_v6 = vmul.f32 %v203_v4, %v203_v4  ;;  %v296_v7 = vmul.f32 %v204_v5, %v204_v5  ;;  %v390_v15 = vsub.s32 0, %v389_v14 }
  0x12   : > { %534 = vmatpush3.xpose.msk.msra.mxu1 %vm207_vm1, %v304_v3  ;;  %528 = vmatprep.subr.msk.mxu0 %vm207_vm1, %v205_v2 }
  0x13   : > { %535 = vmatprep.subr.mxu1 %v591_v0  ;;  %v297_v9 = vsel %vm207_vm1, %v295_v6, 0.0  ;;  %v300_v10 = vsel %vm207_vm1, %v296_v7, 0.0 }
  0x14   : > { %298 = vadd.xlane.f32.xlu0 %v297_v9 }
  0x15   : > { %529 = vmatpush3.xpose.msk.msra.mxu0 %vm207_vm1, %v205_v2 }
  0x16   : > { %536 = vmatpush3.xpose.msk.msra.mxu1 %vm207_vm1, %v303_v8 }
  0x18   : > { %531 = vmatmul.mubr.msk.f32.vlgmr.msra.gmra.mxu0 %vm207_vm1, %v204_v5  ;;  %301 = vadd.xlane.f32.xlu0 %v300_v10 }
  0x19   : > { %538 = vmatmul.mubr.msk.f32.vlgmr.msra.gmra.mxu1 %vm207_vm1, %v593_v11 }
  0x9d   : > { %v299_v13 = vpop.xlane.xlu0 %298 }
  0xa1   : > { %v302_v17 = vpop.xlane.xlu0 %301 }
  0xd8   : > { %v532_v16 = vpop.f32.mrf.mxu0 }
  0xd9   : > { %v385_v18 = vmul.f32 2.0, %v532_v16  ;;  %v380_v19 = vpop.f32.mrf.mxu1 }
  0xda   : > { %v391_v20 = vrot.slane %v380_v19, %v390_v15  ;;  %v286_v21 = vpop.f32.mrf.mxu0 }
  0xdb   : > { %v387_v22 = vsub.f32 %v385_v18, %v302_v17  ;;  %v384_v23 = vmul.f32 2.0, %v286_v21  ;;  %v539_v24 = vpop.f32.mrf.mxu1 }
  0xdd   : > { %v393_v25 = vsub.f32 %v387_v22, %v391_v20  ;;  %v386_v26 = vsub.f32 %v384_v23, %v299_v13 }
  0xdf   : > { %396 = vst.msk [vmem:[%s201_s22 + $0x8] sm:$0xff] %vm394_vm2, %v393_v25  ;;  %v392_v27 = vsub.f32 %v386_v26, %v391_v20 }
  0xe1   : > { %395 = vst.msk [vmem:[%s201_s22] sm:$0xff] %vm394_vm2, %v392_v27 }
  0xe2 PF: > { %s12_s11 = sadd.s32 1, %s589_s11   ;;  %s664_s9 = smov %s585_s10 }
  0xe3   : > { %p9_p5 = scmp.ge.s32.totalorder %s12_s11, 4   ;;  %s665_s10 = smov %s667_s12 }
  0xe5   :  { %11 = sbr.rel (!%p9_p5) target bundleno = 2 (0x2), region = 61 }

// kernel: dgcnn_brute_forward.15
= control target key start
LH: loop header
LB: loop body
LE: loop exit
PB: predicated region body
PF: predicated region fallthrough
CT: control target
= control target key end

     0   :  { %s1100_s21 = smov 0   ;;  %s1102_s22 = smov 0   ;;  %s1239_s0 = inlined_call_operand.vmem [shape: f32[2,16,64], index: 0, kind: input, shape index: {}, may-alias: {0,1}]   ;;  %s1240_s1 = inlined_call_operand.vmem [shape: f32[2,16,64], index: 1, kind: input, shape index: {}, may-alias: {0,1}]   ;;  %s1241_s2 = inlined_call_operand.vmem [shape: s32[2,16,4], index: 2, kind: input, shape index: {}]   ;;  %s1242_s3 = inlined_call_operand.vmem [shape: bf16[64,64], index: 3, kind: input, shape index: {}]   ;;  %s1243_s4 = inlined_call_operand.vmem [shape: bf16[64,64], index: 4, kind: input, shape index: {}]   ;;  %s1244_s5 = inlined_call_operand.vmem [shape: f32[1,64], index: 5, kind: input, shape index: {}]   ;;  %s1245_s6 = inlined_call_operand.vmem [shape: f32[2,16,64], index: 6, kind: output, shape index: {}]  }
   0x1   :  { %s1104_s23 = smov 0  }
   0x2 LB: > { %s28_s24 = sadd.s32 1, %s1057_s22  ;;  %p909_p0 = scmp.ge.s32.totalorder %s1061_s23, 1  ;;  %s1061_s23 = sphi %s1104_s23, %s16_s23   ;;  %s1057_s22 = sphi %s1102_s22, %s1247_s22   ;;  %s1053_s21 = sphi %s1100_s21, %s1246_s21  }
   0x3   : > { %p30_p1 = scmp.ge.s32.totalorder %s28_s24, 2  ;;  %p260_p2 = scmp.lt.s32.totalorder %s1061_s23, 3 }
   0x5   : > { %s1249_s24 = smov (%p30_p1, %s28_s24), 0  ;;  %p261_p3 = pnand %p909_p0, %p260_p2 }
   0x6   : > { %p312_p4 = scmp.lt.s32.totalorder (!%p261_p3), %s1053_s21, 1 }
   0x7   : > { %264 = sbr.rel (%p261_p3) target bundleno = 446 (0x1be), region = 44 }
   0xc   : > { %v1031_v0 = vld [vmem:[%s1242_s3 + $0x18] sm:$0xff]   ;;  %v519_v1 = vlaneseq  ;;  %v1063_v2 = vmov 0.0   ;;  %v1032_v3 = vld [vmem:[%s1242_s3 + $0x10] sm:$0xff]   ;;  %vm1064_vm0 = vmmov 0   ;;  %s1251_s21 = smov (!%p312_p4, %s1053_s21), 1  ;;  %v1033_v6 = vld [vmem:[%s1242_s3 + $0x8] sm:$0xff]  }
   0xd   : > { %957 = vmatprep.subr.bf16.mxu0 %v1063_v2  ;;  %969 = vmatprep.subr.bf16.mxu1 %v1063_v2  ;;  %v1035_v5 = vld [vmem:[%s1243_s4 + $0x18] sm:$0xff]   ;;  %s1139_s9 = sshll.u32 %s1251_s21, 4  ;;  %v1036_v7 = vld [vmem:[%s1243_s4 + $0x10] sm:$0xff]   ;;  %v1034_v8 = vld [vmem:[%s1242_s3] sm:$0xff]   ;;  %vm525_vm3 = vcmask 31744   ;;  %vm386_vm5 = vcmask 523264  }
   0xe   : > { %958 = vmatpush3.bf16.msra.mxu0 %v1031_v0  ;;  %965 = vmatprep.mubr.msk.bf16.mxu0 %vm1064_vm0, %v1063_v2  ;;  %v1131_v4 = vand.u32 127, %v519_v1  ;;  %s316_s14 = scalar_lea.vmem %s1239_s0, %s1139_s9  ;;  %s335_s17 = scalar_lea.vmem %s1241_s2, %s1139_s9  ;;  %v1037_v15 = vld [vmem:[%s1243_s4 + $0x8] sm:$0xff]   ;;  %v1038_v24 = vld [vmem:[%s1243_s4] sm:$0xff]   ;;  %vm537_vm11 = vcmask 130048  }
   0xf   : > { %959 = vmatprep.subr.bf16.mxu0 %v1063_v2  ;;  %977 = vmatprep.mubr.msk.bf16.mxu1 %vm1064_vm0, %v1063_v2  ;;  %v515_v9 = vld [vmem:[%s335_s17] sm:$0xff]  ;;  %v516_v11 = vld [vmem:[%s335_s17 + $0x8] sm:$0xff]  ;;  %s325_s29 = scalar_lea.vmem %s1240_s1, %s1139_s9  ;;  %s345_s11 = scalar_lea.vmem %s1245_s6, %s1139_s9 }
  0x10   : > { %970 = vmatpush3.bf16.msra.mxu1 %v1035_v5  ;;  %vm588_vm1 = vcmp.eq.s32.totalorder %v1131_v4, 1  ;;  %vm522_vm2 = vcmp.eq.s32.totalorder %v1131_v4, 0  ;;  %v517_v10 = vcvt.s32.f32 %v515_v9  ;;  %v348_v12 = vld [vmem:[%s316_s14] sm:$0xff]  ;;  %v349_v13 = vld [vmem:[%s316_s14 + $0x8] sm:$0xff]  ;;  %v518_v14 = vcvt.s32.f32 %v516_v11 }
  0x11   : > { %971 = vmatprep.subr.bf16.mxu1 %v1063_v2  ;;  %vm654_vm4 = vcmp.eq.s32.totalorder %v1131_v4, 2  ;;  %v350_v22 = vpack.c.bf16 %v349_v13, %v348_v12  ;;  %vm720_vm6 = vcmp.eq.s32.totalorder %v1131_v4, 3  ;;  %v351_v34 = vld [vmem:[%s325_s29] sm:$0xff]  ;;  %v352_v35 = vld [vmem:[%s325_s29 + $0x8] sm:$0xff]  ;;  %v521_v41 = vcvt.s32.f32 %v1131_v4 }
  0x12   : > { %960 = vmatpush3.bf16.msra.mxu0 %v1032_v3  ;;  %v589_v16 = vsel %vm588_vm1, %v517_v10, 0.0  ;;  %v523_v17 = vsel %vm522_vm2, %v517_v10, 0.0  ;;  %v590_v20 = vsel %vm588_vm1, %v518_v14, 0.0  ;;  %v524_v21 = vsel %vm522_vm2, %v518_v14, 0.0  ;;  %v923_v4 = vld [vmem:[%s1244_s5] ss:$0 sm:$0xff] }
  0x13   : > { %961 = vmatprep.subr.bf16.mxu0 %v1063_v2  ;;  %v591_v18 = vsel %vm525_vm3, %v589_v16, 0.0  ;;  %v526_v19 = vsel %vm525_vm3, %v523_v17, 0.0  ;;  %v594_v23 = vsel %vm525_vm3, %v590_v20, 0.0  ;;  %v529_v25 = vsel %vm525_vm3, %v524_v21, 0.0 }
  0x14   : > { %972 = vmatpush3.bf16.msra.mxu1 %v1036_v7  ;;  %592 = vadd.xlane.f32.xlu1 %v591_v18  ;;  %v656_v26 = vsel %vm654_vm4, %v518_v14, 0.0  ;;  %v655_v27 = vsel %vm654_vm4, %v517_v10, 0.0  ;;  %v722_v30 = vsel %vm720_vm6, %v518_v14, 0.0  ;;  %v721_v31 = vsel %vm720_vm6, %v517_v10, 0.0 }
  0x15   : > { %973 = vmatprep.subr.bf16.mxu1 %v1063_v2  ;;  %527 = vadd.xlane.f32.xlu0 %v526_v19  ;;  %v660_v28 = vsel %vm525_vm3, %v656_v26, 0.0  ;;  %v657_v29 = vsel %vm525_vm3, %v655_v27, 0.0  ;;  %v726_v32 = vsel %vm525_vm3, %v722_v30, 0.0  ;;  %v723_v33 = vsel %vm525_vm3, %v721_v31, 0.0 }
  0x16   : > { %962 = vmatpush3.bf16.msra.mxu0 %v1033_v6  ;;  %v353_v36 = vpack.c.bf16 %v352_v35, %v351_v34 }
  0x17   : > { %963 = vmatprep.subr.bf16.mxu0 %v1063_v2 }
  0x18   : > { %974 = vmatpush3.bf16.msra.mxu1 %v1037_v15  ;;  %595 = vadd.xlane.f32.xlu1 %v594_v23 }
  0x19   : > { %975 = vmatprep.subr.bf16.mxu1 %v1063_v2  ;;  %530 = vadd.xlane.f32.xlu0 %v529_v25 }
  0x1a   : > { %964 = vmatpush3.bf16.msra.mxu0 %v1034_v8 }
  0x1b   : > { %981 = vmatprep.subr.bf16.mxu0 %v1063_v2 }
  0x1c   : > { %976 = vmatpush3.bf16.msra.mxu1 %v1038_v24  ;;  %661 = vadd.xlane.f32.xlu1 %v660_v28 }
  0x1d   : > { %966 = vmatmul.mubr.msk.bf16.vlgmr.msra.gmra.mxu0 %vm386_vm5, %v350_v22  ;;  %987 = vmatprep.subr.bf16.mxu1 %v1063_v2 }
  0x1e   : > { %983 = vmatprep.mubr.msk.bf16.mxu0 %vm1064_vm0, %v1063_v2  ;;  %658 = vadd.xlane.f32.xlu0 %v657_v29 }
  0x1f   : > { %978 = vmatmul.mubr.msk.bf16.vlgmr.msra.gmra.mxu1 %vm386_vm5, %v353_v36 }
  0x20   : > { %727 = vadd.xlane.f32.xlu1 %v726_v32  ;;  %989 = vmatprep.mubr.msk.bf16.mxu1 %vm1064_vm0, %v1063_v2 }
  0x22   : > { %724 = vadd.xlane.f32.xlu0 %v723_v33 }
  0x9d   : > { %v593_v37 = vpop.xlane.xlu1 %592 }
  0x9e   : > { %v528_v38 = vpop.xlane.xlu0 %527  ;;  %vm597_vm7 = vcmp.eq.f32.partialorder %v593_v37, %v521_v41 }
  0x9f   : > { %vm532_vm9 = vcmp.eq.f32.partialorder %v528_v38, %v521_v41  ;;  %v599_v46 = vsel %vm597_vm7, 1.0, %v1063_v2 }
  0xa0   : > { %v534_v49 = vsel %vm532_vm9, 1.0, %v1063_v2 }
  0xa1   : > { %v596_v39 = vpop.xlane.xlu1 %595 }
  0xa2   : > { %v531_v40 = vpop.xlane.xlu0 %530  ;;  %vm598_vm8 = vcmp.eq.f32.partialorder %v596_v39, %v521_v41 }
  0xa3   : > { %vm533_vm10 = vcmp.eq.f32.partialorder %v531_v40, %v521_v41  ;;  %v600_v48 = vsel %vm598_vm8, 1.0, %v1063_v2 }
  0xa4   : > { %v535_v51 = vsel %vm533_vm10, 1.0, %v1063_v2  ;;  %v601_v55 = vpack.c.bf16 %v600_v48, %v599_v46 }
  0xa5   : > { %v662_v42 = vpop.xlane.xlu1 %661  ;;  %v536_v56 = vpack.c.bf16 %v535_v51, %v534_v49 }
  0xa6   : > { %vm664_vm14 = vcmp.eq.f32.partialorder %v662_v42, %v521_v41 }
  0xa7   : > { %v659_v43 = vpop.xlane.xlu0 %658  ;;  %v666_v59 = vsel %vm664_vm14, 1.0, %v1063_v2 }
  0xa8   : > { %vm663_vm15 = vcmp.eq.f32.partialorder %v659_v43, %v521_v41 }
  0xa9   : > { %v728_v52 = vpop.xlane.xlu1 %727  ;;  %v665_v60 = vsel %vm663_vm15, 1.0, %v1063_v2 }
  0xaa   : > { %vm730_vm12 = vcmp.eq.f32.partialorder %v728_v52, %v521_v41  ;;  %v667_v62 = vpack.c.bf16 %v666_v59, %v665_v60 }
  0xab   : > { %v725_v53 = vpop.xlane.xlu0 %724  ;;  %v732_v57 = vsel %vm730_vm12, 1.0, %v1063_v2 }
  0xac   : > { %vm729_vm13 = vcmp.eq.f32.partialorder %v725_v53, %v521_v41 }
  0xad   : > { %v731_v58 = vsel %vm729_vm13, 1.0, %v1063_v2 }
  0xae   : > { %v733_v61 = vpack.c.bf16 %v732_v57, %v731_v58 }
  0xdd   : > { %v424_v44 = vpop.f32.mrf.mxu0 }
  0xdf   : > { %v967_v45 = vpop.f32.mrf.mxu0  ;;  %v508_v63 = vpop.f32.mrf.mxu1 }
  0xe0   : > { %v509_v5 = vadd.f32 %v923_v4, %v508_v63 }
  0xe1   : > { %v427_v47 = vpop.f32.mrf.mxu0  ;;  %v979_v0 = vpop.f32.mrf.mxu1 }
  0xe2   : > { %v431_v50 = vpack.c.bf16 %v427_v47, %v424_v44 }
  0xe3   : > { %v968_v54 = vpop.f32.mrf.mxu0  ;;  %v511_v1 = vpop.f32.mrf.mxu1 }
  0xe4   : > { %982 = vmatpush3.bf16.msra.mxu0 %v431_v50  ;;  %988 = vmatpush3.bf16.msra.mxu1 %v431_v50  ;;  %v512_v11 = vadd.f32 %v923_v4, %v511_v1 }
  0xe5   : > { %993 = vmatprep.subr.bf16.mxu0 %v1063_v2  ;;  %999 = vmatprep.subr.bf16.mxu1 %v1063_v2  ;;  %v980_v3 = vpop.f32.mrf.mxu1 }
  0xe7   : > { %984 = vmatmul.mubr.msk.bf16.vlgmr.msra.gmra.mxu0 %vm537_vm11, %v536_v56  ;;  %990 = vmatmul.mubr.msk.bf16.vlgmr.msra.gmra.mxu1 %vm537_vm11, %v601_v55 }
  0xe8   : > { %994 = vmatpush3.bf16.msra.mxu0 %v431_v50  ;;  %1000 = vmatpush3.bf16.msra.mxu1 %v431_v50 }
  0xe9   : > { %995 = vmatprep.mubr.msk.bf16.mxu0 %vm1064_vm0, %v1063_v2  ;;  %1001 = vmatprep.mubr.msk.bf16.mxu1 %vm1064_vm0, %v1063_v2 }
  0xef   : > { %996 = vmatmul.mubr.msk.bf16.vlgmr.msra.gmra.mxu0 %vm537_vm11, %v667_v62  ;;  %1002 = vmatmul.mubr.msk.bf16.vlgmr.msra.gmra.mxu1 %vm537_vm11, %v733_v61 }
 0x1a7   : > { %v575_v6 = vpop.f32.mrf.mxu0  ;;  %v639_v7 = vpop.f32.mrf.mxu1 }
 0x1a8   : > { %v576_v8 = vadd.f32 %v575_v6, %v509_v5  ;;  %v640_v9 = vadd.f32 %v639_v7, %v509_v5 }
 0x1a9   : > { %v985_v2 = vpop.f32.mrf.mxu0  ;;  %v991_v10 = vpop.f32.mrf.mxu1 }
 0x1aa   : > { %v584_v12 = vmul.f32 0.2, %v576_v8  ;;  %v648_v13 = vmul.f32 0.2, %v640_v9  ;;  %vm582_vm0 = vcmp.ge.f32.partialorder %v576_v8, 0.0  ;;  %vm646_vm1 = vcmp.ge.f32.partialorder %v640_v9, 0.0 }
 0x1ab   : > { %v578_v14 = vpop.f32.mrf.mxu0  ;;  %v642_v15 = vpop.f32.mrf.mxu1 }
 0x1ac   : > { %v579_v16 = vadd.f32 %v578_v14, %v512_v11  ;;  %v643_v17 = vadd.f32 %v642_v15, %v512_v11  ;;  %v586_v20 = vsel %vm582_vm0, %v576_v8, %v584_v12  ;;  %v650_v21 = vsel %vm646_vm1, %v640_v9, %v648_v13 }
 0x1ad   : > { %v986_v18 = vpop.f32.mrf.mxu0  ;;  %v992_v19 = vpop.f32.mrf.mxu1  ;;  %v652_v32 = vmax.f32 %v586_v20, %v650_v21 }
 0x1ae   : > { %v585_v22 = vmul.f32 0.2, %v579_v16  ;;  %vm583_vm2 = vcmp.ge.f32.partialorder %v579_v16, 0.0  ;;  %v649_v25 = vmul.f32 0.2, %v643_v17  ;;  %vm647_vm3 = vcmp.ge.f32.partialorder %v643_v17, 0.0 }
 0x1af   : > { %v705_v23 = vpop.f32.mrf.mxu0  ;;  %v771_v24 = vpop.f32.mrf.mxu1 }
 0x1b0   : > { %v706_v26 = vadd.f32 %v705_v23, %v509_v5  ;;  %v772_v27 = vadd.f32 %v771_v24, %v509_v5  ;;  %v587_v33 = vsel %vm583_vm2, %v579_v16, %v585_v22  ;;  %v651_v36 = vsel %vm647_vm3, %v643_v17, %v649_v25 }
 0x1b1   : > { %v997_v28 = vpop.f32.mrf.mxu0  ;;  %v1003_v29 = vpop.f32.mrf.mxu1  ;;  %v653_v46 = vmax.f32 %v587_v33, %v651_v36 }
 0x1b2   : > { %vm712_vm4 = vcmp.ge.f32.partialorder %v706_v26, 0.0  ;;  %v714_v30 = vmul.f32 0.2, %v706_v26  ;;  %v780_v31 = vmul.f32 0.2, %v772_v27  ;;  %vm778_vm6 = vcmp.ge.f32.partialorder %v772_v27, 0.0 }
 0x1b3   : > { %v708_v34 = vpop.f32.mrf.mxu0  ;;  %v774_v35 = vpop.f32.mrf.mxu1 }
 0x1b4   : > { %v716_v37 = vsel %vm712_vm4, %v706_v26, %v714_v30  ;;  %v709_v38 = vadd.f32 %v708_v34, %v512_v11  ;;  %v775_v39 = vadd.f32 %v774_v35, %v512_v11  ;;  %v782_v43 = vsel %vm778_vm6, %v772_v27, %v780_v31 }
 0x1b5   : > { %v718_v40 = vmax.f32 %v652_v32, %v716_v37  ;;  %v998_v41 = vpop.f32.mrf.mxu0  ;;  %v1004_v42 = vpop.f32.mrf.mxu1 }
 0x1b6   : > { %vm713_vm7 = vcmp.ge.f32.partialorder %v709_v38, 0.0  ;;  %v715_v44 = vmul.f32 0.2, %v709_v38  ;;  %v781_v45 = vmul.f32 0.2, %v775_v39  ;;  %vm779_vm8 = vcmp.ge.f32.partialorder %v775_v39, 0.0 }
 0x1b7   : > { %v784_v47 = vmax.f32 %v718_v40, %v782_v43 }
 0x1b8   : > { %v717_v48 = vsel %vm713_vm7, %v709_v38, %v715_v44  ;;  %v783_v50 = vsel %vm779_vm8, %v775_v39, %v781_v45 }
 0x1b9   : > { %786 = vst.msk [vmem:[%s345_s11] sm:$0xff] %vm386_vm5, %v784_v47  ;;  %v719_v49 = vmax.f32 %v653_v46, %v717_v48 }
 0x1bb   : > { %v785_v51 = vmax.f32 %v719_v49, %v783_v50 }
 0x1bd   : > { %787 = vst.msk [vmem:[%s345_s11 + $0x8] sm:$0xff] %vm386_vm5, %v785_v51 }
 0x1be PF: > { %s16_s23 = sadd.s32 1, %s1061_s23   ;;  %s1246_s21 = smov %s1057_s22 }
 0x1bf   : > { %p13_p5 = scmp.ge.s32.totalorder %s16_s23, 4   ;;  %s1247_s22 = smov %s1249_s24 }
 0x1c1   :  { %15 = sbr.rel (!%p13_p5) target bundleno = 2 (0x2), region = 80 }

// kernel: dgcnn_brute_forward.17
= control target key start
LH: loop header
LB: loop body
LE: loop exit
PB: predicated region body
PF: predicated region fallthrough
CT: control target
= control target key end

     0   :  { %s1100_s21 = smov 0   ;;  %s1102_s22 = smov 0   ;;  %s1237_s0 = inlined_call_operand.vmem [shape: f32[2,16,64], index: 0, kind: input, shape index: {}, may-alias: {0,1}]   ;;  %s1238_s1 = inlined_call_operand.vmem [shape: f32[2,16,64], index: 1, kind: input, shape index: {}, may-alias: {0,1}]   ;;  %s1239_s2 = inlined_call_operand.vmem [shape: s32[2,16,4], index: 2, kind: input, shape index: {}]   ;;  %s1240_s3 = inlined_call_operand.vmem [shape: bf16[64,128], index: 3, kind: input, shape index: {}]   ;;  %s1241_s4 = inlined_call_operand.vmem [shape: bf16[64,128], index: 4, kind: input, shape index: {}]   ;;  %s1242_s5 = inlined_call_operand.vmem [shape: f32[1,128], index: 5, kind: input, shape index: {}]   ;;  %s1243_s6 = inlined_call_operand.vmem [shape: f32[2,16,128], index: 6, kind: output, shape index: {}]  }
   0x1   :  { %s1104_s23 = smov 0  }
   0x2 LB: > { %s28_s24 = sadd.s32 1, %s1057_s22  ;;  %p909_p0 = scmp.ge.s32.totalorder %s1061_s23, 1  ;;  %s1061_s23 = sphi %s1104_s23, %s16_s23   ;;  %s1057_s22 = sphi %s1102_s22, %s1245_s22   ;;  %s1053_s21 = sphi %s1100_s21, %s1244_s21  }
   0x3   : > { %p30_p1 = scmp.ge.s32.totalorder %s28_s24, 2  ;;  %p260_p2 = scmp.lt.s32.totalorder %s1061_s23, 3 }
   0x5   : > { %s1247_s24 = smov (%p30_p1, %s28_s24), 0  ;;  %p261_p3 = pnand %p909_p0, %p260_p2 }
   0x6   : > { %p312_p4 = scmp.lt.s32.totalorder (!%p261_p3), %s1053_s21, 1 }
   0x7   : > { %264 = sbr.rel (%p261_p3) target bundleno = 446 (0x1be), region = 44 }
   0xc   : > { %v1031_v0 = vld [vmem:[%s1240_s3 + $0x18] sm:$0xff]   ;;  %v519_v1 = vlaneseq  ;;  %v1063_v2 = vmov 0.0   ;;  %v1032_v3 = vld [vmem:[%s1240_s3 + $0x10] sm:$0xff]   ;;  %vm1064_vm0 = vmmov 0   ;;  %s1249_s21 = smov (!%p312_p4, %s1053_s21), 1  ;;  %v1033_v6 = vld [vmem:[%s1240_s3 + $0x8] sm:$0xff]  }
   0xd   : > { %957 = vmatprep.subr.bf16.mxu0 %v1063_v2  ;;  %969 = vmatprep.subr.bf16.mxu1 %v1063_v2  ;;  %v1035_v5 = vld [vmem:[%s1241_s4 + $0x18] sm:$0xff]   ;;  %s1139_s9 = sshll.u32 %s1249_s21, 4  ;;  %v1036_v7 = vld [vmem:[%s1241_s4 + $0x10] sm:$0xff]   ;;  %v1034_v8 = vld [vmem:[%s1240_s3] sm:$0xff]   ;;  %vm525_vm3 = vcmask 31744   ;;  %vm386_vm5 = vcmask 523264  }
   0xe   : > { %958 = vmatpush3.bf16.msra.mxu0 %v1031_v0  ;;  %965 = vmatprep.mubr.msk.bf16.mxu0 %vm1064_vm0, %v1063_v2  ;;  %v1131_v4 = vand.u32 127, %v519_v1  ;;  %s316_s14 = scalar_lea.vmem %s1237_s0, %s1139_s9  ;;  %s335_s17 = scalar_lea.vmem %s1239_s2, %s1139_s9  ;;  %v1037_v15 = vld [vmem:[%s1241_s4 + $0x8] sm:$0xff]   ;;  %v1038_v24 = vld [vmem:[%s1241_s4] sm:$0xff]   ;;  %vm537_vm11 = vcmask 130048  }
   0xf   : > { %959 = vmatprep.subr.bf16.mxu0 %v1063_v2  ;;  %977 = vmatprep.mubr.msk.bf16.mxu1 %vm1064_vm0, %v1063_v2  ;;  %v515_v9 = vld [vmem:[%s335_s17] sm:$0xff]  ;;  %v516_v11 = vld [vmem:[%s335_s17 + $0x8] sm:$0xff]  ;;  %s325_s29 = scalar_lea.vmem %s1238_s1, %s1139_s9  ;;  %s345_s11 = scalar_lea.vmem %s1243_s6, %s1139_s9 }
  0x10   : > { %970 = vmatpush3.bf16.msra.mxu1 %v1035_v5  ;;  %vm588_vm1 = vcmp.eq.s32.totalorder %v1131_v4, 1  ;;  %vm522_vm2 = vcmp.eq.s32.totalorder %v1131_v4, 0  ;;  %v517_v10 = vcvt.s32.f32 %v515_v9  ;;  %v348_v12 = vld [vmem:[%s316_s14] sm:$0xff]  ;;  %v349_v13 = vld [vmem:[%s316_s14 + $0x8] sm:$0xff]  ;;  %v518_v14 = vcvt.s32.f32 %v516_v11 }
  0x11   : > { %971 = vmatprep.subr.bf16.mxu1 %v1063_v2  ;;  %vm654_vm4 = vcmp.eq.s32.totalorder %v1131_v4, 2  ;;  %v350_v22 = vpack.c.bf16 %v349_v13, %v348_v12  ;;  %vm720_vm6 = vcmp.eq.s32.totalorder %v1131_v4, 3  ;;  %v351_v34 = vld [vmem:[%s325_s29] sm:$0xff]  ;;  %v352_v35 = vld [vmem:[%s325_s29 + $0x8] sm:$0xff]  ;;  %v521_v41 = vcvt.s32.f32 %v1131_v4 }
  0x12   : > { %960 = vmatpush3.bf16.msra.mxu0 %v1032_v3  ;;  %v589_v16 = vsel %vm588_vm1, %v517_v10, 0.0  ;;  %v523_v17 = vsel %vm522_vm2, %v517_v10, 0.0  ;;  %v590_v20 = vsel %vm588_vm1, %v518_v14, 0.0  ;;  %v524_v21 = vsel %vm522_vm2, %v518_v14, 0.0  ;;  %v923_v4 = vld [vmem:[%s1242_s5] ss:$0 sm:$0xff] }
  0x13   : > { %961 = vmatprep.subr.bf16.mxu0 %v1063_v2  ;;  %v591_v18 = vsel %vm525_vm3, %v589_v16, 0.0  ;;  %v526_v19 = vsel %vm525_vm3, %v523_v17, 0.0  ;;  %v594_v23 = vsel %vm525_vm3, %v590_v20, 0.0  ;;  %v529_v25 = vsel %vm525_vm3, %v524_v21, 0.0 }
  0x14   : > { %972 = vmatpush3.bf16.msra.mxu1 %v1036_v7  ;;  %592 = vadd.xlane.f32.xlu1 %v591_v18  ;;  %v656_v26 = vsel %vm654_vm4, %v518_v14, 0.0  ;;  %v655_v27 = vsel %vm654_vm4, %v517_v10, 0.0  ;;  %v722_v30 = vsel %vm720_vm6, %v518_v14, 0.0  ;;  %v721_v31 = vsel %vm720_vm6, %v517_v10, 0.0 }
  0x15   : > { %973 = vmatprep.subr.bf16.mxu1 %v1063_v2  ;;  %527 = vadd.xlane.f32.xlu0 %v526_v19  ;;  %v660_v28 = vsel %vm525_vm3, %v656_v26, 0.0  ;;  %v657_v29 = vsel %vm525_vm3, %v655_v27, 0.0  ;;  %v726_v32 = vsel %vm525_vm3, %v722_v30, 0.0  ;;  %v723_v33 = vsel %vm525_vm3, %v721_v31, 0.0 }
  0x16   : > { %962 = vmatpush3.bf16.msra.mxu0 %v1033_v6  ;;  %v353_v36 = vpack.c.bf16 %v352_v35, %v351_v34 }
  0x17   : > { %963 = vmatprep.subr.bf16.mxu0 %v1063_v2 }
  0x18   : > { %974 = vmatpush3.bf16.msra.mxu1 %v1037_v15  ;;  %595 = vadd.xlane.f32.xlu1 %v594_v23 }
  0x19   : > { %975 = vmatprep.subr.bf16.mxu1 %v1063_v2  ;;  %530 = vadd.xlane.f32.xlu0 %v529_v25 }
  0x1a   : > { %964 = vmatpush3.bf16.msra.mxu0 %v1034_v8 }
  0x1b   : > { %981 = vmatprep.subr.bf16.mxu0 %v1063_v2 }
  0x1c   : > { %976 = vmatpush3.bf16.msra.mxu1 %v1038_v24  ;;  %661 = vadd.xlane.f32.xlu1 %v660_v28 }
  0x1d   : > { %966 = vmatmul.mubr.msk.bf16.vlgmr.msra.gmra.mxu0 %vm386_vm5, %v350_v22  ;;  %987 = vmatprep.subr.bf16.mxu1 %v1063_v2 }
  0x1e   : > { %983 = vmatprep.mubr.msk.bf16.mxu0 %vm1064_vm0, %v1063_v2  ;;  %658 = vadd.xlane.f32.xlu0 %v657_v29 }
  0x1f   : > { %978 = vmatmul.mubr.msk.bf16.vlgmr.msra.gmra.mxu1 %vm386_vm5, %v353_v36 }
  0x20   : > { %727 = vadd.xlane.f32.xlu1 %v726_v32  ;;  %989 = vmatprep.mubr.msk.bf16.mxu1 %vm1064_vm0, %v1063_v2 }
  0x22   : > { %724 = vadd.xlane.f32.xlu0 %v723_v33 }
  0x9d   : > { %v593_v37 = vpop.xlane.xlu1 %592 }
  0x9e   : > { %v528_v38 = vpop.xlane.xlu0 %527  ;;  %vm597_vm7 = vcmp.eq.f32.partialorder %v593_v37, %v521_v41 }
  0x9f   : > { %vm532_vm9 = vcmp.eq.f32.partialorder %v528_v38, %v521_v41  ;;  %v599_v46 = vsel %vm597_vm7, 1.0, %v1063_v2 }
  0xa0   : > { %v534_v49 = vsel %vm532_vm9, 1.0, %v1063_v2 }
  0xa1   : > { %v596_v39 = vpop.xlane.xlu1 %595 }
  0xa2   : > { %v531_v40 = vpop.xlane.xlu0 %530  ;;  %vm598_vm8 = vcmp.eq.f32.partialorder %v596_v39, %v521_v41 }
  0xa3   : > { %vm533_vm10 = vcmp.eq.f32.partialorder %v531_v40, %v521_v41  ;;  %v600_v48 = vsel %vm598_vm8, 1.0, %v1063_v2 }
  0xa4   : > { %v535_v51 = vsel %vm533_vm10, 1.0, %v1063_v2  ;;  %v601_v55 = vpack.c.bf16 %v600_v48, %v599_v46 }
  0xa5   : > { %v662_v42 = vpop.xlane.xlu1 %661  ;;  %v536_v56 = vpack.c.bf16 %v535_v51, %v534_v49 }
  0xa6   : > { %vm664_vm14 = vcmp.eq.f32.partialorder %v662_v42, %v521_v41 }
  0xa7   : > { %v659_v43 = vpop.xlane.xlu0 %658  ;;  %v666_v59 = vsel %vm664_vm14, 1.0, %v1063_v2 }
  0xa8   : > { %vm663_vm15 = vcmp.eq.f32.partialorder %v659_v43, %v521_v41 }
  0xa9   : > { %v728_v52 = vpop.xlane.xlu1 %727  ;;  %v665_v60 = vsel %vm663_vm15, 1.0, %v1063_v2 }
  0xaa   : > { %vm730_vm12 = vcmp.eq.f32.partialorder %v728_v52, %v521_v41  ;;  %v667_v62 = vpack.c.bf16 %v666_v59, %v665_v60 }
  0xab   : > { %v725_v53 = vpop.xlane.xlu0 %724  ;;  %v732_v57 = vsel %vm730_vm12, 1.0, %v1063_v2 }
  0xac   : > { %vm729_vm13 = vcmp.eq.f32.partialorder %v725_v53, %v521_v41 }
  0xad   : > { %v731_v58 = vsel %vm729_vm13, 1.0, %v1063_v2 }
  0xae   : > { %v733_v61 = vpack.c.bf16 %v732_v57, %v731_v58 }
  0xdd   : > { %v424_v44 = vpop.f32.mrf.mxu0 }
  0xdf   : > { %v967_v45 = vpop.f32.mrf.mxu0  ;;  %v508_v63 = vpop.f32.mrf.mxu1 }
  0xe0   : > { %v509_v5 = vadd.f32 %v923_v4, %v508_v63 }
  0xe1   : > { %v427_v47 = vpop.f32.mrf.mxu0  ;;  %v979_v0 = vpop.f32.mrf.mxu1 }
  0xe2   : > { %v431_v50 = vpack.c.bf16 %v427_v47, %v424_v44 }
  0xe3   : > { %v968_v54 = vpop.f32.mrf.mxu0  ;;  %v511_v1 = vpop.f32.mrf.mxu1 }
  0xe4   : > { %982 = vmatpush3.bf16.msra.mxu0 %v431_v50  ;;  %988 = vmatpush3.bf16.msra.mxu1 %v431_v50  ;;  %v512_v11 = vadd.f32 %v923_v4, %v511_v1 }
  0xe5   : > { %993 = vmatprep.subr.bf16.mxu0 %v1063_v2  ;;  %999 = vmatprep.subr.bf16.mxu1 %v1063_v2  ;;  %v980_v3 = vpop.f32.mrf.mxu1 }
  0xe7   : > { %984 = vmatmul.mubr.msk.bf16.vlgmr.msra.gmra.mxu0 %vm537_vm11, %v536_v56  ;;  %990 = vmatmul.mubr.msk.bf16.vlgmr.msra.gmra.mxu1 %vm537_vm11, %v601_v55 }
  0xe8   : > { %994 = vmatpush3.bf16.msra.mxu0 %v431_v50  ;;  %1000 = vmatpush3.bf16.msra.mxu1 %v431_v50 }
  0xe9   : > { %995 = vmatprep.mubr.msk.bf16.mxu0 %vm1064_vm0, %v1063_v2  ;;  %1001 = vmatprep.mubr.msk.bf16.mxu1 %vm1064_vm0, %v1063_v2 }
  0xef   : > { %996 = vmatmul.mubr.msk.bf16.vlgmr.msra.gmra.mxu0 %vm537_vm11, %v667_v62  ;;  %1002 = vmatmul.mubr.msk.bf16.vlgmr.msra.gmra.mxu1 %vm537_vm11, %v733_v61 }
 0x1a7   : > { %v575_v6 = vpop.f32.mrf.mxu0  ;;  %v639_v7 = vpop.f32.mrf.mxu1 }
 0x1a8   : > { %v576_v8 = vadd.f32 %v575_v6, %v509_v5  ;;  %v640_v9 = vadd.f32 %v639_v7, %v509_v5 }
 0x1a9   : > { %v985_v2 = vpop.f32.mrf.mxu0  ;;  %v991_v10 = vpop.f32.mrf.mxu1 }
 0x1aa   : > { %v584_v12 = vmul.f32 0.2, %v576_v8  ;;  %v648_v13 = vmul.f32 0.2, %v640_v9  ;;  %vm582_vm0 = vcmp.ge.f32.partialorder %v576_v8, 0.0  ;;  %vm646_vm1 = vcmp.ge.f32.partialorder %v640_v9, 0.0 }
 0x1ab   : > { %v578_v14 = vpop.f32.mrf.mxu0  ;;  %v642_v15 = vpop.f32.mrf.mxu1 }
 0x1ac   : > { %v579_v16 = vadd.f32 %v578_v14, %v512_v11  ;;  %v643_v17 = vadd.f32 %v642_v15, %v512_v11  ;;  %v586_v20 = vsel %vm582_vm0, %v576_v8, %v584_v12  ;;  %v650_v21 = vsel %vm646_vm1, %v640_v9, %v648_v13 }
 0x1ad   : > { %v986_v18 = vpop.f32.mrf.mxu0  ;;  %v992_v19 = vpop.f32.mrf.mxu1  ;;  %v652_v32 = vmax.f32 %v586_v20, %v650_v21 }
 0x1ae   : > { %v585_v22 = vmul.f32 0.2, %v579_v16  ;;  %vm583_vm2 = vcmp.ge.f32.partialorder %v579_v16, 0.0  ;;  %v649_v25 = vmul.f32 0.2, %v643_v17  ;;  %vm647_vm3 = vcmp.ge.f32.partialorder %v643_v17, 0.0 }
 0x1af   : > { %v705_v23 = vpop.f32.mrf.mxu0  ;;  %v771_v24 = vpop.f32.mrf.mxu1 }
 0x1b0   : > { %v706_v26 = vadd.f32 %v705_v23, %v509_v5  ;;  %v772_v27 = vadd.f32 %v771_v24, %v509_v5  ;;  %v587_v33 = vsel %vm583_vm2, %v579_v16, %v585_v22  ;;  %v651_v36 = vsel %vm647_vm3, %v643_v17, %v649_v25 }
 0x1b1   : > { %v997_v28 = vpop.f32.mrf.mxu0  ;;  %v1003_v29 = vpop.f32.mrf.mxu1  ;;  %v653_v46 = vmax.f32 %v587_v33, %v651_v36 }
 0x1b2   : > { %vm712_vm4 = vcmp.ge.f32.partialorder %v706_v26, 0.0  ;;  %v714_v30 = vmul.f32 0.2, %v706_v26  ;;  %v780_v31 = vmul.f32 0.2, %v772_v27  ;;  %vm778_vm5 = vcmp.ge.f32.partialorder %v772_v27, 0.0 }
 0x1b3   : > { %v708_v34 = vpop.f32.mrf.mxu0  ;;  %v774_v35 = vpop.f32.mrf.mxu1 }
 0x1b4   : > { %v716_v37 = vsel %vm712_vm4, %v706_v26, %v714_v30  ;;  %v709_v38 = vadd.f32 %v708_v34, %v512_v11  ;;  %v775_v39 = vadd.f32 %v774_v35, %v512_v11  ;;  %v782_v43 = vsel %vm778_vm5, %v772_v27, %v780_v31 }
 0x1b5   : > { %v718_v40 = vmax.f32 %v652_v32, %v716_v37  ;;  %v998_v41 = vpop.f32.mrf.mxu0  ;;  %v1004_v42 = vpop.f32.mrf.mxu1 }
 0x1b6   : > { %vm713_vm6 = vcmp.ge.f32.partialorder %v709_v38, 0.0  ;;  %v715_v44 = vmul.f32 0.2, %v709_v38  ;;  %v781_v45 = vmul.f32 0.2, %v775_v39  ;;  %vm779_vm7 = vcmp.ge.f32.partialorder %v775_v39, 0.0 }
 0x1b7   : > { %v784_v47 = vmax.f32 %v718_v40, %v782_v43 }
 0x1b8   : > { %v717_v48 = vsel %vm713_vm6, %v709_v38, %v715_v44  ;;  %v783_v50 = vsel %vm779_vm7, %v775_v39, %v781_v45 }
 0x1b9   : > { %786 = vst [vmem:[%s345_s11] sm:$0xff] %v784_v47  ;;  %v719_v49 = vmax.f32 %v653_v46, %v717_v48 }
 0x1bb   : > { %v785_v51 = vmax.f32 %v719_v49, %v783_v50 }
 0x1bd   : > { %787 = vst [vmem:[%s345_s11 + $0x8] sm:$0xff] %v785_v51 }
 0x1be PF: > { %s16_s23 = sadd.s32 1, %s1061_s23   ;;  %s1244_s21 = smov %s1057_s22 }
 0x1bf   : > { %p13_p5 = scmp.ge.s32.totalorder %s16_s23, 4   ;;  %s1245_s22 = smov %s1247_s24 }
 0x1c1   :  { %15 = sbr.rel (!%p13_p5) target bundleno = 2 (0x2), region = 80 }

// kernel: dgcnn_brute_forward.20
= control target key start
LH: loop header
LB: loop body
LE: loop exit
PB: predicated region body
PF: predicated region fallthrough
CT: control target
= control target key end

     0   :  { %s1203_s30 = smov 0   ;;  %s1366_s0 = inlined_call_operand.vmem [shape: f32[2,16,64], index: 0, kind: input, shape index: {}]   ;;  %s1367_s1 = inlined_call_operand.vmem [shape: f32[2,16,64], index: 1, kind: input, shape index: {}]   ;;  %s1368_s2 = inlined_call_operand.vmem [shape: f32[2,16,128], index: 2, kind: input, shape index: {}]   ;;  %s1369_s3 = inlined_call_operand.vmem [shape: f32[2,16,256], index: 3, kind: input, shape index: {}]   ;;  %s1370_s4 = inlined_call_operand.vmem [shape: bf16[64,128], index: 4, kind: input, shape index: {}]   ;;  %s1371_s5 = inlined_call_operand.vmem [shape: bf16[64,128], index: 5, kind: input, shape index: {}]   ;;  %s1372_s6 = inlined_call_operand.vmem [shape: bf16[128,128], index: 6, kind: input, shape index: {}]   ;;  %s1373_s7 = inlined_call_operand.vmem [shape: bf16[256,128], index: 7, kind: input, shape index: {}]   ;;  %s1374_s8 = inlined_call_operand.vmem [shape: f32[1,128], index: 8, kind: input, shape index: {}]   ;;  %s1375_s9 = inlined_call_operand.vmem [shape: f32[2,2,128], index: 9, kind: output, shape index: {}]  }
   0x1 LB: > { %s961_s10 = sadd.s32 4294967295, %s1149_s30   ;;  %p965_p0 = scmp.ge.s32.totalorder %s1149_s30, 1  ;;  %s1149_s30 = sphi %s1203_s30, %s19_s30  }
   0x2   : > { %p317_p1 = scmp.lt.s32.totalorder %s1149_s30, 3 }
   0x4   : > { %p318_p2 = pnand %p965_p0, %p317_p1 }
   0x5   : > { %p367_p3 = scmp.lt.s32.totalorder (!%p318_p2), %s961_s10, 1 }
   0x6   : > { %321 = sbr.rel (%p318_p2) target bundleno = 287 (0x11f), region = 56 }
   0xb   : > { %v1111_v0 = vld [vmem:[%s1371_s5 + $0x18] sm:$0xff]   ;;  %v1151_v1 = vmov 0.0   ;;  %v1113_v3 = vld [vmem:[%s1371_s5 + $0x10] sm:$0xff]   ;;  %vm1152_vm0 = vmmov 0   ;;  %s1377_s10 = smov (!%p367_p3, %s961_s10), 1  ;;  %v1115_v5 = vld [vmem:[%s1371_s5 + $0x8] sm:$0xff]  }
   0xc   : > { %1057 = vmatprep.subr.bf16.mxu0 %v1151_v1  ;;  %1069 = vmatprep.subr.bf16.mxu1 %v1151_v1  ;;  %v1112_v2 = vld [vmem:[%s1370_s4 + $0x18] sm:$0xff]   ;;  %v1114_v4 = vld [vmem:[%s1370_s4 + $0x10] sm:$0xff]   ;;  %s1237_s21 = sshll.u32 %s1377_s10, 4  ;;  %v1116_v6 = vld [vmem:[%s1370_s4 + $0x8] sm:$0xff]   ;;  %vm438_vm1 = vcmask 523264   ;;  %s1015_s22 = sshll.u32 %s1377_s10, 5 }
   0xd   : > { %1058 = vmatpush3.bf16.msra.mxu0 %v1111_v0  ;;  %1065 = vmatprep.mubr.msk.bf16.mxu0 %vm1152_vm0, %v1151_v1  ;;  %s376_s26 = scalar_lea.vmem %s1367_s1, %s1237_s21  ;;  %v1117_v7 = vld [vmem:[%s1371_s5] sm:$0xff]   ;;  %s371_s12 = scalar_lea.vmem %s1366_s0, %s1237_s21  ;;  %v1119_v13 = vld [vmem:[%s1373_s7 + $0x78] sm:$0xff]   ;;  %v1122_v18 = vld [vmem:[%s1373_s7 + $0x70] sm:$0xff]   ;;  %vm869_vm4 = vcmask 1040384  }
   0xe   : > { %1070 = vmatpush3.bf16.msra.mxu1 %v1112_v2  ;;  %1059 = vmatprep.subr.bf16.mxu0 %v1151_v1  ;;  %v1118_v8 = vld [vmem:[%s1370_s4] sm:$0xff]   ;;  %v404_v10 = vld [vmem:[%s376_s26 + $0x8] sm:$0xff]  ;;  %v1120_v16 = vld [vmem:[%s1372_s6 + $0x38] sm:$0xff]   ;;  %s1312_s29 = scalar_lea.vmem %s1369_s3, %s1015_s22  ;;  %s381_s28 = scalar_lea.vmem %s1368_s2, %s1237_s21 }
   0xf   : > { %1071 = vmatprep.subr.bf16.mxu1 %v1151_v1  ;;  %1077 = vmatprep.mubr.msk.bf16.mxu1 %vm1152_vm0, %v1151_v1  ;;  %v403_v9 = vld [vmem:[%s376_s26] sm:$0xff]  ;;  %v393_v12 = vld [vmem:[%s371_s12 + $0x8] sm:$0xff]  ;;  %v1121_v17 = vld [vmem:[%s1373_s7 + $0x38] sm:$0xff]   ;;  %s974_s17 = sshll.u32 %s1377_s10, 1 }
  0x10   : > { %v392_v11 = vld [vmem:[%s371_s12] sm:$0xff]  ;;  %v405_v14 = vpack.c.bf16 %v404_v10, %v403_v9  ;;  %v1123_v19 = vld [vmem:[%s1372_s6 + $0x30] sm:$0xff]   ;;  %v1125_v21 = vld [vmem:[%s1373_s7 + $0x68] sm:$0xff]   ;;  %s390_s20 = scalar_lea.vmem %s1375_s9, %s974_s17 }
  0x11   : > { %1060 = vmatpush3.bf16.msra.mxu0 %v1113_v3  ;;  %v394_v15 = vpack.c.bf16 %v393_v12, %v392_v11  ;;  %v1124_v20 = vld [vmem:[%s1373_s7 + $0x30] sm:$0xff]   ;;  %v1126_v22 = vld [vmem:[%s1372_s6 + $0x28] sm:$0xff]   ;;  %v1128_v24 = vld [vmem:[%s1373_s7 + $0x60] sm:$0xff]  }
  0x12   : > { %1072 = vmatpush3.bf16.msra.mxu1 %v1114_v4  ;;  %1061 = vmatprep.subr.bf16.mxu0 %v1151_v1  ;;  %v1127_v23 = vld [vmem:[%s1373_s7 + $0x28] sm:$0xff]   ;;  %v1129_v25 = vld [vmem:[%s1372_s6 + $0x20] sm:$0xff]   ;;  %v1131_v27 = vld [vmem:[%s1373_s7 + $0x58] sm:$0xff]  }
  0x13   : > { %1073 = vmatprep.subr.bf16.mxu1 %v1151_v1  ;;  %v1130_v26 = vld [vmem:[%s1373_s7 + $0x20] sm:$0xff]   ;;  %v1132_v28 = vld [vmem:[%s1372_s6 + $0x18] sm:$0xff]   ;;  %v1134_v30 = vld [vmem:[%s1373_s7 + $0x50] sm:$0xff]  }
  0x14   : > { %v1133_v29 = vld [vmem:[%s1373_s7 + $0x18] sm:$0xff]   ;;  %v662_v31 = vld [vmem:[%s1312_s29 + $0x8] sm:$0xff]  ;;  %v1135_v33 = vld [vmem:[%s1372_s6 + $0x10] sm:$0xff]  }
  0x15   : > { %1062 = vmatpush3.bf16.msra.mxu0 %v1115_v5  ;;  %v664_v32 = vld [vmem:[%s1312_s29 + $0x18] sm:$0xff]  ;;  %v1136_v35 = vld [vmem:[%s1373_s7 + $0x10] sm:$0xff]   ;;  %v1137_v36 = vld [vmem:[%s1373_s7 + $0x48] sm:$0xff]  }
  0x16   : > { %1074 = vmatpush3.bf16.msra.mxu1 %v1116_v6  ;;  %1063 = vmatprep.subr.bf16.mxu0 %v1151_v1  ;;  %v666_v34 = vpack.c.bf16 %v664_v32, %v662_v31  ;;  %v1138_v37 = vld [vmem:[%s1372_s6 + $0x8] sm:$0xff]   ;;  %v1140_v39 = vld [vmem:[%s1373_s7 + $0x40] sm:$0xff]   ;;  %v663_v45 = vld [vmem:[%s1312_s29 + $0x10] sm:$0xff] }
  0x17   : > { %1075 = vmatprep.subr.bf16.mxu1 %v1151_v1  ;;  %v1139_v38 = vld [vmem:[%s1373_s7 + $0x8] sm:$0xff]   ;;  %v1141_v40 = vld [vmem:[%s1372_s6] sm:$0xff]  }
  0x18   : > { %v551_v41 = vld [vmem:[%s381_s28] sm:$0xff]  ;;  %v552_v42 = vld [vmem:[%s381_s28 + $0x8] sm:$0xff] }
  0x19   : > { %1064 = vmatpush3.bf16.msra.mxu0 %v1117_v7  ;;  %v1142_v43 = vld [vmem:[%s1373_s7] sm:$0xff]   ;;  %v553_v46 = vpack.c.bf16 %v552_v42, %v551_v41 }
  0x1a   : > { %1076 = vmatpush3.bf16.msra.mxu1 %v1118_v8  ;;  %1081 = vmatprep.subr.bf16.mxu0 %v1151_v1  ;;  %v661_v44 = vld [vmem:[%s1312_s29] sm:$0xff] }
  0x1b   : > { %1035 = vmatprep.subr.bf16.mxu1 %v1119_v13  ;;  %v665_v47 = vpack.c.bf16 %v663_v45, %v661_v44  ;;  %v1009_v0 = vld [vmem:[%s1374_s8] ss:$0 sm:$0xff] }
  0x1c   : > { %1066 = vmatmul.mubr.msk.bf16.vlgmr.msra.gmra.mxu0 %vm438_vm1, %v405_v14 }
  0x1d   : > { %1078 = vmatmul.mubr.msk.bf16.vlgmr.msra.gmra.mxu1 %vm438_vm1, %v394_v15  ;;  %1082 = vmatpush3.bf16.msra.mxu0 %v1120_v16 }
  0x1e   : > { %1036 = vmatpush3.bf16.msra.mxu1 %v1121_v17  ;;  %1083 = vmatprep.subr.bf16.mxu0 %v1151_v1 }
  0x1f   : > { %1037 = vmatprep.subr.bf16.mxu1 %v1122_v18  ;;  %1097 = vmatprep.mubr.msk.bf16.mxu0 %vm1152_vm0, %v1151_v1 }
  0x20   : > { %827 = vmatprep.mubr.bf16.mxu1 %v666_v34 }
  0x21   : > { %1084 = vmatpush3.bf16.msra.mxu0 %v1123_v19 }
  0x22   : > { %1038 = vmatpush3.bf16.msra.mxu1 %v1124_v20  ;;  %1085 = vmatprep.subr.bf16.mxu0 %v1151_v1 }
  0x23   : > { %1039 = vmatprep.subr.bf16.mxu1 %v1125_v21 }
  0x25   : > { %1086 = vmatpush3.bf16.msra.mxu0 %v1126_v22 }
  0x26   : > { %1040 = vmatpush3.bf16.msra.mxu1 %v1127_v23  ;;  %1087 = vmatprep.subr.bf16.mxu0 %v1151_v1 }
  0x27   : > { %1041 = vmatprep.subr.bf16.mxu1 %v1128_v24 }
  0x29   : > { %1088 = vmatpush3.bf16.msra.mxu0 %v1129_v25 }
  0x2a   : > { %1042 = vmatpush3.bf16.msra.mxu1 %v1130_v26  ;;  %1089 = vmatprep.subr.bf16.mxu0 %v1151_v1 }
  0x2b   : > { %1043 = vmatprep.subr.bf16.mxu1 %v1131_v27 }
  0x2d   : > { %1090 = vmatpush3.bf16.msra.mxu0 %v1132_v28 }
  0x2e   : > { %1044 = vmatpush3.bf16.msra.mxu1 %v1133_v29  ;;  %1091 = vmatprep.subr.bf16.mxu0 %v1151_v1 }
  0x2f   : > { %1045 = vmatprep.subr.bf16.mxu1 %v1134_v30 }
  0x31   : > { %1092 = vmatpush3.bf16.msra.mxu0 %v1135_v33 }
  0x32   : > { %1046 = vmatpush3.bf16.msra.mxu1 %v1136_v35  ;;  %1093 = vmatprep.subr.bf16.mxu0 %v1151_v1 }
  0x33   : > { %1047 = vmatprep.subr.bf16.mxu1 %v1137_v36 }
  0x35   : > { %1094 = vmatpush3.bf16.msra.mxu0 %v1138_v37 }
  0x36   : > { %1048 = vmatpush3.bf16.msra.mxu1 %v1139_v38  ;;  %1095 = vmatprep.subr.bf16.mxu0 %v1151_v1 }
  0x37   : > { %1049 = vmatprep.subr.bf16.mxu1 %v1140_v39 }
  0x39   : > { %1096 = vmatpush3.bf16.msra.mxu0 %v1141_v40 }
  0x3a   : > { %1050 = vmatpush3.bf16.msra.mxu1 %v1142_v43 }
  0x3c   : > { %1098 = vmatmul.mubr.bf16.vlgmr.msra.gmra.mxu0 %v553_v46 }
  0x3d   : > { %828 = vmatmul.mubr.bf16.vlgmr.msra.gmra.mxu1 %v665_v47 }
  0xdc   : > { %v476_v48 = vpop.f32.mrf.mxu0 }
  0xdd   : > { %v544_v49 = vpop.f32.mrf.mxu1 }
  0xde   : > { %v1067_v50 = vpop.f32.mrf.mxu0  ;;  %v545_v58 = vadd.f32 %v544_v49, %v476_v48 }
  0xdf   : > { %v1079_v51 = vpop.f32.mrf.mxu1 }
  0xe0   : > { %v479_v52 = vpop.f32.mrf.mxu0 }
  0xe1   : > { %v547_v53 = vpop.f32.mrf.mxu1 }
  0xe2   : > { %v1068_v54 = vpop.f32.mrf.mxu0  ;;  %v548_v2 = vadd.f32 %v547_v53, %v479_v52 }
  0xe3   : > { %v1080_v55 = vpop.f32.mrf.mxu1 }
  0xfc   : > { %v652_v56 = vpop.f32.mrf.mxu0 }
  0xfd   : > { %v1051_v57 = vpop.f32.mrf.mxu1  ;;  %v659_v61 = vadd.f32 %v652_v56, %v545_v58 }
  0xfe   : > { %v1099_v59 = vpop.f32.mrf.mxu0 }
  0xff   : > { %v1052_v60 = vpop.f32.mrf.mxu1 }
 0x100   : > { %v1053_v62 = vadd.f32 %v1052_v60, %v1051_v57  ;;  %v655_v63 = vpop.f32.mrf.mxu0 }
 0x101   : > { %v1054_v1 = vpop.f32.mrf.mxu1  ;;  %v660_v7 = vadd.f32 %v655_v63, %v548_v2 }
 0x102   : > { %v836_v3 = vadd.f32 %v1053_v62, %v659_v61  ;;  %v1100_v4 = vpop.f32.mrf.mxu0 }
 0x103   : > { %v1055_v5 = vpop.f32.mrf.mxu1 }
 0x104   : > { %v845_v6 = vadd.f32 %v1009_v0, %v836_v3  ;;  %v1056_v8 = vadd.f32 %v1055_v5, %v1054_v1 }
 0x106   : > { %v837_v9 = vadd.f32 %v1056_v8, %v660_v7  ;;  %v849_v10 = vmul.f32 0.2, %v845_v6  ;;  %vm847_vm2 = vcmp.ge.f32.partialorder %v845_v6, 0.0 }
 0x108   : > { %v846_v11 = vadd.f32 %v1009_v0, %v837_v9  ;;  %v851_v13 = vsel %vm847_vm2, %v845_v6, %v849_v10 }
 0x10a   : > { %vm848_vm3 = vcmp.ge.f32.partialorder %v846_v11, 0.0  ;;  %v850_v12 = vmul.f32 0.2, %v846_v11 }
 0x10c   : > { %v852_v14 = vsel %vm848_vm3, %v846_v11, %v850_v12 }
 0x10d   : > { %v853_v15 = vmax.f32 %v851_v13, %v852_v14  ;;  %v860_v16 = vadd.f32 %v852_v14, %v851_v13 }
 0x10f   : > { %v854_v17 = vrot.slane %v853_v15, 4  ;;  %v861_v18 = vrot.slane %v860_v16, 4 }
 0x111   : > { %v855_v19 = vmax.f32 %v853_v15, %v854_v17  ;;  %v862_v20 = vadd.f32 %v861_v18, %v860_v16 }
 0x113   : > { %v856_v21 = vrot.slane %v855_v19, 2  ;;  %v863_v22 = vrot.slane %v862_v20, 2 }
 0x115   : > { %v857_v23 = vmax.f32 %v855_v19, %v856_v21  ;;  %v864_v24 = vadd.f32 %v863_v22, %v862_v20 }
 0x117   : > { %v858_v25 = vrot.slane %v857_v23, 1  ;;  %v865_v26 = vrot.slane %v864_v24, 1 }
 0x119   : > { %v866_v27 = vadd.f32 %v865_v26, %v864_v24  ;;  %v859_v28 = vmax.f32 %v857_v23, %v858_v25 }
 0x11b   : > { %v868_v29 = vmul.f32 0.0625, %v866_v27 }
 0x11d   : > { %v870_v30 = vsel %vm869_vm4, %v859_v28, %v868_v29 }
 0x11e   : > { %871 = vst [vmem:[%s390_s20] sm:$0x3] %v870_v30 }
 0x11f PF: > { %s19_s30 = sadd.s32 1, %s1149_s30  }
 0x120   : > { %p16_p4 = scmp.ge.s32.totalorder %s19_s30, 4  }
 0x122   :  { %18 = sbr.rel (!%p16_p4) target bundleno = 1 (0x1), region = 95 }

// kernel: dgcnn_brute_forward.19
= control target key start
LH: loop header
LB: loop body
LE: loop exit
PB: predicated region body
PF: predicated region fallthrough
CT: control target
= control target key end

     0   :  { %s1274_s21 = smov 0   ;;  %s1276_s22 = smov 0   ;;  %s1459_s0 = inlined_call_operand.vmem [shape: f32[2,16,128], index: 0, kind: input, shape index: {}, may-alias: {0,1}]   ;;  %s1460_s1 = inlined_call_operand.vmem [shape: f32[2,16,128], index: 1, kind: input, shape index: {}, may-alias: {0,1}]   ;;  %s1461_s2 = inlined_call_operand.vmem [shape: s32[2,16,4], index: 2, kind: input, shape index: {}]   ;;  %s1462_s3 = inlined_call_operand.vmem [shape: bf16[128,256], index: 3, kind: input, shape index: {}]   ;;  %s1463_s4 = inlined_call_operand.vmem [shape: bf16[128,256], index: 4, kind: input, shape index: {}]   ;;  %s1464_s5 = inlined_call_operand.vmem [shape: f32[1,256], index: 5, kind: input, shape index: {}]   ;;  %s1465_s6 = inlined_call_operand.vmem [shape: f32[2,16,256], index: 6, kind: output, shape index: {}]  }
   0x1   :  { %s1278_s23 = smov 0  }
   0x2 LB: > { %s28_s24 = sadd.s32 1, %s1231_s22  ;;  %p1088_p0 = scmp.ge.s32.totalorder %s1235_s23, 1  ;;  %s1235_s23 = sphi %s1278_s23, %s16_s23   ;;  %s1231_s22 = sphi %s1276_s22, %s1467_s22   ;;  %s1227_s21 = sphi %s1274_s21, %s1466_s21  }
   0x3   : > { %p30_p1 = scmp.ge.s32.totalorder %s28_s24, 2  ;;  %p260_p2 = scmp.lt.s32.totalorder %s1235_s23, 3 }
   0x5   : > { %s1469_s24 = smov (%p30_p1, %s28_s24), 0  ;;  %p261_p3 = pnand %p1088_p0, %p260_p2 }
   0x6   : > { %p313_p4 = scmp.lt.s32.totalorder (!%p261_p3), %s1227_s21, 1 }
   0x7   : > { %264 = sbr.rel (%p261_p3) target bundleno = 470 (0x1d6), region = 44 }
   0xc   : > { %v1165_v0 = vld [vmem:[%s1462_s3 + $0x74] ss:$8 sps:$4 sm:$0xff]   ;;  %v1167_v1 = vld [vmem:[%s1462_s3 + $0x70] ss:$8 sps:$4 sm:$0xff]   ;;  %v1237_v2 = vmov 0   ;;  %s1471_s21 = smov (!%p313_p4, %s1227_s21), 1  ;;  %v515_v5 = vlaneseq }
   0xd   : > { %484 = vmatprep.mubr.bf16.mxu0 %v1237_v2  ;;  %637 = vmatprep.mubr.bf16.mxu1 %v1237_v2  ;;  %v1168_v3 = vld [vmem:[%s1462_s3 + $0x64] ss:$8 sps:$4 sm:$0xff]   ;;  %v1170_v4 = vld [vmem:[%s1462_s3 + $0x60] ss:$8 sps:$4 sm:$0xff]   ;;  %v1171_v6 = vld [vmem:[%s1462_s3 + $0x54] ss:$8 sps:$4 sm:$0xff]  }
   0xe   : > { %452 = vmatprep.subr.bf16.mxu0 %v1165_v0  ;;  %v1173_v7 = vld [vmem:[%s1462_s3 + $0x50] ss:$8 sps:$4 sm:$0xff]   ;;  %s1315_s13 = sshll.u32 %s1471_s21, 4  ;;  %v1318_v8 = vand.u32 127, %v515_v5  ;;  %v1174_v9 = vld [vmem:[%s1462_s3 + $0x44] ss:$8 sps:$4 sm:$0xff]  }
   0xf   : > { %453 = vmatpush1.bf16.msra.mxu0 %v1167_v1  ;;  %s336_s18 = scalar_lea.vmem %s1461_s2, %s1315_s13  ;;  %v1176_v10 = vld [vmem:[%s1462_s3 + $0x40] ss:$8 sps:$4 sm:$0xff]   ;;  %v1177_v11 = vld [vmem:[%s1462_s3 + $0x34] ss:$8 sps:$4 sm:$0xff]   ;;  %vm658_vm2 = vcmask 31744   ;;  %s317_s15 = scalar_lea.vmem %s1459_s0, %s1315_s13  ;;  %vm670_vm9 = vcmask 130048  }
  0x10   : > { %454 = vmatprep.subr.bf16.mxu0 %v1168_v3  ;;  %v648_v12 = vld [vmem:[%s336_s18] sm:$0xff]  ;;  %vm729_vm0 = vcmp.eq.s32.totalorder %v1318_v8, 1  ;;  %vm655_vm1 = vcmp.eq.s32.totalorder %v1318_v8, 0  ;;  %v649_v13 = vld [vmem:[%s336_s18 + $0x8] sm:$0xff]  ;;  %v1189_v16 = vld [vmem:[%s1463_s4 + $0x74] ss:$8 sps:$4 sm:$0xff]   ;;  %s326_s17 = scalar_lea.vmem %s1460_s1, %s1315_s13  ;;  %v654_v3 = vcvt.s32.f32 %v1318_v8 }
  0x11   : > { %v650_v14 = vcvt.s32.f32 %v648_v12  ;;  %v651_v15 = vcvt.s32.f32 %v649_v13  ;;  %v1179_v17 = vld [vmem:[%s1462_s3 + $0x30] ss:$8 sps:$4 sm:$0xff]   ;;  %605 = vmatprep.subr.bf16.mxu1 %v1189_v16  ;;  %v1192_v22 = vld [vmem:[%s1463_s4 + $0x64] ss:$8 sps:$4 sm:$0xff]   ;;  %vm805_vm3 = vcmp.eq.s32.totalorder %v1318_v8, 2  ;;  %vm881_vm4 = vcmp.eq.s32.totalorder %v1318_v8, 3 }
  0x12   : > { %v1191_v18 = vld [vmem:[%s1463_s4 + $0x70] ss:$8 sps:$4 sm:$0xff]   ;;  %v1194_v26 = vld [vmem:[%s1463_s4 + $0x60] ss:$8 sps:$4 sm:$0xff]   ;;  %v1180_v27 = vld [vmem:[%s1462_s3 + $0x24] ss:$8 sps:$4 sm:$0xff]  }
  0x13   : > { %455 = vmatpush1.bf16.msra.mxu0 %v1170_v4  ;;  %v730_v19 = vsel %vm729_vm0, %v650_v14, 0.0  ;;  %v656_v20 = vsel %vm655_vm1, %v650_v14, 0.0  ;;  %v731_v21 = vsel %vm729_vm0, %v651_v15, 0.0  ;;  %v657_v25 = vsel %vm655_vm1, %v651_v15, 0.0  ;;  %606 = vmatpush1.bf16.msra.mxu1 %v1191_v18  ;;  %v1195_v29 = vld [vmem:[%s1463_s4 + $0x54] ss:$8 sps:$4 sm:$0xff]  }
  0x14   : > { %456 = vmatprep.subr.bf16.mxu0 %v1171_v6  ;;  %v732_v23 = vsel %vm658_vm2, %v730_v19, 0.0  ;;  %v659_v24 = vsel %vm658_vm2, %v656_v20, 0.0  ;;  %v735_v28 = vsel %vm658_vm2, %v731_v21, 0.0  ;;  %607 = vmatprep.subr.bf16.mxu1 %v1192_v22  ;;  %v1182_v30 = vld [vmem:[%s1462_s3 + $0x20] ss:$8 sps:$4 sm:$0xff]   ;;  %v662_v31 = vsel %vm658_vm2, %v657_v25, 0.0 }
  0x15   : > { %733 = vadd.xlane.f32.xlu1 %v732_v23  ;;  %660 = vadd.xlane.f32.xlu0 %v659_v24  ;;  %v807_v32 = vsel %vm805_vm3, %v651_v15, 0.0  ;;  %v806_v33 = vsel %vm805_vm3, %v650_v14, 0.0  ;;  %v1197_v34 = vld [vmem:[%s1463_s4 + $0x50] ss:$8 sps:$4 sm:$0xff]   ;;  %v1183_v35 = vld [vmem:[%s1462_s3 + $0x14] ss:$8 sps:$4 sm:$0xff]  }
  0x16   : > { %v811_v36 = vsel %vm658_vm2, %v807_v32, 0.0  ;;  %v1198_v37 = vld [vmem:[%s1463_s4 + $0x44] ss:$8 sps:$4 sm:$0xff]   ;;  %v808_v38 = vsel %vm658_vm2, %v806_v33, 0.0  ;;  %v883_v39 = vsel %vm881_vm4, %v651_v15, 0.0  ;;  %v882_v41 = vsel %vm881_vm4, %v650_v14, 0.0 }
  0x17   : > { %457 = vmatpush1.bf16.msra.mxu0 %v1173_v7  ;;  %608 = vmatpush1.bf16.msra.mxu1 %v1194_v26  ;;  %v1185_v40 = vld [vmem:[%s1462_s3 + $0x10] ss:$8 sps:$4 sm:$0xff]   ;;  %v1200_v42 = vld [vmem:[%s1463_s4 + $0x40] ss:$8 sps:$4 sm:$0xff]   ;;  %v1186_v43 = vld [vmem:[%s1462_s3 + $0x4] ss:$8 sps:$4 sm:$0xff]  }
  0x18   : > { %458 = vmatprep.subr.bf16.mxu0 %v1174_v9  ;;  %609 = vmatprep.subr.bf16.mxu1 %v1195_v29  ;;  %v887_v44 = vsel %vm658_vm2, %v883_v39, 0.0  ;;  %v1201_v45 = vld [vmem:[%s1463_s4 + $0x34] ss:$8 sps:$4 sm:$0xff]   ;;  %v1188_v46 = vld [vmem:[%s1462_s3] ss:$8 sps:$4 sm:$0xff]   ;;  %v884_v47 = vsel %vm658_vm2, %v882_v41, 0.0 }
  0x19   : > { %736 = vadd.xlane.f32.xlu1 %v735_v28  ;;  %663 = vadd.xlane.f32.xlu0 %v662_v31  ;;  %v350_v48 = vld [vmem:[%s317_s15] sm:$0xff]  ;;  %v351_v49 = vld [vmem:[%s317_s15 + $0x8] sm:$0xff]  ;;  %v1203_v50 = vld [vmem:[%s1463_s4 + $0x30] ss:$8 sps:$4 sm:$0xff]   ;;  %v516_v28 = vshrl.u32 %v515_v5, 7  ;;  %s1138_s19 = sshll.u32 %s1471_s21, 5 }
  0x1a   : > { %v1204_v51 = vld [vmem:[%s1463_s4 + $0x24] ss:$8 sps:$4 sm:$0xff]   ;;  %v352_v52 = vpack.c.bf16 %v351_v49, %v350_v48  ;;  %v1206_v53 = vld [vmem:[%s1463_s4 + $0x20] ss:$8 sps:$4 sm:$0xff]   ;;  %v1207_v54 = vld [vmem:[%s1463_s4 + $0x14] ss:$8 sps:$4 sm:$0xff]   ;;  %s347_s26 = scalar_lea.vmem %s1465_s6, %s1138_s19 }
  0x1b   : > { %459 = vmatpush1.bf16.msra.mxu0 %v1176_v10  ;;  %610 = vmatpush1.bf16.msra.mxu1 %v1197_v34  ;;  %v1209_v55 = vld [vmem:[%s1463_s4 + $0x10] ss:$8 sps:$4 sm:$0xff]   ;;  %v1210_v56 = vld [vmem:[%s1463_s4 + $0x4] ss:$8 sps:$4 sm:$0xff]   ;;  %v1212_v57 = vld [vmem:[%s1463_s4] ss:$8 sps:$4 sm:$0xff]  }
  0x1c   : > { %460 = vmatprep.subr.bf16.mxu0 %v1177_v11  ;;  %611 = vmatprep.subr.bf16.mxu1 %v1198_v37  ;;  %v353_v58 = vld [vmem:[%s326_s17] sm:$0xff]  ;;  %v354_v59 = vld [vmem:[%s326_s17 + $0x8] sm:$0xff]  ;;  %v1238_v11 = vmov 0.0   ;;  %v521_v32 = vsub.s32 1, %v516_v28 }
  0x1d   : > { %812 = vadd.xlane.f32.xlu1 %v811_v36  ;;  %809 = vadd.xlane.f32.xlu0 %v808_v38  ;;  %v355_v60 = vpack.c.bf16 %v354_v59, %v353_v58  ;;  %v513_v31 = vld [vmem:[%s1464_s5] sm:$0x3] }
  0x1e   : > { %v522_v34 = vrot.slane %v513_v31, %v521_v32 }
  0x1f   : > { %461 = vmatpush1.bf16.msra.mxu0 %v1179_v17  ;;  %612 = vmatpush1.bf16.msra.mxu1 %v1200_v42 }
  0x20   : > { %462 = vmatprep.subr.bf16.mxu0 %v1180_v27  ;;  %613 = vmatprep.subr.bf16.mxu1 %v1201_v45 }
  0x21   : > { %888 = vadd.xlane.f32.xlu1 %v887_v44  ;;  %885 = vadd.xlane.f32.xlu0 %v884_v47 }
  0x23   : > { %463 = vmatpush1.bf16.msra.mxu0 %v1182_v30  ;;  %614 = vmatpush1.bf16.msra.mxu1 %v1203_v50  ;;  %v517_v30 = vsub.s32 0, %v516_v28 }
  0x24   : > { %464 = vmatprep.subr.bf16.mxu0 %v1183_v35  ;;  %615 = vmatprep.subr.bf16.mxu1 %v1204_v51 }
  0x27   : > { %465 = vmatpush1.bf16.msra.mxu0 %v1185_v40  ;;  %616 = vmatpush1.bf16.msra.mxu1 %v1206_v53 }
  0x28   : > { %466 = vmatprep.subr.bf16.mxu0 %v1186_v43  ;;  %617 = vmatprep.subr.bf16.mxu1 %v1207_v54 }
  0x2b   : > { %467 = vmatpush1.bf16.msra.mxu0 %v1188_v46  ;;  %618 = vmatpush1.bf16.msra.mxu1 %v1209_v55 }
  0x2c   : > { %619 = vmatprep.subr.bf16.mxu1 %v1210_v56 }
  0x2e   : > { %485 = vmatmul.mubr.bf16.vlgmr.msra.gmra.mxu0 %v352_v52 }
  0x2f   : > { %706 = vmatprep.mubr.bf16.mxu0 %v1237_v2  ;;  %620 = vmatpush1.bf16.msra.mxu1 %v1212_v57 }
  0x32   : > { %638 = vmatmul.mubr.bf16.vlgmr.msra.gmra.mxu1 %v355_v60 }
  0x33   : > { %778 = vmatprep.mubr.bf16.mxu1 %v1237_v2 }
  0x9e   : > { %v734_v61 = vpop.xlane.xlu1 %733  ;;  %v661_v62 = vpop.xlane.xlu0 %660 }
  0x9f   : > { %vm738_vm5 = vcmp.eq.f32.partialorder %v734_v61, %v654_v3  ;;  %vm665_vm7 = vcmp.eq.f32.partialorder %v661_v62, %v654_v3 }
  0xa0   : > { %v740_v12 = vsel %vm738_vm5, 1.0, %v1238_v11  ;;  %v667_v15 = vsel %vm665_vm7, 1.0, %v1238_v11 }
  0xa2   : > { %v737_v63 = vpop.xlane.xlu1 %736  ;;  %v664_v0 = vpop.xlane.xlu0 %663 }
  0xa3   : > { %vm739_vm6 = vcmp.eq.f32.partialorder %v737_v63, %v654_v3  ;;  %vm666_vm8 = vcmp.eq.f32.partialorder %v664_v0, %v654_v3 }
  0xa4   : > { %v741_v14 = vsel %vm739_vm6, 1.0, %v1238_v11  ;;  %v668_v17 = vsel %vm666_vm8, 1.0, %v1238_v11 }
  0xa5   : > { %v742_v8 = vpack.c.bf16 %v741_v14, %v740_v12  ;;  %v669_v20 = vpack.c.bf16 %v668_v17, %v667_v15 }
  0xa6   : > { %v813_v4 = vpop.xlane.xlu1 %812  ;;  %v810_v7 = vpop.xlane.xlu0 %809 }
  0xa7   : > { %vm815_vm12 = vcmp.eq.f32.partialorder %v813_v4, %v654_v3  ;;  %vm814_vm13 = vcmp.eq.f32.partialorder %v810_v7, %v654_v3 }
  0xa8   : > { %v817_v23 = vsel %vm815_vm12, 1.0, %v1238_v11  ;;  %v816_v24 = vsel %vm814_vm13, 1.0, %v1238_v11 }
  0xa9   : > { %v818_v26 = vpack.c.bf16 %v817_v23, %v816_v24 }
  0xaa   : > { %v889_v18 = vpop.xlane.xlu1 %888  ;;  %v886_v19 = vpop.xlane.xlu0 %885 }
  0xab   : > { %vm891_vm10 = vcmp.eq.f32.partialorder %v889_v18, %v654_v3  ;;  %vm890_vm11 = vcmp.eq.f32.partialorder %v886_v19, %v654_v3 }
  0xac   : > { %v893_v21 = vsel %vm891_vm10, 1.0, %v1238_v11  ;;  %v892_v22 = vsel %vm890_vm11, 1.0, %v1238_v11 }
  0xad   : > { %v894_v25 = vpack.c.bf16 %v893_v21, %v892_v22 }
  0xee   : > { %v486_v1 = vpop.f32.mrf.mxu0 }
  0xf0   : > { %v488_v6 = vpop.f32.mrf.mxu0 }
  0xf2   : > { %v490_v9 = vpop.f32.mrf.mxu0  ;;  %v639_v27 = vpop.f32.mrf.mxu1 }
  0xf3   : > { %v495_v16 = vpack.c.bf16 %v490_v9, %v486_v1 }
  0xf4   : > { %v492_v10 = vpop.f32.mrf.mxu0  ;;  %v641_v29 = vpop.f32.mrf.mxu1 }
  0xf5   : > { %v496_v13 = vpack.c.bf16 %v492_v10, %v488_v6  ;;  %v642_v41 = vadd.f32 %v641_v29, %v522_v34 }
  0xf6   : > { %v643_v33 = vpop.f32.mrf.mxu1 }
  0xf7   : > { %688 = vmatprep.subr.bf16.mxu0 %v496_v13  ;;  %760 = vmatprep.subr.bf16.mxu1 %v496_v13 }
  0xf8   : > { %689 = vmatpush1.bf16.msra.mxu0 %v495_v16  ;;  %761 = vmatpush1.bf16.msra.mxu1 %v495_v16  ;;  %v645_v35 = vpop.f32.mrf.mxu1 }
  0xf9   : > { %836 = vmatprep.subr.bf16.mxu0 %v496_v13  ;;  %912 = vmatprep.subr.bf16.mxu1 %v496_v13  ;;  %v1439_v50 = vadd.f32 %v645_v35, %v522_v34 }
  0xfb   : > { %1129 = vmatmul.mubr.msk.bf16.vlgmr.msra.gmra.mxu0 %vm670_vm9, %v669_v20  ;;  %1130 = vmatmul.mubr.msk.bf16.vlgmr.msra.gmra.mxu1 %vm670_vm9, %v742_v8 }
  0xfc   : > { %837 = vmatpush1.bf16.msra.mxu0 %v495_v16  ;;  %913 = vmatpush1.bf16.msra.mxu1 %v495_v16 }
  0xfd   : > { %854 = vmatprep.mubr.bf16.mxu0 %v1237_v2  ;;  %930 = vmatprep.mubr.bf16.mxu1 %v1237_v2  ;;  %v518_v2 = vrot.slane %v513_v31, %v517_v30 }
  0xff   : > { %v640_v36 = vadd.f32 %v639_v27, %v518_v2  ;;  %v644_v42 = vadd.f32 %v643_v33, %v518_v2 }
 0x103   : > { %1131 = vmatmul.mubr.msk.bf16.vlgmr.msra.gmra.mxu0 %vm670_vm9, %v818_v26  ;;  %1132 = vmatmul.mubr.msk.bf16.vlgmr.msra.gmra.mxu1 %vm670_vm9, %v894_v25 }
 0x1bb   : > { %v708_v37 = vpop.f32.mrf.mxu0  ;;  %v780_v38 = vpop.f32.mrf.mxu1 }
 0x1bc   : > { %v709_v39 = vadd.f32 %v708_v37, %v640_v36  ;;  %v781_v40 = vadd.f32 %v780_v38, %v640_v36 }
 0x1bd   : > { %v710_v43 = vpop.f32.mrf.mxu0  ;;  %v782_v5 = vpop.f32.mrf.mxu1 }
 0x1be   : > { %vm717_vm14 = vcmp.ge.f32.partialorder %v709_v39, 0.0  ;;  %v721_v44 = vmul.f32 0.2, %v709_v39  ;;  %vm789_vm15 = vcmp.ge.f32.partialorder %v781_v40, 0.0  ;;  %v793_v45 = vmul.f32 0.2, %v781_v40 }
 0x1bf   : > { %v711_v46 = vadd.f32 %v710_v43, %v642_v41  ;;  %v783_v47 = vadd.f32 %v782_v5, %v642_v41  ;;  %v712_v48 = vpop.f32.mrf.mxu0  ;;  %v784_v49 = vpop.f32.mrf.mxu1 }
 0x1c0   : > { %v725_v51 = vsel %vm717_vm14, %v709_v39, %v721_v44  ;;  %v713_v52 = vadd.f32 %v712_v48, %v644_v42  ;;  %v785_v53 = vadd.f32 %v784_v49, %v644_v42  ;;  %v797_v54 = vsel %vm789_vm15, %v781_v40, %v793_v45 }
 0x1c1   : > { %vm718_vm0 = vcmp.ge.f32.partialorder %v711_v46, 0.0  ;;  %v722_v55 = vmul.f32 0.2, %v711_v46  ;;  %vm790_vm1 = vcmp.ge.f32.partialorder %v783_v47, 0.0  ;;  %v714_v56 = vpop.f32.mrf.mxu0  ;;  %v786_v57 = vpop.f32.mrf.mxu1  ;;  %v794_v58 = vmul.f32 0.2, %v783_v47 }
 0x1c2   : > { %vm719_vm2 = vcmp.ge.f32.partialorder %v713_v52, 0.0  ;;  %v723_v59 = vmul.f32 0.2, %v713_v52  ;;  %vm791_vm3 = vcmp.ge.f32.partialorder %v785_v53, 0.0  ;;  %v795_v61 = vmul.f32 0.2, %v785_v53 }
 0x1c3   : > { %v726_v60 = vsel %vm718_vm0, %v711_v46, %v722_v55  ;;  %v715_v62 = vadd.f32 %v714_v56, %v1439_v50  ;;  %v787_v63 = vadd.f32 %v786_v57, %v1439_v50  ;;  %v856_v0 = vpop.f32.mrf.mxu0  ;;  %v932_v1 = vpop.f32.mrf.mxu1  ;;  %v798_v3 = vsel %vm790_vm1, %v783_v47, %v794_v58 }
 0x1c4   : > { %v727_v4 = vsel %vm719_vm2, %v713_v52, %v723_v59  ;;  %v857_v6 = vadd.f32 %v856_v0, %v640_v36  ;;  %v933_v7 = vadd.f32 %v932_v1, %v640_v36  ;;  %v801_v9 = vmax.f32 %v725_v51, %v797_v54 }
 0x1c5   : > { %v799_v10 = vsel %vm791_vm3, %v785_v53, %v795_v61  ;;  %vm720_vm4 = vcmp.ge.f32.partialorder %v715_v62, 0.0  ;;  %v724_v11 = vmul.f32 0.2, %v715_v62  ;;  %v858_v12 = vpop.f32.mrf.mxu0  ;;  %v934_v13 = vpop.f32.mrf.mxu1  ;;  %v802_v14 = vmax.f32 %v726_v60, %v798_v3 }
 0x1c6   : > { %vm792_vm5 = vcmp.ge.f32.partialorder %v787_v63, 0.0  ;;  %v796_v15 = vmul.f32 0.2, %v787_v63  ;;  %vm865_vm6 = vcmp.ge.f32.partialorder %v857_v6, 0.0  ;;  %v803_v16 = vmax.f32 %v727_v4, %v799_v10 }
 0x1c7   : > { %v869_v17 = vmul.f32 0.2, %v857_v6  ;;  %vm941_vm7 = vcmp.ge.f32.partialorder %v933_v7, 0.0  ;;  %v945_v18 = vmul.f32 0.2, %v933_v7  ;;  %v860_v19 = vpop.f32.mrf.mxu0  ;;  %v936_v8 = vpop.f32.mrf.mxu1  ;;  %v728_v20 = vsel %vm720_vm4, %v715_v62, %v724_v11 }
 0x1c8   : > { %v859_v21 = vadd.f32 %v858_v12, %v642_v41  ;;  %v935_v22 = vadd.f32 %v934_v13, %v642_v41  ;;  %v861_v23 = vadd.f32 %v860_v19, %v644_v42  ;;  %v800_v24 = vsel %vm792_vm5, %v787_v63, %v796_v15 }
 0x1c9   : > { %v873_v25 = vsel %vm865_vm6, %v857_v6, %v869_v17  ;;  %v949_v26 = vsel %vm941_vm7, %v933_v7, %v945_v18  ;;  %v937_v27 = vadd.f32 %v936_v8, %v644_v42  ;;  %v862_v28 = vpop.f32.mrf.mxu0  ;;  %v938_v31 = vpop.f32.mrf.mxu1  ;;  %v804_v37 = vmax.f32 %v728_v20, %v800_v24 }
 0x1ca   : > { %v877_v29 = vmax.f32 %v801_v9, %v873_v25  ;;  %vm866_vm8 = vcmp.ge.f32.partialorder %v859_v21, 0.0  ;;  %v870_v30 = vmul.f32 0.2, %v859_v21  ;;  %vm942_vm9 = vcmp.ge.f32.partialorder %v935_v22, 0.0 }
 0x1cb   : > { %v946_v32 = vmul.f32 0.2, %v935_v22  ;;  %vm867_vm10 = vcmp.ge.f32.partialorder %v861_v23, 0.0  ;;  %v871_v33 = vmul.f32 0.2, %v861_v23  ;;  %vm943_vm11 = vcmp.ge.f32.partialorder %v937_v27, 0.0 }
 0x1cc   : > { %v953_v2 = vmax.f32 %v877_v29, %v949_v26  ;;  %v874_v34 = vsel %vm866_vm8, %v859_v21, %v870_v30  ;;  %v947_v35 = vmul.f32 0.2, %v937_v27  ;;  %v863_v36 = vadd.f32 %v862_v28, %v1439_v50 }
 0x1cd   : > { %v878_v38 = vmax.f32 %v802_v14, %v874_v34  ;;  %v875_v39 = vsel %vm867_vm10, %v861_v23, %v871_v33  ;;  %v939_v40 = vadd.f32 %v938_v31, %v1439_v50  ;;  %v950_v41 = vsel %vm942_vm9, %v935_v22, %v946_v32 }
 0x1ce   : > { %957 = vst [vmem:[%s347_s26] sm:$0xff] %v953_v2  ;;  %v879_v42 = vmax.f32 %v803_v16, %v875_v39  ;;  %vm868_vm12 = vcmp.ge.f32.partialorder %v863_v36, 0.0  ;;  %v872_v43 = vmul.f32 0.2, %v863_v36  ;;  %v951_v44 = vsel %vm943_vm11, %v937_v27, %v947_v35 }
 0x1cf   : > { %v954_v5 = vmax.f32 %v878_v38, %v950_v41  ;;  %vm944_vm13 = vcmp.ge.f32.partialorder %v939_v40, 0.0  ;;  %v948_v45 = vmul.f32 0.2, %v939_v40 }
 0x1d0   : > { %v955_v46 = vmax.f32 %v879_v42, %v951_v44  ;;  %v876_v47 = vsel %vm868_vm12, %v863_v36, %v872_v43 }
 0x1d1   : > { %958 = vst [vmem:[%s347_s26 + $0x8] sm:$0xff] %v954_v5  ;;  %v880_v48 = vmax.f32 %v804_v37, %v876_v47  ;;  %v952_v49 = vsel %vm944_vm13, %v939_v40, %v948_v45 }
 0x1d2   : > { %959 = vst [vmem:[%s347_s26 + $0x10] sm:$0xff] %v955_v46 }
 0x1d3   : > { %v956_v51 = vmax.f32 %v880_v48, %v952_v49 }
 0x1d5   : > { %960 = vst [vmem:[%s347_s26 + $0x18] sm:$0xff] %v956_v51 }
 0x1d6 PF: > { %s16_s23 = sadd.s32 1, %s1235_s23   ;;  %s1466_s21 = smov %s1231_s22 }
 0x1d7   : > { %p13_p5 = scmp.ge.s32.totalorder %s16_s23, 4   ;;  %s1467_s22 = smov %s1469_s24 }
 0x1d9   :  { %15 = sbr.rel (!%p13_p5) target bundleno = 2 (0x2), region = 80 }

// kernel: dgcnn_brute_forward.21
= control target key start
LH: loop header
LB: loop body
LE: loop exit
PB: predicated region body
PF: predicated region fallthrough
CT: control target
= control target key end

     0   :  { %s2124_s0 = inlined_call_operand.vmem [shape: f32[2,256], index: 0, kind: input, shape index: {}]   ;;  %s2125_s1 = inlined_call_operand.vmem [shape: bf16[256,512], index: 1, kind: input, shape index: {}]   ;;  %s2126_s2 = inlined_call_operand.vmem [shape: f32[1,512], index: 2, kind: input, shape index: {}]   ;;  %s2127_s3 = inlined_call_operand.vmem [shape: bf16[512,256], index: 3, kind: input, shape index: {}]   ;;  %s2128_s4 = inlined_call_operand.vmem [shape: f32[1,256], index: 4, kind: input, shape index: {}]   ;;  %s2129_s5 = inlined_call_operand.vmem [shape: bf16[256,40], index: 5, kind: input, shape index: {}]   ;;  %s2130_s6 = inlined_call_operand.vmem [shape: f32[1,40], index: 6, kind: input, shape index: {}]   ;;  %s2131_s7 = inlined_call_operand.hbm [shape: f32[2,40], index: 7, kind: output, shape index: {}]  }
   0x1   :  { %v1392_v0 = vld [vmem:[%s2125_s1 + $0xe4] ss:$16 sps:$4 sm:$0xff]   ;;  %v1394_v1 = vld [vmem:[%s2125_s1 + $0xec] ss:$16 sps:$4 sm:$0xff]   ;;  %v1396_v2 = vld [vmem:[%s2125_s1 + $0xe0] ss:$16 sps:$4 sm:$0xff]  }
   0x2   :  { %448 = vmatprep.subr.bf16.mxu0 %v1392_v0  ;;  %v1397_v3 = vld [vmem:[%s2125_s1 + $0xe8] ss:$16 sps:$4 sm:$0xff]   ;;  %489 = vmatprep.subr.bf16.mxu1 %v1394_v1  ;;  %v1398_v4 = vld [vmem:[%s2125_s1 + $0xc4] ss:$16 sps:$4 sm:$0xff]   ;;  %v1400_v5 = vld [vmem:[%s2125_s1 + $0xcc] ss:$16 sps:$4 sm:$0xff]  }
   0x3   :  { %449 = vmatpush1.bf16.msra.mxu0 %v1396_v2  ;;  %490 = vmatpush1.bf16.msra.mxu1 %v1397_v3  ;;  %v1402_v6 = vld [vmem:[%s2125_s1 + $0xc0] ss:$16 sps:$4 sm:$0xff]   ;;  %v1403_v7 = vld [vmem:[%s2125_s1 + $0xc8] ss:$16 sps:$4 sm:$0xff]   ;;  %v1404_v8 = vld [vmem:[%s2125_s1 + $0xa4] ss:$16 sps:$4 sm:$0xff]  }
   0x4   :  { %450 = vmatprep.subr.bf16.mxu0 %v1398_v4  ;;  %491 = vmatprep.subr.bf16.mxu1 %v1400_v5  ;;  %v1406_v9 = vld [vmem:[%s2125_s1 + $0xac] ss:$16 sps:$4 sm:$0xff]   ;;  %v1408_v10 = vld [vmem:[%s2125_s1 + $0xa0] ss:$16 sps:$4 sm:$0xff]   ;;  %v1409_v11 = vld [vmem:[%s2125_s1 + $0xa8] ss:$16 sps:$4 sm:$0xff]  }
   0x5   :  { %v1410_v12 = vld [vmem:[%s2125_s1 + $0x84] ss:$16 sps:$4 sm:$0xff]   ;;  %v1412_v13 = vld [vmem:[%s2125_s1 + $0x8c] ss:$16 sps:$4 sm:$0xff]   ;;  %v1414_v14 = vld [vmem:[%s2125_s1 + $0x80] ss:$16 sps:$4 sm:$0xff]  }
   0x6   :  { %v1415_v15 = vld [vmem:[%s2125_s1 + $0x88] ss:$16 sps:$4 sm:$0xff]   ;;  %v1416_v16 = vld [vmem:[%s2125_s1 + $0x64] ss:$16 sps:$4 sm:$0xff]   ;;  %v1418_v17 = vld [vmem:[%s2125_s1 + $0x6c] ss:$16 sps:$4 sm:$0xff]  }
   0x7   :  { %451 = vmatpush1.bf16.msra.mxu0 %v1402_v6  ;;  %492 = vmatpush1.bf16.msra.mxu1 %v1403_v7  ;;  %v1420_v18 = vld [vmem:[%s2125_s1 + $0x60] ss:$16 sps:$4 sm:$0xff]   ;;  %v1421_v19 = vld [vmem:[%s2125_s1 + $0x68] ss:$16 sps:$4 sm:$0xff]   ;;  %v1422_v20 = vld [vmem:[%s2125_s1 + $0x44] ss:$16 sps:$4 sm:$0xff]  }
   0x8   :  { %452 = vmatprep.subr.bf16.mxu0 %v1404_v8  ;;  %493 = vmatprep.subr.bf16.mxu1 %v1406_v9  ;;  %v1424_v21 = vld [vmem:[%s2125_s1 + $0x4c] ss:$16 sps:$4 sm:$0xff]   ;;  %v1426_v22 = vld [vmem:[%s2125_s1 + $0x40] ss:$16 sps:$4 sm:$0xff]   ;;  %v1427_v23 = vld [vmem:[%s2125_s1 + $0x48] ss:$16 sps:$4 sm:$0xff]  }
   0x9   :  { %v1428_v24 = vld [vmem:[%s2125_s1 + $0x24] ss:$16 sps:$4 sm:$0xff]   ;;  %v1430_v25 = vld [vmem:[%s2125_s1 + $0x2c] ss:$16 sps:$4 sm:$0xff]   ;;  %v1432_v26 = vld [vmem:[%s2125_s1 + $0x20] ss:$16 sps:$4 sm:$0xff]  }
   0xa   :  { %v1433_v27 = vld [vmem:[%s2125_s1 + $0x28] ss:$16 sps:$4 sm:$0xff]   ;;  %v1434_v28 = vld [vmem:[%s2125_s1 + $0x4] ss:$16 sps:$4 sm:$0xff]   ;;  %v1436_v29 = vld [vmem:[%s2125_s1 + $0xc] ss:$16 sps:$4 sm:$0xff]  }
   0xb   :  { %453 = vmatpush1.bf16.msra.mxu0 %v1408_v10  ;;  %494 = vmatpush1.bf16.msra.mxu1 %v1409_v11  ;;  %v1438_v30 = vld [vmem:[%s2125_s1] ss:$16 sps:$4 sm:$0xff]   ;;  %v1439_v31 = vld [vmem:[%s2125_s1 + $0x8] ss:$16 sps:$4 sm:$0xff]   ;;  %v1440_v32 = vld [vmem:[%s2125_s1 + $0x1e4] ss:$16 sps:$4 sm:$0xff]  }
   0xc   :  { %454 = vmatprep.subr.bf16.mxu0 %v1410_v12  ;;  %495 = vmatprep.subr.bf16.mxu1 %v1412_v13  ;;  %v1442_v33 = vld [vmem:[%s2125_s1 + $0x1ec] ss:$16 sps:$4 sm:$0xff]   ;;  %v1444_v34 = vld [vmem:[%s2125_s1 + $0x1e0] ss:$16 sps:$4 sm:$0xff]   ;;  %v1445_v35 = vld [vmem:[%s2125_s1 + $0x1e8] ss:$16 sps:$4 sm:$0xff]  }
   0xd   :  { %v1446_v36 = vld [vmem:[%s2125_s1 + $0x1c4] ss:$16 sps:$4 sm:$0xff]   ;;  %v1448_v37 = vld [vmem:[%s2125_s1 + $0x1cc] ss:$16 sps:$4 sm:$0xff]   ;;  %v1450_v38 = vld [vmem:[%s2125_s1 + $0x1c0] ss:$16 sps:$4 sm:$0xff]  }
   0xe   :  { %v1451_v39 = vld [vmem:[%s2125_s1 + $0x1c8] ss:$16 sps:$4 sm:$0xff]   ;;  %v1452_v40 = vld [vmem:[%s2125_s1 + $0x1a4] ss:$16 sps:$4 sm:$0xff]   ;;  %v1454_v41 = vld [vmem:[%s2125_s1 + $0x1ac] ss:$16 sps:$4 sm:$0xff]  }
   0xf   :  { %455 = vmatpush1.bf16.msra.mxu0 %v1414_v14  ;;  %496 = vmatpush1.bf16.msra.mxu1 %v1415_v15  ;;  %v1456_v42 = vld [vmem:[%s2125_s1 + $0x1a0] ss:$16 sps:$4 sm:$0xff]   ;;  %v1457_v43 = vld [vmem:[%s2125_s1 + $0x1a8] ss:$16 sps:$4 sm:$0xff]   ;;  %v1458_v44 = vld [vmem:[%s2125_s1 + $0x184] ss:$16 sps:$4 sm:$0xff]  }
  0x10   :  { %456 = vmatprep.subr.bf16.mxu0 %v1416_v16  ;;  %497 = vmatprep.subr.bf16.mxu1 %v1418_v17  ;;  %v1460_v45 = vld [vmem:[%s2125_s1 + $0x18c] ss:$16 sps:$4 sm:$0xff]   ;;  %v1223_v46 = vld.sshfl [vmem:[%s2124_s0] sm:$0x33 pattern:$0x76325410] }
  0x11   :  { %v1462_v47 = vld [vmem:[%s2125_s1 + $0x180] ss:$16 sps:$4 sm:$0xff]   ;;  %v1463_v48 = vld [vmem:[%s2125_s1 + $0x188] ss:$16 sps:$4 sm:$0xff]   ;;  %v37_v49 = vcombine.high %v1223_v46, %v1223_v46  ;;  %v1464_v50 = vld [vmem:[%s2125_s1 + $0x164] ss:$16 sps:$4 sm:$0xff]   ;;  %v40_v5 = vpack.c.bf16 %v1223_v46, %v1223_v46 }
  0x12   :  { %v1466_v51 = vld [vmem:[%s2125_s1 + $0x16c] ss:$16 sps:$4 sm:$0xff]   ;;  %v1468_v53 = vld [vmem:[%s2125_s1 + $0x160] ss:$16 sps:$4 sm:$0xff]   ;;  %v1469_v54 = vld [vmem:[%s2125_s1 + $0x168] ss:$16 sps:$4 sm:$0xff]  }
  0x13   :  { %457 = vmatpush1.bf16.msra.mxu0 %v1420_v18  ;;  %498 = vmatpush1.bf16.msra.mxu1 %v1421_v19  ;;  %v41_v52 = vpack.c.bf16 %v37_v49, %v37_v49  ;;  %v1470_v55 = vld [vmem:[%s2125_s1 + $0x144] ss:$16 sps:$4 sm:$0xff]   ;;  %v1472_v56 = vld [vmem:[%s2125_s1 + $0x14c] ss:$16 sps:$4 sm:$0xff]   ;;  %v1474_v57 = vld [vmem:[%s2125_s1 + $0x140] ss:$16 sps:$4 sm:$0xff]  }
  0x14   :  { %458 = vmatprep.subr.bf16.mxu0 %v1422_v20  ;;  %499 = vmatprep.subr.bf16.mxu1 %v1424_v21  ;;  %v1475_v58 = vld [vmem:[%s2125_s1 + $0x148] ss:$16 sps:$4 sm:$0xff]   ;;  %v1476_v59 = vld [vmem:[%s2125_s1 + $0x124] ss:$16 sps:$4 sm:$0xff]   ;;  %v1478_v60 = vld [vmem:[%s2125_s1 + $0x12c] ss:$16 sps:$4 sm:$0xff]  }
  0x15   :  { %480 = vmatprep.mubr.bf16.mxu0 %v41_v52  ;;  %521 = vmatprep.mubr.bf16.mxu1 %v41_v52  ;;  %v1480_v61 = vld [vmem:[%s2125_s1 + $0x120] ss:$16 sps:$4 sm:$0xff]   ;;  %v1481_v62 = vld [vmem:[%s2125_s1 + $0x128] ss:$16 sps:$4 sm:$0xff]   ;;  %v1482_v63 = vld [vmem:[%s2125_s1 + $0x104] ss:$16 sps:$4 sm:$0xff]  }
  0x16   :  { %v1484_v0 = vld [vmem:[%s2125_s1 + $0x10c] ss:$16 sps:$4 sm:$0xff]   ;;  %v1486_v1 = vld [vmem:[%s2125_s1 + $0x100] ss:$16 sps:$4 sm:$0xff]   ;;  %v1487_v2 = vld [vmem:[%s2125_s1 + $0x108] ss:$16 sps:$4 sm:$0xff]  }
  0x17   :  { %459 = vmatpush1.bf16.msra.mxu0 %v1426_v22  ;;  %500 = vmatpush1.bf16.msra.mxu1 %v1427_v23  ;;  %v1490_v3 = vld [vmem:[%s2127_s3 + $0x74] ss:$8 sps:$4 sm:$0xff]   ;;  %v1488_v6 = vld [vmem:[%s2127_s3 + $0x70] ss:$8 sps:$4 sm:$0xff]   ;;  %v1496_v8 = vld [vmem:[%s2127_s3 + $0x64] ss:$8 sps:$4 sm:$0xff]  }
  0x18   :  { %460 = vmatprep.subr.bf16.mxu0 %v1428_v24  ;;  %501 = vmatprep.subr.bf16.mxu1 %v1430_v25  ;;  %v1493_v4 = vld [vmem:[%s2127_s3 + $0x174] ss:$8 sps:$4 sm:$0xff]   ;;  %v1491_v7 = vld [vmem:[%s2127_s3 + $0x170] ss:$8 sps:$4 sm:$0xff]   ;;  %v1499_v9 = vld [vmem:[%s2127_s3 + $0x164] ss:$8 sps:$4 sm:$0xff]  }
  0x19   :  { %v1494_v10 = vld [vmem:[%s2127_s3 + $0x60] ss:$8 sps:$4 sm:$0xff]   ;;  %v1502_v12 = vld [vmem:[%s2127_s3 + $0x54] ss:$8 sps:$4 sm:$0xff]   ;;  %v1500_v14 = vld [vmem:[%s2127_s3 + $0x50] ss:$8 sps:$4 sm:$0xff]  }
  0x1a   :  { %v1497_v11 = vld [vmem:[%s2127_s3 + $0x160] ss:$8 sps:$4 sm:$0xff]   ;;  %v1505_v13 = vld [vmem:[%s2127_s3 + $0x154] ss:$8 sps:$4 sm:$0xff]   ;;  %v1503_v15 = vld [vmem:[%s2127_s3 + $0x150] ss:$8 sps:$4 sm:$0xff]  }
  0x1b   :  { %461 = vmatpush1.bf16.msra.mxu0 %v1432_v26  ;;  %502 = vmatpush1.bf16.msra.mxu1 %v1433_v27  ;;  %v1508_v16 = vld [vmem:[%s2127_s3 + $0x44] ss:$8 sps:$4 sm:$0xff]   ;;  %v1506_v18 = vld [vmem:[%s2127_s3 + $0x40] ss:$8 sps:$4 sm:$0xff]   ;;  %v1514_v20 = vld [vmem:[%s2127_s3 + $0x34] ss:$8 sps:$4 sm:$0xff]  }
  0x1c   :  { %462 = vmatprep.subr.bf16.mxu0 %v1434_v28  ;;  %503 = vmatprep.subr.bf16.mxu1 %v1436_v29  ;;  %v1511_v17 = vld [vmem:[%s2127_s3 + $0x144] ss:$8 sps:$4 sm:$0xff]   ;;  %v1509_v19 = vld [vmem:[%s2127_s3 + $0x140] ss:$8 sps:$4 sm:$0xff]   ;;  %v1517_v21 = vld [vmem:[%s2127_s3 + $0x134] ss:$8 sps:$4 sm:$0xff]  }
  0x1d   :  { %v1512_v22 = vld [vmem:[%s2127_s3 + $0x30] ss:$8 sps:$4 sm:$0xff]   ;;  %v1520_v24 = vld [vmem:[%s2127_s3 + $0x24] ss:$8 sps:$4 sm:$0xff]   ;;  %v1518_v26 = vld [vmem:[%s2127_s3 + $0x20] ss:$8 sps:$4 sm:$0xff]  }
  0x1e   :  { %v1515_v23 = vld [vmem:[%s2127_s3 + $0x130] ss:$8 sps:$4 sm:$0xff]   ;;  %v1523_v25 = vld [vmem:[%s2127_s3 + $0x124] ss:$8 sps:$4 sm:$0xff]   ;;  %v1521_v27 = vld [vmem:[%s2127_s3 + $0x120] ss:$8 sps:$4 sm:$0xff]  }
  0x1f   :  { %463 = vmatpush1.bf16.msra.mxu0 %v1438_v30  ;;  %504 = vmatpush1.bf16.msra.mxu1 %v1439_v31  ;;  %v1526_v28 = vld [vmem:[%s2127_s3 + $0x14] ss:$8 sps:$4 sm:$0xff]   ;;  %v1524_v30 = vld [vmem:[%s2127_s3 + $0x10] ss:$8 sps:$4 sm:$0xff]  }
  0x20   :  { %464 = vmatprep.subr.bf16.mxu0 %v1440_v32  ;;  %505 = vmatprep.subr.bf16.mxu1 %v1442_v33  ;;  %v1529_v29 = vld [vmem:[%s2127_s3 + $0x114] ss:$8 sps:$4 sm:$0xff]   ;;  %v1527_v31 = vld [vmem:[%s2127_s3 + $0x110] ss:$8 sps:$4 sm:$0xff]   ;;  %v1532_v32 = vld [vmem:[%s2127_s3 + $0x4] ss:$8 sps:$4 sm:$0xff]  }
  0x21   :  { %v1535_v33 = vld [vmem:[%s2127_s3 + $0x104] ss:$8 sps:$4 sm:$0xff]  }
  0x23   :  { %465 = vmatpush2.bf16.msra.mxu0 %v1444_v34  ;;  %506 = vmatpush2.bf16.msra.mxu1 %v1445_v35  ;;  %v1530_v34 = vld [vmem:[%s2127_s3] ss:$8 sps:$4 sm:$0xff]  }
  0x24   :  { %466 = vmatprep.subr.bf16.mxu0 %v1446_v36  ;;  %507 = vmatprep.subr.bf16.mxu1 %v1448_v37  ;;  %v1533_v35 = vld [vmem:[%s2127_s3 + $0x100] ss:$8 sps:$4 sm:$0xff]   ;;  %v1538_v36 = vld [vmem:[%s2127_s3 + $0xf4] ss:$8 sps:$4 sm:$0xff]  }
  0x25   :  { %v1541_v37 = vld [vmem:[%s2127_s3 + $0x1f4] ss:$8 sps:$4 sm:$0xff]  }
  0x27   :  { %467 = vmatpush2.bf16.msra.mxu0 %v1450_v38  ;;  %508 = vmatpush2.bf16.msra.mxu1 %v1451_v39 }
  0x28   :  { %468 = vmatprep.subr.bf16.mxu0 %v1452_v40  ;;  %509 = vmatprep.subr.bf16.mxu1 %v1454_v41 }
  0x2b   :  { %469 = vmatpush2.bf16.msra.mxu0 %v1456_v42  ;;  %510 = vmatpush2.bf16.msra.mxu1 %v1457_v43 }
  0x2c   :  { %470 = vmatprep.subr.bf16.mxu0 %v1458_v44  ;;  %511 = vmatprep.subr.bf16.mxu1 %v1460_v45 }
  0x2f   :  { %471 = vmatpush2.bf16.msra.mxu0 %v1462_v47  ;;  %512 = vmatpush2.bf16.msra.mxu1 %v1463_v48 }
  0x30   :  { %472 = vmatprep.subr.bf16.mxu0 %v1464_v50  ;;  %513 = vmatprep.subr.bf16.mxu1 %v1466_v51 }
  0x33   :  { %473 = vmatpush2.bf16.msra.mxu0 %v1468_v53  ;;  %514 = vmatpush2.bf16.msra.mxu1 %v1469_v54 }
  0x34   :  { %474 = vmatprep.subr.bf16.mxu0 %v1470_v55  ;;  %515 = vmatprep.subr.bf16.mxu1 %v1472_v56 }
  0x37   :  { %475 = vmatpush2.bf16.msra.mxu0 %v1474_v57  ;;  %516 = vmatpush2.bf16.msra.mxu1 %v1475_v58 }
  0x38   :  { %476 = vmatprep.subr.bf16.mxu0 %v1476_v59  ;;  %517 = vmatprep.subr.bf16.mxu1 %v1478_v60 }
  0x3b   :  { %477 = vmatpush2.bf16.msra.mxu0 %v1480_v61  ;;  %518 = vmatpush2.bf16.msra.mxu1 %v1481_v62 }
  0x3c   :  { %478 = vmatprep.subr.bf16.mxu0 %v1482_v63  ;;  %519 = vmatprep.subr.bf16.mxu1 %v1484_v0 }
  0x3f   :  { %479 = vmatpush2.bf16.msra.mxu0 %v1486_v1  ;;  %520 = vmatpush2.bf16.msra.mxu1 %v1487_v2 }
  0x40   :  { %942 = vmatprep.subr.bf16.mxu0 %v1490_v3  ;;  %983 = vmatprep.subr.bf16.mxu1 %v1493_v4 }
  0x42   :  { %481 = vmatmul.mubr.bf16.vlgmr.msra.gmra.mxu0 %v40_v5  ;;  %522 = vmatmul.mubr.bf16.vlgmr.msra.gmra.mxu1 %v40_v5 }
  0x43   :  { %943 = vmatpush1.bf16.msra.mxu0 %v1488_v6  ;;  %984 = vmatpush1.bf16.msra.mxu1 %v1491_v7 }
  0x44   :  { %944 = vmatprep.subr.bf16.mxu0 %v1496_v8  ;;  %985 = vmatprep.subr.bf16.mxu1 %v1499_v9 }
  0x47   :  { %945 = vmatpush1.bf16.msra.mxu0 %v1494_v10  ;;  %986 = vmatpush1.bf16.msra.mxu1 %v1497_v11 }
  0x48   :  { %946 = vmatprep.subr.bf16.mxu0 %v1502_v12  ;;  %987 = vmatprep.subr.bf16.mxu1 %v1505_v13 }
  0x4b   :  { %947 = vmatpush1.bf16.msra.mxu0 %v1500_v14  ;;  %988 = vmatpush1.bf16.msra.mxu1 %v1503_v15 }
  0x4c   :  { %948 = vmatprep.subr.bf16.mxu0 %v1508_v16  ;;  %989 = vmatprep.subr.bf16.mxu1 %v1511_v17 }
  0x4f   :  { %949 = vmatpush1.bf16.msra.mxu0 %v1506_v18  ;;  %990 = vmatpush1.bf16.msra.mxu1 %v1509_v19 }
  0x50   :  { %950 = vmatprep.subr.bf16.mxu0 %v1514_v20  ;;  %991 = vmatprep.subr.bf16.mxu1 %v1517_v21 }
  0x53   :  { %951 = vmatpush1.bf16.msra.mxu0 %v1512_v22  ;;  %992 = vmatpush1.bf16.msra.mxu1 %v1515_v23 }
  0x54   :  { %952 = vmatprep.subr.bf16.mxu0 %v1520_v24  ;;  %993 = vmatprep.subr.bf16.mxu1 %v1523_v25 }
  0x57   :  { %953 = vmatpush1.bf16.msra.mxu0 %v1518_v26  ;;  %994 = vmatpush1.bf16.msra.mxu1 %v1521_v27 }
  0x58   :  { %954 = vmatprep.subr.bf16.mxu0 %v1526_v28  ;;  %995 = vmatprep.subr.bf16.mxu1 %v1529_v29 }
  0x5b   :  { %955 = vmatpush1.bf16.msra.mxu0 %v1524_v30  ;;  %996 = vmatpush1.bf16.msra.mxu1 %v1527_v31 }
  0x5c   :  { %956 = vmatprep.subr.bf16.mxu0 %v1532_v32  ;;  %997 = vmatprep.subr.bf16.mxu1 %v1535_v33 }
  0x5d   :  { %12 = vsyncpa [#allocation3], 0  ;;  %v1536_v38 = vld [vmem:[%s2127_s3 + $0xf0] ss:$8 sps:$4 sm:$0xff]   ;;  %v1544_v40 = vld [vmem:[%s2127_s3 + $0xe4] ss:$8 sps:$4 sm:$0xff]   ;;  %v108_v5 = vlaneseq }
  0x5e   :  { %v1539_v39 = vld [vmem:[%s2127_s3 + $0x1f0] ss:$8 sps:$4 sm:$0xff]   ;;  %v1547_v41 = vld [vmem:[%s2127_s3 + $0x1e4] ss:$8 sps:$4 sm:$0xff]   ;;  %v1542_v42 = vld [vmem:[%s2127_s3 + $0xe0] ss:$8 sps:$4 sm:$0xff]  }
  0x5f   :  { %957 = vmatpush1.bf16.msra.mxu0 %v1530_v34  ;;  %998 = vmatpush1.bf16.msra.mxu1 %v1533_v35  ;;  %v1545_v43 = vld [vmem:[%s2127_s3 + $0x1e0] ss:$8 sps:$4 sm:$0xff]   ;;  %v1550_v44 = vld [vmem:[%s2127_s3 + $0xd4] ss:$8 sps:$4 sm:$0xff]   ;;  %v1548_v46 = vld [vmem:[%s2127_s3 + $0xd0] ss:$8 sps:$4 sm:$0xff]  }
  0x60   :  { %958 = vmatprep.subr.bf16.mxu0 %v1538_v36  ;;  %999 = vmatprep.subr.bf16.mxu1 %v1541_v37  ;;  %v1553_v45 = vld [vmem:[%s2127_s3 + $0x1d4] ss:$8 sps:$4 sm:$0xff]   ;;  %v1551_v47 = vld [vmem:[%s2127_s3 + $0x1d0] ss:$8 sps:$4 sm:$0xff]   ;;  %v1556_v48 = vld [vmem:[%s2127_s3 + $0xc4] ss:$8 sps:$4 sm:$0xff]  }
  0x61   :  { %v1559_v49 = vld [vmem:[%s2127_s3 + $0x1c4] ss:$8 sps:$4 sm:$0xff]   ;;  %v1554_v50 = vld [vmem:[%s2127_s3 + $0xc0] ss:$8 sps:$4 sm:$0xff]   ;;  %v1562_v52 = vld [vmem:[%s2127_s3 + $0xb4] ss:$8 sps:$4 sm:$0xff]  }
  0x62   :  { %v1557_v51 = vld [vmem:[%s2127_s3 + $0x1c0] ss:$8 sps:$4 sm:$0xff]   ;;  %v1565_v53 = vld [vmem:[%s2127_s3 + $0x1b4] ss:$8 sps:$4 sm:$0xff]   ;;  %v1560_v54 = vld [vmem:[%s2127_s3 + $0xb0] ss:$8 sps:$4 sm:$0xff]  }
  0x63   :  { %959 = vmatpush2.bf16.msra.mxu0 %v1536_v38  ;;  %1000 = vmatpush2.bf16.msra.mxu1 %v1539_v39  ;;  %v1563_v55 = vld [vmem:[%s2127_s3 + $0x1b0] ss:$8 sps:$4 sm:$0xff]   ;;  %v1568_v56 = vld [vmem:[%s2127_s3 + $0xa4] ss:$8 sps:$4 sm:$0xff]   ;;  %v1566_v58 = vld [vmem:[%s2127_s3 + $0xa0] ss:$8 sps:$4 sm:$0xff]  }
  0x64   :  { %960 = vmatprep.subr.bf16.mxu0 %v1544_v40  ;;  %1001 = vmatprep.subr.bf16.mxu1 %v1547_v41  ;;  %v1571_v57 = vld [vmem:[%s2127_s3 + $0x1a4] ss:$8 sps:$4 sm:$0xff]   ;;  %v1569_v59 = vld [vmem:[%s2127_s3 + $0x1a0] ss:$8 sps:$4 sm:$0xff]   ;;  %v1574_v60 = vld [vmem:[%s2127_s3 + $0x94] ss:$8 sps:$4 sm:$0xff]  }
  0x65   :  { %v1577_v61 = vld [vmem:[%s2127_s3 + $0x194] ss:$8 sps:$4 sm:$0xff]   ;;  %v1572_v62 = vld [vmem:[%s2127_s3 + $0x90] ss:$8 sps:$4 sm:$0xff]   ;;  %v1578_v0 = vld [vmem:[%s2127_s3 + $0x80] ss:$8 sps:$4 sm:$0xff]  }
  0x66   :  { %v1575_v63 = vld [vmem:[%s2127_s3 + $0x190] ss:$8 sps:$4 sm:$0xff]   ;;  %v1580_v1 = vld [vmem:[%s2127_s3 + $0x84] ss:$8 sps:$4 sm:$0xff]   ;;  %v1581_v2 = vld [vmem:[%s2127_s3 + $0x180] ss:$8 sps:$4 sm:$0xff]  }
  0x67   :  { %961 = vmatpush2.bf16.msra.mxu0 %v1542_v42  ;;  %1002 = vmatpush2.bf16.msra.mxu1 %v1545_v43  ;;  %v1583_v3 = vld [vmem:[%s2127_s3 + $0x184] ss:$8 sps:$4 sm:$0xff]   ;;  %v1584_v4 = vld [vmem:[%s2129_s5 + $0x78] sm:$0xff]   ;;  %v2053_v6 = vshrl.u32 %v108_v5, 7  ;;  %v106_v9 = vld [vmem:[%s2126_s2] sm:$0xf] }
  0x68   :  { %962 = vmatprep.subr.bf16.mxu0 %v1550_v44  ;;  %1003 = vmatprep.subr.bf16.mxu1 %v1553_v45  ;;  %v1585_v37 = vld [vmem:[%s2129_s5 + $0x38] sm:$0xff]   ;;  %v1586_v40 = vld [vmem:[%s2129_s5 + $0x70] sm:$0xff]   ;;  %v1588_v43 = vld [vmem:[%s2129_s5 + $0x68] sm:$0xff]   ;;  %s1622_s23 = smov [#allocation2]   ;;  %vm1207_vm6 = vcmask 320512  }
  0x69   :  { %v110_v7 = vsub.s32 0, %v2053_v6  ;;  %v118_v8 = vsub.s32 2, %v2053_v6  ;;  %v114_v10 = vsub.s32 1, %v2053_v6  ;;  %v122_v11 = vsub.s32 3, %v2053_v6  ;;  %v1587_v42 = vld [vmem:[%s2129_s5 + $0x30] sm:$0xff]   ;;  %v1589_v44 = vld [vmem:[%s2129_s5 + $0x28] sm:$0xff]  }
  0x6a   :  { %v1590_v45 = vld [vmem:[%s2129_s5 + $0x60] sm:$0xff]   ;;  %s1215_s24 = sshll.u32 %s1622_s23, 4  ;;  %s1216_s24 = int_to_ptr.vmem [resolvable:$true] %s1215_s24 }
  0x6b   :  { %963 = vmatpush2.bf16.msra.mxu0 %v1548_v46  ;;  %1004 = vmatpush2.bf16.msra.mxu1 %v1551_v47  ;;  %v111_v12 = vrot.slane %v106_v9, %v110_v7  ;;  %v119_v13 = vrot.slane %v106_v9, %v118_v8  ;;  %v115_v16 = vrot.slane %v106_v9, %v114_v10  ;;  %v1591_v46 = vld [vmem:[%s2129_s5 + $0x20] sm:$0xff]   ;;  %v1592_v47 = vld [vmem:[%s2129_s5 + $0x58] sm:$0xff]   ;;  %s1600_s25 = scalar_lea.vmem %s1216_s24, 32  ;;  %p1605_p1 = scmp.lt.s32.totalorder %s1216_s24, %s1216_s24 }
  0x6c   :  { %964 = vmatprep.subr.bf16.mxu0 %v1556_v48  ;;  %1005 = vmatprep.subr.bf16.mxu1 %v1559_v49  ;;  %v123_v17 = vrot.slane %v106_v9, %v122_v11  ;;  %v1593_v48 = vld [vmem:[%s2129_s5 + $0x18] sm:$0xff]   ;;  %v1594_v49 = vld [vmem:[%s2129_s5 + $0x50] sm:$0xff]   ;;  %p1601_p0 = scmp.ne.s32.totalorder %s1216_s24, %s1600_s25  ;;  %p1606_p2 = scmp.lt.s32.totalorder %s1600_s25, %s1600_s25 }
  0x6e   :  { %p1607_p3 = por %p1606_p2, %p1605_p1 }
  0x6f   :  { %965 = vmatpush2.bf16.msra.mxu0 %v1554_v50  ;;  %1006 = vmatpush2.bf16.msra.mxu1 %v1557_v51  ;;  %v1595_v50 = vld [vmem:[%s2129_s5 + $0x10] sm:$0xff]   ;;  %v1596_v51 = vld [vmem:[%s2129_s5 + $0x48] sm:$0xff]  }
  0x70   :  { %966 = vmatprep.subr.bf16.mxu0 %v1562_v52  ;;  %1007 = vmatprep.subr.bf16.mxu1 %v1565_v53  ;;  %v1597_v52 = vld [vmem:[%s2129_s5 + $0x8] sm:$0xff]   ;;  %v1598_v53 = vld [vmem:[%s2129_s5 + $0x40] sm:$0xff]   ;;  %p1608_p4 = pnand %p1607_p3, %p1601_p0 }
  0x73   :  { %967 = vmatpush2.bf16.msra.mxu0 %v1560_v54  ;;  %1008 = vmatpush2.bf16.msra.mxu1 %v1563_v55  ;;  %v1599_v54 = vld [vmem:[%s2129_s5] sm:$0xff]  }
  0x74   :  { %968 = vmatprep.subr.bf16.mxu0 %v1568_v56  ;;  %1009 = vmatprep.subr.bf16.mxu1 %v1571_v57  ;;  %v610_v55 = vld [vmem:[%s2128_s4] sm:$0x3] }
  0x75   :  { %v615_v56 = vrot.slane %v610_v55, %v110_v7  ;;  %v619_v57 = vrot.slane %v610_v55, %v114_v10 }
  0x77   :  { %969 = vmatpush2.bf16.msra.mxu0 %v1566_v58  ;;  %1010 = vmatpush2.bf16.msra.mxu1 %v1569_v59 }
  0x78   :  { %970 = vmatprep.subr.bf16.mxu0 %v1574_v60  ;;  %1011 = vmatprep.subr.bf16.mxu1 %v1577_v61 }
  0x7b   :  { %971 = vmatpush2.bf16.msra.mxu0 %v1572_v62  ;;  %1012 = vmatpush2.bf16.msra.mxu1 %v1575_v63 }
  0x7c   :  { %972 = vmatprep.subr.bf16.mxu0 %v1580_v1  ;;  %1013 = vmatprep.subr.bf16.mxu1 %v1583_v3 }
  0x7f   :  { %973 = vmatpush2.bf16.msra.mxu0 %v1578_v0  ;;  %1014 = vmatpush2.bf16.msra.mxu1 %v1581_v2 }
  0x80   :  { %1369 = vmatprep.subr.bf16.mxu0 %v1584_v4 }
 0x102   :  { %v482_v14 = vpop.f32.mrf.mxu0  ;;  %v523_v15 = vpop.f32.mrf.mxu1 }
 0x103   :  { %v483_v18 = vadd.f32 %v482_v14, %v111_v12  ;;  %v524_v19 = vadd.f32 %v523_v15, %v119_v13  ;;  %v1352_v13 = vld [vmem:[%s2130_s6] ss:$0 sm:$0xff] }
 0x104   :  { %v484_v20 = vpop.f32.mrf.mxu0  ;;  %v525_v21 = vpop.f32.mrf.mxu1 }
 0x105   :  { %v534_v22 = vmul.f32 0.2, %v483_v18  ;;  %vm530_vm0 = vcmp.ge.f32.partialorder %v483_v18, 0.0  ;;  %v536_v23 = vmul.f32 0.2, %v524_v19  ;;  %v485_v24 = vadd.f32 %v484_v20, %v115_v16 }
 0x106   :  { %v526_v25 = vadd.f32 %v525_v21, %v123_v17  ;;  %v486_v26 = vpop.f32.mrf.mxu0  ;;  %v527_v27 = vpop.f32.mrf.mxu1  ;;  %vm532_vm1 = vcmp.ge.f32.partialorder %v524_v19, 0.0 }
 0x107   :  { %vm531_vm2 = vcmp.ge.f32.partialorder %v485_v24, 0.0  ;;  %v535_v28 = vmul.f32 0.2, %v485_v24  ;;  %v538_v31 = vsel %vm530_vm0, %v483_v18, %v534_v22  ;;  %v540_v33 = vsel %vm532_vm1, %v524_v19, %v536_v23 }
 0x108   :  { %v487_v29 = vpop.f32.mrf.mxu0  ;;  %v528_v30 = vpop.f32.mrf.mxu1  ;;  %vm533_vm3 = vcmp.ge.f32.partialorder %v526_v25, 0.0  ;;  %v537_v32 = vmul.f32 0.2, %v526_v25  ;;  %v542_v38 = vpack.c.bf16 %v538_v31, %v538_v31  ;;  %v544_v41 = vpack.c.bf16 %v540_v33, %v540_v33 }
 0x109   :  { %v539_v34 = vsel %vm531_vm2, %v485_v24, %v535_v28 }
 0x10a   :  { %v543_v35 = vpack.c.bf16 %v539_v34, %v539_v34  ;;  %v541_v36 = vsel %vm533_vm3, %v526_v25, %v537_v32 }
 0x10b   :  { %v545_v39 = vpack.c.bf16 %v541_v36, %v541_v36 }
 0x10c   :  { %974 = vmatprep.mubr.bf16.mxu0 %v543_v35 }
 0x10d   :  { %1015 = vmatprep.mubr.bf16.mxu1 %v545_v39  ;;  %975 = vmatmul.mubr.bf16.vlgmr.msra.gmra.mxu0 %v542_v38 }
 0x10e   :  { %1016 = vmatmul.mubr.bf16.vlgmr.msra.gmra.mxu1 %v544_v41  ;;  %1370 = vmatpush3.bf16.msra.mxu0 %v1585_v37 }
 0x10f   :  { %1371 = vmatprep.subr.bf16.mxu0 %v1586_v40 }
 0x112   :  { %1372 = vmatpush3.bf16.msra.mxu0 %v1587_v42 }
 0x113   :  { %1373 = vmatprep.subr.bf16.mxu0 %v1588_v43 }
 0x116   :  { %1374 = vmatpush3.bf16.msra.mxu0 %v1589_v44 }
 0x117   :  { %1375 = vmatprep.subr.bf16.mxu0 %v1590_v45 }
 0x11a   :  { %1376 = vmatpush3.bf16.msra.mxu0 %v1591_v46 }
 0x11b   :  { %1377 = vmatprep.subr.bf16.mxu0 %v1592_v47 }
 0x11e   :  { %1378 = vmatpush3.bf16.msra.mxu0 %v1593_v48 }
 0x11f   :  { %1379 = vmatprep.subr.bf16.mxu0 %v1594_v49 }
 0x122   :  { %1380 = vmatpush3.bf16.msra.mxu0 %v1595_v50 }
 0x123   :  { %1381 = vmatprep.subr.bf16.mxu0 %v1596_v51 }
 0x126   :  { %1382 = vmatpush3.bf16.msra.mxu0 %v1597_v52 }
 0x127   :  { %1383 = vmatprep.subr.bf16.mxu0 %v1598_v53 }
 0x12a   :  { %1384 = vmatpush3.bf16.msra.mxu0 %v1599_v54 }
 0x1cd   :  { %v976_v58 = vpop.f32.mrf.mxu0 }
 0x1ce   :  { %v977_v59 = vadd.f32 %v976_v58, %v615_v56  ;;  %v1017_v60 = vpop.f32.mrf.mxu1 }
 0x1cf   :  { %v978_v61 = vpop.f32.mrf.mxu0 }
 0x1d0   :  { %v1018_v62 = vadd.f32 %v1017_v60, %v977_v59  ;;  %v979_v63 = vadd.f32 %v978_v61, %v619_v57  ;;  %v1019_v0 = vpop.f32.mrf.mxu1 }
 0x1d1   :  { %v980_v1 = vpop.f32.mrf.mxu0 }
 0x1d2   :  { %vm1024_vm4 = vcmp.ge.f32.partialorder %v1018_v62, 0.0  ;;  %v1026_v2 = vmul.f32 0.2, %v1018_v62  ;;  %v1020_v3 = vadd.f32 %v1019_v0, %v979_v63  ;;  %v1021_v4 = vpop.f32.mrf.mxu1 }
 0x1d3   :  { %v981_v5 = vpop.f32.mrf.mxu0 }
 0x1d4   :  { %vm1025_vm5 = vcmp.ge.f32.partialorder %v1020_v3, 0.0  ;;  %v1027_v8 = vmul.f32 0.2, %v1020_v3  ;;  %v1022_v9 = vpop.f32.mrf.mxu1  ;;  %v1028_v7 = vsel %vm1024_vm4, %v1018_v62, %v1026_v2 }
 0x1d5   :  { %v1030_v10 = vpack.c.bf16 %v1028_v7, %v1028_v7 }
 0x1d6   :  { %v1029_v11 = vsel %vm1025_vm5, %v1020_v3, %v1027_v8 }
 0x1d7   :  { %v1031_v6 = vpack.c.bf16 %v1029_v11, %v1029_v11 }
 0x1d9   :  { %1199 = vmatprep.mubr.bf16.mxu0 %v1031_v6 }
 0x1da   :  { %1200 = vmatmul.mubr.bf16.vlgmr.msra.gmra.mxu0 %v1030_v10 }
 0x29a   :  { %v1385_v12 = vpop.f32.mrf.mxu0 }
 0x29c   :  { %v1386_v14 = vpop.f32.mrf.mxu0 }
 0x29d   :  { %v1387_v15 = vadd.f32 %v1386_v14, %v1385_v12 }
 0x29e   :  { %v1388_v16 = vpop.f32.mrf.mxu0 }
 0x29f   :  { %v1202_v17 = vadd.f32 %v1387_v15, %v1352_v13 }
 0x2a0   :  { %v1389_v18 = vpop.f32.mrf.mxu0 }
 0x2a1   :  { %1208 = vst.msk [vmem:[#allocation2] sm:$0x3] %vm1207_vm6, %v1202_v17 }
 0x2a2   :  { %1611 = shalt.err (!%p1608_p4)
}
 0x2a3   :  { %1218 = dma.vmem_to_hbm [thread:$0]  %s1216_s24, 32, %s2131_s7, [#allocation3]  }
 0x2a4   :  { %1620 = dma.done.wait [#allocation3], 32  }
 0x2a5   :  { %1621 = vsyncadd [#allocation3], 4294967264 }
 0x2a6   :  { %1222 = vsyncpa [#allocation3], 1 }

</bundles_post_ra>
